<compile_context>
chip_gen: v5e
topology: v5e:2x2
jax: 0.10.0
libtpu: 0.0.40
codegen_flags: <defaults>
</compile_context>

<pallas_src>
import jax
import jax.numpy as jnp
from jax.experimental import pallas as pl
from jax.experimental.pallas import tpu as pltpu

BN_EPS = 1e-5


def _round_up(x, m):
    return (x + m - 1) // m * m


# ----------------------------- Pallas kernel ------------------------------

def _basic_block_kernel(x_ref, w1_ref, b1_ref, w2_ref, b2_ref, o_ref, h1_ref):
    """Fused conv1+bn1+relu -> conv2+bn2+residual+relu for one image.

    x_ref : (1, H+2, W+2, C)  f32   spatially pre-padded input (also residual)
    w*_ref: (9, C, C)         bf16  per-tap weights with BN scale folded in
    b*_ref: (1, C)            f32   folded BN bias
    o_ref : (1, H, W, C)      f32   output block
    h1_ref: (H+2, W+2, C)     f32   VMEM scratch: conv1 output + zero halo
    """
    _, hh, ww, c = o_ref.shape

    # ---- conv1 (+ folded bn1) + relu: 9 shifted MXU dots, f32 accumulation.
    acc = jnp.zeros((hh * ww, c), jnp.float32)
    for t in range(9):
        kh, kw = divmod(t, 3)
        a = x_ref[0, kh:kh + hh, kw:kw + ww, :].astype(jnp.bfloat16)
        acc = acc + jnp.dot(a.reshape(hh * ww, c), w1_ref[t],
                            preferred_element_type=jnp.float32)
    y1 = jnp.maximum(acc + b1_ref[...], 0.0)

    # Stage conv1 output in VMEM with a 1-pixel zero halo (= conv2's padding);
    # the intermediate activation never touches HBM.
    h1_ref[...] = jnp.zeros_like(h1_ref)
    h1_ref[1:1 + hh, 1:1 + ww, :] = y1.reshape(hh, ww, c)

    # ---- conv2 (+ folded bn2) + residual + relu.
    acc2 = jnp.zeros((hh * ww, c), jnp.float32)
    for t in range(9):
        kh, kw = divmod(t, 3)
        a = h1_ref[kh:kh + hh, kw:kw + ww, :].astype(jnp.bfloat16)
        acc2 = acc2 + jnp.dot(a.reshape(hh * ww, c), w2_ref[t],
                              preferred_element_type=jnp.float32)
    residual = x_ref[0, 1:1 + hh, 1:1 + ww, :].reshape(hh * ww, c)
    y2 = jnp.maximum(acc2 + b2_ref[...] + residual, 0.0)
    o_ref[...] = y2.reshape(1, hh, ww, c).astype(o_ref.dtype)


# ------------------------------ host-side glue -----------------------------

def _fold_conv_bn(w_oihw, gamma, beta, mean, var, c_pad):
    """(Cout,Cin,3,3) torch weight + BN stats -> bf16 (9, C_pad, C_pad) per-tap
    weight with BN scale folded into the output columns, and f32 (1, C_pad)
    folded bias."""
    cout, cin, _, _ = w_oihw.shape
    scale = gamma / jnp.sqrt(var + BN_EPS)
    bias = beta - mean * scale
    w = jnp.transpose(w_oihw, (2, 3, 1, 0)).reshape(9, cin, cout)  # tap=(kh,kw)
    w = w * scale[None, None, :]                                   # fold BN scale
    w = jnp.pad(w, ((0, 0), (0, c_pad - cin), (0, c_pad - cout)))
    b = jnp.pad(bias, (0, c_pad - cout)).reshape(1, c_pad)
    return w.astype(jnp.bfloat16), b.astype(jnp.float32)


def basic_block_forward(x_nchw, params):
    """BasicBlock.forward (stride=1, downsample=None)."""
    n, cin, h, w = x_nchw.shape
    planes = params["w1"].shape[0]
    assert cin == planes, "stride=1 / downsample=None requires inplanes == planes"
    c_pad = _round_up(max(planes, 128), 128)       # lane-dense channels

    x_nhwc = jnp.transpose(x_nchw, (0, 2, 3, 1)).astype(jnp.float32)
    # +1 spatial halo for conv1; zero channel padding is mathematically inert.
    x_pad = jnp.pad(x_nhwc, ((0, 0), (1, 1), (1, 1), (0, c_pad - cin)))

    w1, b1 = _fold_conv_bn(params["w1"], params["g1"], params["be1"],
                           params["m1"], params["v1"], c_pad)
    w2, b2 = _fold_conv_bn(params["w2"], params["g2"], params["be2"],
                           params["m2"], params["v2"], c_pad)

    flops = 2 * (2 * n * h * w * (9 * c_pad) * c_pad)
    bytes_accessed = (x_pad.size * 4 + w1.size * 2 + w2.size * 2
                      + b1.size * 4 + b2.size * 4 + n * h * w * c_pad * 4)

    out = pl.pallas_call(
        _basic_block_kernel,
        out_shape=jax.ShapeDtypeStruct((n, h, w, c_pad), jnp.float32),
        grid_spec=pltpu.PrefetchScalarGridSpec(
            num_scalar_prefetch=0,
            grid=(n,),
            in_specs=[
                pl.BlockSpec((1, h + 2, w + 2, c_pad), lambda i: (i, 0, 0, 0)),
                pl.BlockSpec((9, c_pad, c_pad), lambda i: (0, 0, 0)),
                pl.BlockSpec((1, c_pad), lambda i: (0, 0)),
                pl.BlockSpec((9, c_pad, c_pad), lambda i: (0, 0, 0)),
                pl.BlockSpec((1, c_pad), lambda i: (0, 0)),
            ],
            out_specs=pl.BlockSpec((1, h, w, c_pad), lambda i: (i, 0, 0, 0)),
            scratch_shapes=[pltpu.VMEM((h + 2, w + 2, c_pad), jnp.float32)],
        ),
        compiler_params=pltpu.CompilerParams(
            dimension_semantics=("parallel",),          # megacore: shard batch
            vmem_limit_bytes=48 * 1024 * 1024,          # within v7x's 64 MiB too
        ),
        cost_estimate=pl.CostEstimate(flops=flops, transcendentals=0,
                                      bytes_accessed=bytes_accessed),
    )(x_pad, w1, b1, w2, b2)

    out = out[..., :planes]                       # drop channel padding
    return jnp.transpose(out, (0, 3, 1, 2))       # back to NCHW


# ------------------------------ pure-JAX reference -------------------------

def _ref_forward(x_nchw, params):
    x = jnp.transpose(x_nchw, (0, 2, 3, 1)).astype(jnp.float32)

    def conv(xx, w_oihw):
        return jax.lax.conv_general_dilated(
            xx, jnp.transpose(w_oihw, (2, 3, 1, 0)),
            window_strides=(1, 1), padding=((1, 1), (1, 1)),
            dimension_numbers=("NHWC", "HWIO", "NHWC"))

    def bn(xx, g, b, m, v):
        return (xx - m) / jnp.sqrt(v + BN_EPS) * g + b

    out = conv(x, params["w1"])
    out = bn(out, params["g1"], params["be1"], params["m1"], params["v1"])
    out = jnp.maximum(out, 0.0)
    out = conv(out, params["w2"])
    out = bn(out, params["g2"], params["be2"], params["m2"], params["v2"])
    out = out + x
    out = jnp.maximum(out, 0.0)
    return jnp.transpose(out, (0, 3, 1, 2))


# ---------------------------------- main ------------------------------------

if __name__ == "__main__":
    key = jax.random.PRNGKey(0)
    batch, inplanes, planes, spatial = 2, 4, 4, 16  # stride=1, no downsample

    ks = jax.random.split(key, 11)
    x = jax.random.normal(ks[0], (batch, inplanes, spatial, spatial), jnp.float32)

    params = {
        "w1": 0.1 * jax.random.normal(ks[1], (planes, inplanes, 3, 3), jnp.float32),
        "g1": 1.0 + 0.1 * jax.random.normal(ks[2], (planes,), jnp.float32),
        "be1": 0.1 * jax.random.normal(ks[3], (planes,), jnp.float32),
        "m1": 0.1 * jax.random.normal(ks[4], (planes,), jnp.float32),
        "v1": jax.random.uniform(ks[5], (planes,), jnp.float32, 0.5, 1.5),
        "w2": 0.1 * jax.random.normal(ks[6], (planes, planes, 3, 3), jnp.float32),
        "g2": 1.0 + 0.1 * jax.random.normal(ks[7], (planes,), jnp.float32),
        "be2": 0.1 * jax.random.normal(ks[8], (planes,), jnp.float32),
        "m2": 0.1 * jax.random.normal(ks[9], (planes,), jnp.float32),
        "v2": jax.random.uniform(ks[10], (planes,), jnp.float32, 0.5, 1.5),
    }

    fwd = jax.jit(basic_block_forward)
    out = jax.block_until_ready(fwd(x, params))
    ref = jax.block_until_ready(_ref_forward(x, params))

    assert out.shape == (batch, planes, spatial, spatial)
    # bf16 MXU operands (f32 accumulation) vs the pure-f32 reference.
    assert jnp.allclose(out, ref, atol=5e-2, rtol=5e-2), "mismatch vs JAX reference"

    print("KERNEL_OK")
</pallas_src>

<mosaic_0001>
module attributes {stable_mosaic.version = 11 : i64} {
  func.func @_basic_block_kernel(%arg0: i32, %arg1: memref<1x18x18x128xf32, #tpu.memory_space<vmem>>, %arg2: memref<9x128x128xbf16, #tpu.memory_space<vmem>>, %arg3: memref<1x128xf32, #tpu.memory_space<vmem>>, %arg4: memref<9x128x128xbf16, #tpu.memory_space<vmem>>, %arg5: memref<1x128xf32, #tpu.memory_space<vmem>>, %arg6: memref<1x16x16x128xf32, #tpu.memory_space<vmem>>, %arg7: memref<18x18x128xf32, #tpu.memory_space<vmem>>) attributes {dimension_semantics = [#tpu.dimension_semantics<parallel>], iteration_bounds = array<i64: 2>, scalar_prefetch = 0 : i64, scratch_operands = 1 : i64, tpu.core_type = #tpu.core_type<tc>, window_params = [{transform_indices = @transform_0, window_bounds = array<i64: 1, 18, 18, 128>}, {pipeline_mode = #tpu.pipeline_mode<synchronous>, transform_indices = @transform_1, window_bounds = array<i64: 9, 128, 128>}, {pipeline_mode = #tpu.pipeline_mode<synchronous>, transform_indices = @transform_2, window_bounds = array<i64: 1, 128>}, {pipeline_mode = #tpu.pipeline_mode<synchronous>, transform_indices = @transform_3, window_bounds = array<i64: 9, 128, 128>}, {pipeline_mode = #tpu.pipeline_mode<synchronous>, transform_indices = @transform_4, window_bounds = array<i64: 1, 128>}, {transform_indices = @transform_5, window_bounds = array<i64: 1, 16, 16, 128>}]} {
    %cst = arith.constant 0.000000e+00 : f32
    %0 = vector.broadcast %cst : f32 to vector<256x128xf32>
    %c0 = arith.constant 0 : index
    %c0_0 = arith.constant 0 : index
    %c0_1 = arith.constant 0 : index
    %c0_2 = arith.constant 0 : index
    %1 = vector.load %arg1[%c0, %c0_0, %c0_1, %c0_2] : memref<1x18x18x128xf32, #tpu.memory_space<vmem>>, vector<1x16x16x128xf32>
    %2 = vector.shape_cast %1 : vector<1x16x16x128xf32> to vector<16x16x128xf32>
    %3 = arith.truncf %2 : vector<16x16x128xf32> to vector<16x16x128xbf16>
    %4 = vector.shape_cast %3 : vector<16x16x128xbf16> to vector<256x128xbf16>
    %c0_3 = arith.constant 0 : index
    %c0_4 = arith.constant 0 : index
    %c0_5 = arith.constant 0 : index
    %5 = vector.load %arg2[%c0_3, %c0_4, %c0_5] : memref<9x128x128xbf16, #tpu.memory_space<vmem>>, vector<1x128x128xbf16>
    %6 = vector.shape_cast %5 : vector<1x128x128xbf16> to vector<128x128xbf16>
    %cst_6 = arith.constant dense<0.000000e+00> : vector<256x128xf32>
    %7 = tpu.matmul %4, %6, %cst_6 {dimension_numbers = #tpu.dot_dimension_numbers<[1], [0], [0], [1], [0, 0, 1, 1], [], []>} : vector<256x128xbf16>, vector<128x128xbf16>, vector<256x128xf32> -> vector<256x128xf32>
    %8 = arith.addf %0, %7 : vector<256x128xf32>
    %c0_7 = arith.constant 0 : index
    %c0_8 = arith.constant 0 : index
    %c1 = arith.constant 1 : index
    %c0_9 = arith.constant 0 : index
    %9 = vector.load %arg1[%c0_7, %c0_8, %c1, %c0_9] : memref<1x18x18x128xf32, #tpu.memory_space<vmem>>, vector<1x16x16x128xf32>
    %10 = vector.shape_cast %9 : vector<1x16x16x128xf32> to vector<16x16x128xf32>
    %11 = arith.truncf %10 : vector<16x16x128xf32> to vector<16x16x128xbf16>
    %12 = vector.shape_cast %11 : vector<16x16x128xbf16> to vector<256x128xbf16>
    %c1_10 = arith.constant 1 : index
    %c0_11 = arith.constant 0 : index
    %c0_12 = arith.constant 0 : index
    %13 = vector.load %arg2[%c1_10, %c0_11, %c0_12] : memref<9x128x128xbf16, #tpu.memory_space<vmem>>, vector<1x128x128xbf16>
    %14 = vector.shape_cast %13 : vector<1x128x128xbf16> to vector<128x128xbf16>
    %cst_13 = arith.constant dense<0.000000e+00> : vector<256x128xf32>
    %15 = tpu.matmul %12, %14, %cst_13 {dimension_numbers = #tpu.dot_dimension_numbers<[1], [0], [0], [1], [0, 0, 1, 1], [], []>} : vector<256x128xbf16>, vector<128x128xbf16>, vector<256x128xf32> -> vector<256x128xf32>
    %16 = arith.addf %8, %15 : vector<256x128xf32>
    %c0_14 = arith.constant 0 : index
    %c0_15 = arith.constant 0 : index
    %c2 = arith.constant 2 : index
    %c0_16 = arith.constant 0 : index
    %17 = vector.load %arg1[%c0_14, %c0_15, %c2, %c0_16] : memref<1x18x18x128xf32, #tpu.memory_space<vmem>>, vector<1x16x16x128xf32>
    %18 = vector.shape_cast %17 : vector<1x16x16x128xf32> to vector<16x16x128xf32>
    %19 = arith.truncf %18 : vector<16x16x128xf32> to vector<16x16x128xbf16>
    %20 = vector.shape_cast %19 : vector<16x16x128xbf16> to vector<256x128xbf16>
    %c2_17 = arith.constant 2 : index
    %c0_18 = arith.constant 0 : index
    %c0_19 = arith.constant 0 : index
    %21 = vector.load %arg2[%c2_17, %c0_18, %c0_19] : memref<9x128x128xbf16, #tpu.memory_space<vmem>>, vector<1x128x128xbf16>
    %22 = vector.shape_cast %21 : vector<1x128x128xbf16> to vector<128x128xbf16>
    %cst_20 = arith.constant dense<0.000000e+00> : vector<256x128xf32>
    %23 = tpu.matmul %20, %22, %cst_20 {dimension_numbers = #tpu.dot_dimension_numbers<[1], [0], [0], [1], [0, 0, 1, 1], [], []>} : vector<256x128xbf16>, vector<128x128xbf16>, vector<256x128xf32> -> vector<256x128xf32>
    %24 = arith.addf %16, %23 : vector<256x128xf32>
    %c0_21 = arith.constant 0 : index
    %c1_22 = arith.constant 1 : index
    %c0_23 = arith.constant 0 : index
    %c0_24 = arith.constant 0 : index
    %25 = vector.load %arg1[%c0_21, %c1_22, %c0_23, %c0_24] : memref<1x18x18x128xf32, #tpu.memory_space<vmem>>, vector<1x16x16x128xf32>
    %26 = vector.shape_cast %25 : vector<1x16x16x128xf32> to vector<16x16x128xf32>
    %27 = arith.truncf %26 : vector<16x16x128xf32> to vector<16x16x128xbf16>
    %28 = vector.shape_cast %27 : vector<16x16x128xbf16> to vector<256x128xbf16>
    %c3 = arith.constant 3 : index
    %c0_25 = arith.constant 0 : index
    %c0_26 = arith.constant 0 : index
    %29 = vector.load %arg2[%c3, %c0_25, %c0_26] : memref<9x128x128xbf16, #tpu.memory_space<vmem>>, vector<1x128x128xbf16>
    %30 = vector.shape_cast %29 : vector<1x128x128xbf16> to vector<128x128xbf16>
    %cst_27 = arith.constant dense<0.000000e+00> : vector<256x128xf32>
    %31 = tpu.matmul %28, %30, %cst_27 {dimension_numbers = #tpu.dot_dimension_numbers<[1], [0], [0], [1], [0, 0, 1, 1], [], []>} : vector<256x128xbf16>, vector<128x128xbf16>, vector<256x128xf32> -> vector<256x128xf32>
    %32 = arith.addf %24, %31 : vector<256x128xf32>
    %c0_28 = arith.constant 0 : index
    %c1_29 = arith.constant 1 : index
    %c1_30 = arith.constant 1 : index
    %c0_31 = arith.constant 0 : index
    %33 = vector.load %arg1[%c0_28, %c1_29, %c1_30, %c0_31] : memref<1x18x18x128xf32, #tpu.memory_space<vmem>>, vector<1x16x16x128xf32>
    %34 = vector.shape_cast %33 : vector<1x16x16x128xf32> to vector<16x16x128xf32>
    %35 = arith.truncf %34 : vector<16x16x128xf32> to vector<16x16x128xbf16>
    %36 = vector.shape_cast %35 : vector<16x16x128xbf16> to vector<256x128xbf16>
    %c4 = arith.constant 4 : index
    %c0_32 = arith.constant 0 : index
    %c0_33 = arith.constant 0 : index
    %37 = vector.load %arg2[%c4, %c0_32, %c0_33] : memref<9x128x128xbf16, #tpu.memory_space<vmem>>, vector<1x128x128xbf16>
    %38 = vector.shape_cast %37 : vector<1x128x128xbf16> to vector<128x128xbf16>
    %cst_34 = arith.constant dense<0.000000e+00> : vector<256x128xf32>
    %39 = tpu.matmul %36, %38, %cst_34 {dimension_numbers = #tpu.dot_dimension_numbers<[1], [0], [0], [1], [0, 0, 1, 1], [], []>} : vector<256x128xbf16>, vector<128x128xbf16>, vector<256x128xf32> -> vector<256x128xf32>
    %40 = arith.addf %32, %39 : vector<256x128xf32>
    %c0_35 = arith.constant 0 : index
    %c1_36 = arith.constant 1 : index
    %c2_37 = arith.constant 2 : index
    %c0_38 = arith.constant 0 : index
    %41 = vector.load %arg1[%c0_35, %c1_36, %c2_37, %c0_38] : memref<1x18x18x128xf32, #tpu.memory_space<vmem>>, vector<1x16x16x128xf32>
    %42 = vector.shape_cast %41 : vector<1x16x16x128xf32> to vector<16x16x128xf32>
    %43 = arith.truncf %42 : vector<16x16x128xf32> to vector<16x16x128xbf16>
    %44 = vector.shape_cast %43 : vector<16x16x128xbf16> to vector<256x128xbf16>
    %c5 = arith.constant 5 : index
    %c0_39 = arith.constant 0 : index
    %c0_40 = arith.constant 0 : index
    %45 = vector.load %arg2[%c5, %c0_39, %c0_40] : memref<9x128x128xbf16, #tpu.memory_space<vmem>>, vector<1x128x128xbf16>
    %46 = vector.shape_cast %45 : vector<1x128x128xbf16> to vector<128x128xbf16>
    %cst_41 = arith.constant dense<0.000000e+00> : vector<256x128xf32>
    %47 = tpu.matmul %44, %46, %cst_41 {dimension_numbers = #tpu.dot_dimension_numbers<[1], [0], [0], [1], [0, 0, 1, 1], [], []>} : vector<256x128xbf16>, vector<128x128xbf16>, vector<256x128xf32> -> vector<256x128xf32>
    %48 = arith.addf %40, %47 : vector<256x128xf32>
    %c0_42 = arith.constant 0 : index
    %c2_43 = arith.constant 2 : index
    %c0_44 = arith.constant 0 : index
    %c0_45 = arith.constant 0 : index
    %49 = vector.load %arg1[%c0_42, %c2_43, %c0_44, %c0_45] : memref<1x18x18x128xf32, #tpu.memory_space<vmem>>, vector<1x16x16x128xf32>
    %50 = vector.shape_cast %49 : vector<1x16x16x128xf32> to vector<16x16x128xf32>
    %51 = arith.truncf %50 : vector<16x16x128xf32> to vector<16x16x128xbf16>
    %52 = vector.shape_cast %51 : vector<16x16x128xbf16> to vector<256x128xbf16>
    %c6 = arith.constant 6 : index
    %c0_46 = arith.constant 0 : index
    %c0_47 = arith.constant 0 : index
    %53 = vector.load %arg2[%c6, %c0_46, %c0_47] : memref<9x128x128xbf16, #tpu.memory_space<vmem>>, vector<1x128x128xbf16>
    %54 = vector.shape_cast %53 : vector<1x128x128xbf16> to vector<128x128xbf16>
    %cst_48 = arith.constant dense<0.000000e+00> : vector<256x128xf32>
    %55 = tpu.matmul %52, %54, %cst_48 {dimension_numbers = #tpu.dot_dimension_numbers<[1], [0], [0], [1], [0, 0, 1, 1], [], []>} : vector<256x128xbf16>, vector<128x128xbf16>, vector<256x128xf32> -> vector<256x128xf32>
    %56 = arith.addf %48, %55 : vector<256x128xf32>
    %c0_49 = arith.constant 0 : index
    %c2_50 = arith.constant 2 : index
    %c1_51 = arith.constant 1 : index
    %c0_52 = arith.constant 0 : index
    %57 = vector.load %arg1[%c0_49, %c2_50, %c1_51, %c0_52] : memref<1x18x18x128xf32, #tpu.memory_space<vmem>>, vector<1x16x16x128xf32>
    %58 = vector.shape_cast %57 : vector<1x16x16x128xf32> to vector<16x16x128xf32>
    %59 = arith.truncf %58 : vector<16x16x128xf32> to vector<16x16x128xbf16>
    %60 = vector.shape_cast %59 : vector<16x16x128xbf16> to vector<256x128xbf16>
    %c7 = arith.constant 7 : index
    %c0_53 = arith.constant 0 : index
    %c0_54 = arith.constant 0 : index
    %61 = vector.load %arg2[%c7, %c0_53, %c0_54] : memref<9x128x128xbf16, #tpu.memory_space<vmem>>, vector<1x128x128xbf16>
    %62 = vector.shape_cast %61 : vector<1x128x128xbf16> to vector<128x128xbf16>
    %cst_55 = arith.constant dense<0.000000e+00> : vector<256x128xf32>
    %63 = tpu.matmul %60, %62, %cst_55 {dimension_numbers = #tpu.dot_dimension_numbers<[1], [0], [0], [1], [0, 0, 1, 1], [], []>} : vector<256x128xbf16>, vector<128x128xbf16>, vector<256x128xf32> -> vector<256x128xf32>
    %64 = arith.addf %56, %63 : vector<256x128xf32>
    %c0_56 = arith.constant 0 : index
    %c2_57 = arith.constant 2 : index
    %c2_58 = arith.constant 2 : index
    %c0_59 = arith.constant 0 : index
    %65 = vector.load %arg1[%c0_56, %c2_57, %c2_58, %c0_59] : memref<1x18x18x128xf32, #tpu.memory_space<vmem>>, vector<1x16x16x128xf32>
    %66 = vector.shape_cast %65 : vector<1x16x16x128xf32> to vector<16x16x128xf32>
    %67 = arith.truncf %66 : vector<16x16x128xf32> to vector<16x16x128xbf16>
    %68 = vector.shape_cast %67 : vector<16x16x128xbf16> to vector<256x128xbf16>
    %c8 = arith.constant 8 : index
    %c0_60 = arith.constant 0 : index
    %c0_61 = arith.constant 0 : index
    %69 = vector.load %arg2[%c8, %c0_60, %c0_61] : memref<9x128x128xbf16, #tpu.memory_space<vmem>>, vector<1x128x128xbf16>
    %70 = vector.shape_cast %69 : vector<1x128x128xbf16> to vector<128x128xbf16>
    %cst_62 = arith.constant dense<0.000000e+00> : vector<256x128xf32>
    %71 = tpu.matmul %68, %70, %cst_62 {dimension_numbers = #tpu.dot_dimension_numbers<[1], [0], [0], [1], [0, 0, 1, 1], [], []>} : vector<256x128xbf16>, vector<128x128xbf16>, vector<256x128xf32> -> vector<256x128xf32>
    %72 = arith.addf %64, %71 : vector<256x128xf32>
    %c0_63 = arith.constant 0 : index
    %c0_64 = arith.constant 0 : index
    %73 = vector.load %arg3[%c0_63, %c0_64] : memref<1x128xf32, #tpu.memory_space<vmem>>, vector<1x128xf32>
    %74 = vector.broadcast %73 : vector<1x128xf32> to vector<256x128xf32>
    %75 = arith.addf %72, %74 : vector<256x128xf32>
    %cst_65 = arith.constant 0.000000e+00 : f32
    %76 = vector.broadcast %cst_65 : f32 to vector<256x128xf32>
    %77 = arith.maximumf %75, %76 : vector<256x128xf32>
    %cst_66 = arith.constant 0.000000e+00 : f32
    %78 = vector.broadcast %cst_66 : f32 to vector<18x18x128xf32>
    %c0_67 = arith.constant 0 : index
    %c0_68 = arith.constant 0 : index
    %c0_69 = arith.constant 0 : index
    %79 = vector.load %arg7[%c0_67, %c0_68, %c0_69] : memref<18x18x128xf32, #tpu.memory_space<vmem>>, vector<18x18x128xf32>
    tpu.vector_store %arg7[%c0_67, %c0_68, %c0_69], %78 {strides = array<i32>} : memref<18x18x128xf32, #tpu.memory_space<vmem>>, vector<18x18x128xf32>,
    %80 = vector.shape_cast %77 : vector<256x128xf32> to vector<16x16x128xf32>
    %c1_70 = arith.constant 1 : index
    %c1_71 = arith.constant 1 : index
    %c0_72 = arith.constant 0 : index
    %81 = vector.load %arg7[%c1_70, %c1_71, %c0_72] : memref<18x18x128xf32, #tpu.memory_space<vmem>>, vector<16x16x128xf32>
    tpu.vector_store %arg7[%c1_70, %c1_71, %c0_72], %80 {strides = array<i32>} : memref<18x18x128xf32, #tpu.memory_space<vmem>>, vector<16x16x128xf32>,
    %cst_73 = arith.constant 0.000000e+00 : f32
    %82 = vector.broadcast %cst_73 : f32 to vector<256x128xf32>
    %c0_74 = arith.constant 0 : index
    %c0_75 = arith.constant 0 : index
    %c0_76 = arith.constant 0 : index
    %83 = vector.load %arg7[%c0_74, %c0_75, %c0_76] : memref<18x18x128xf32, #tpu.memory_space<vmem>>, vector<16x16x128xf32>
    %84 = arith.truncf %83 : vector<16x16x128xf32> to vector<16x16x128xbf16>
    %85 = vector.shape_cast %84 : vector<16x16x128xbf16> to vector<256x128xbf16>
    %c0_77 = arith.constant 0 : index
    %c0_78 = arith.constant 0 : index
    %c0_79 = arith.constant 0 : index
    %86 = vector.load %arg4[%c0_77, %c0_78, %c0_79] : memref<9x128x128xbf16, #tpu.memory_space<vmem>>, vector<1x128x128xbf16>
    %87 = vector.shape_cast %86 : vector<1x128x128xbf16> to vector<128x128xbf16>
    %cst_80 = arith.constant dense<0.000000e+00> : vector<256x128xf32>
    %88 = tpu.matmul %85, %87, %cst_80 {dimension_numbers = #tpu.dot_dimension_numbers<[1], [0], [0], [1], [0, 0, 1, 1], [], []>} : vector<256x128xbf16>, vector<128x128xbf16>, vector<256x128xf32> -> vector<256x128xf32>
    %89 = arith.addf %82, %88 : vector<256x128xf32>
    %c0_81 = arith.constant 0 : index
    %c1_82 = arith.constant 1 : index
    %c0_83 = arith.constant 0 : index
    %90 = vector.load %arg7[%c0_81, %c1_82, %c0_83] : memref<18x18x128xf32, #tpu.memory_space<vmem>>, vector<16x16x128xf32>
    %91 = arith.truncf %90 : vector<16x16x128xf32> to vector<16x16x128xbf16>
    %92 = vector.shape_cast %91 : vector<16x16x128xbf16> to vector<256x128xbf16>
    %c1_84 = arith.constant 1 : index
    %c0_85 = arith.constant 0 : index
    %c0_86 = arith.constant 0 : index
    %93 = vector.load %arg4[%c1_84, %c0_85, %c0_86] : memref<9x128x128xbf16, #tpu.memory_space<vmem>>, vector<1x128x128xbf16>
    %94 = vector.shape_cast %93 : vector<1x128x128xbf16> to vector<128x128xbf16>
    %cst_87 = arith.constant dense<0.000000e+00> : vector<256x128xf32>
    %95 = tpu.matmul %92, %94, %cst_87 {dimension_numbers = #tpu.dot_dimension_numbers<[1], [0], [0], [1], [0, 0, 1, 1], [], []>} : vector<256x128xbf16>, vector<128x128xbf16>, vector<256x128xf32> -> vector<256x128xf32>
    %96 = arith.addf %89, %95 : vector<256x128xf32>
    %c0_88 = arith.constant 0 : index
    %c2_89 = arith.constant 2 : index
    %c0_90 = arith.constant 0 : index
    %97 = vector.load %arg7[%c0_88, %c2_89, %c0_90] : memref<18x18x128xf32, #tpu.memory_space<vmem>>, vector<16x16x128xf32>
    %98 = arith.truncf %97 : vector<16x16x128xf32> to vector<16x16x128xbf16>
    %99 = vector.shape_cast %98 : vector<16x16x128xbf16> to vector<256x128xbf16>
    %c2_91 = arith.constant 2 : index
    %c0_92 = arith.constant 0 : index
    %c0_93 = arith.constant 0 : index
    %100 = vector.load %arg4[%c2_91, %c0_92, %c0_93] : memref<9x128x128xbf16, #tpu.memory_space<vmem>>, vector<1x128x128xbf16>
    %101 = vector.shape_cast %100 : vector<1x128x128xbf16> to vector<128x128xbf16>
    %cst_94 = arith.constant dense<0.000000e+00> : vector<256x128xf32>
    %102 = tpu.matmul %99, %101, %cst_94 {dimension_numbers = #tpu.dot_dimension_numbers<[1], [0], [0], [1], [0, 0, 1, 1], [], []>} : vector<256x128xbf16>, vector<128x128xbf16>, vector<256x128xf32> -> vector<256x128xf32>
    %103 = arith.addf %96, %102 : vector<256x128xf32>
    %c1_95 = arith.constant 1 : index
    %c0_96 = arith.constant 0 : index
    %c0_97 = arith.constant 0 : index
    %104 = vector.load %arg7[%c1_95, %c0_96, %c0_97] : memref<18x18x128xf32, #tpu.memory_space<vmem>>, vector<16x16x128xf32>
    %105 = arith.truncf %104 : vector<16x16x128xf32> to vector<16x16x128xbf16>
    %106 = vector.shape_cast %105 : vector<16x16x128xbf16> to vector<256x128xbf16>
    %c3_98 = arith.constant 3 : index
    %c0_99 = arith.constant 0 : index
    %c0_100 = arith.constant 0 : index
    %107 = vector.load %arg4[%c3_98, %c0_99, %c0_100] : memref<9x128x128xbf16, #tpu.memory_space<vmem>>, vector<1x128x128xbf16>
    %108 = vector.shape_cast %107 : vector<1x128x128xbf16> to vector<128x128xbf16>
    %cst_101 = arith.constant dense<0.000000e+00> : vector<256x128xf32>
    %109 = tpu.matmul %106, %108, %cst_101 {dimension_numbers = #tpu.dot_dimension_numbers<[1], [0], [0], [1], [0, 0, 1, 1], [], []>} : vector<256x128xbf16>, vector<128x128xbf16>, vector<256x128xf32> -> vector<256x128xf32>
    %110 = arith.addf %103, %109 : vector<256x128xf32>
    %c1_102 = arith.constant 1 : index
    %c1_103 = arith.constant 1 : index
    %c0_104 = arith.constant 0 : index
    %111 = vector.load %arg7[%c1_102, %c1_103, %c0_104] : memref<18x18x128xf32, #tpu.memory_space<vmem>>, vector<16x16x128xf32>
    %112 = arith.truncf %111 : vector<16x16x128xf32> to vector<16x16x128xbf16>
    %113 = vector.shape_cast %112 : vector<16x16x128xbf16> to vector<256x128xbf16>
    %c4_105 = arith.constant 4 : index
    %c0_106 = arith.constant 0 : index
    %c0_107 = arith.constant 0 : index
    %114 = vector.load %arg4[%c4_105, %c0_106, %c0_107] : memref<9x128x128xbf16, #tpu.memory_space<vmem>>, vector<1x128x128xbf16>
    %115 = vector.shape_cast %114 : vector<1x128x128xbf16> to vector<128x128xbf16>
    %cst_108 = arith.constant dense<0.000000e+00> : vector<256x128xf32>
    %116 = tpu.matmul %113, %115, %cst_108 {dimension_numbers = #tpu.dot_dimension_numbers<[1], [0], [0], [1], [0, 0, 1, 1], [], []>} : vector<256x128xbf16>, vector<128x128xbf16>, vector<256x128xf32> -> vector<256x128xf32>
    %117 = arith.addf %110, %116 : vector<256x128xf32>
    %c1_109 = arith.constant 1 : index
    %c2_110 = arith.constant 2 : index
    %c0_111 = arith.constant 0 : index
    %118 = vector.load %arg7[%c1_109, %c2_110, %c0_111] : memref<18x18x128xf32, #tpu.memory_space<vmem>>, vector<16x16x128xf32>
    %119 = arith.truncf %118 : vector<16x16x128xf32> to vector<16x16x128xbf16>
    %120 = vector.shape_cast %119 : vector<16x16x128xbf16> to vector<256x128xbf16>
    %c5_112 = arith.constant 5 : index
    %c0_113 = arith.constant 0 : index
    %c0_114 = arith.constant 0 : index
    %121 = vector.load %arg4[%c5_112, %c0_113, %c0_114] : memref<9x128x128xbf16, #tpu.memory_space<vmem>>, vector<1x128x128xbf16>
    %122 = vector.shape_cast %121 : vector<1x128x128xbf16> to vector<128x128xbf16>
    %cst_115 = arith.constant dense<0.000000e+00> : vector<256x128xf32>
    %123 = tpu.matmul %120, %122, %cst_115 {dimension_numbers = #tpu.dot_dimension_numbers<[1], [0], [0], [1], [0, 0, 1, 1], [], []>} : vector<256x128xbf16>, vector<128x128xbf16>, vector<256x128xf32> -> vector<256x128xf32>
    %124 = arith.addf %117, %123 : vector<256x128xf32>
    %c2_116 = arith.constant 2 : index
    %c0_117 = arith.constant 0 : index
    %c0_118 = arith.constant 0 : index
    %125 = vector.load %arg7[%c2_116, %c0_117, %c0_118] : memref<18x18x128xf32, #tpu.memory_space<vmem>>, vector<16x16x128xf32>
    %126 = arith.truncf %125 : vector<16x16x128xf32> to vector<16x16x128xbf16>
    %127 = vector.shape_cast %126 : vector<16x16x128xbf16> to vector<256x128xbf16>
    %c6_119 = arith.constant 6 : index
    %c0_120 = arith.constant 0 : index
    %c0_121 = arith.constant 0 : index
    %128 = vector.load %arg4[%c6_119, %c0_120, %c0_121] : memref<9x128x128xbf16, #tpu.memory_space<vmem>>, vector<1x128x128xbf16>
    %129 = vector.shape_cast %128 : vector<1x128x128xbf16> to vector<128x128xbf16>
    %cst_122 = arith.constant dense<0.000000e+00> : vector<256x128xf32>
    %130 = tpu.matmul %127, %129, %cst_122 {dimension_numbers = #tpu.dot_dimension_numbers<[1], [0], [0], [1], [0, 0, 1, 1], [], []>} : vector<256x128xbf16>, vector<128x128xbf16>, vector<256x128xf32> -> vector<256x128xf32>
    %131 = arith.addf %124, %130 : vector<256x128xf32>
    %c2_123 = arith.constant 2 : index
    %c1_124 = arith.constant 1 : index
    %c0_125 = arith.constant 0 : index
    %132 = vector.load %arg7[%c2_123, %c1_124, %c0_125] : memref<18x18x128xf32, #tpu.memory_space<vmem>>, vector<16x16x128xf32>
    %133 = arith.truncf %132 : vector<16x16x128xf32> to vector<16x16x128xbf16>
    %134 = vector.shape_cast %133 : vector<16x16x128xbf16> to vector<256x128xbf16>
    %c7_126 = arith.constant 7 : index
    %c0_127 = arith.constant 0 : index
    %c0_128 = arith.constant 0 : index
    %135 = vector.load %arg4[%c7_126, %c0_127, %c0_128] : memref<9x128x128xbf16, #tpu.memory_space<vmem>>, vector<1x128x128xbf16>
    %136 = vector.shape_cast %135 : vector<1x128x128xbf16> to vector<128x128xbf16>
    %cst_129 = arith.constant dense<0.000000e+00> : vector<256x128xf32>
    %137 = tpu.matmul %134, %136, %cst_129 {dimension_numbers = #tpu.dot_dimension_numbers<[1], [0], [0], [1], [0, 0, 1, 1], [], []>} : vector<256x128xbf16>, vector<128x128xbf16>, vector<256x128xf32> -> vector<256x128xf32>
    %138 = arith.addf %131, %137 : vector<256x128xf32>
    %c2_130 = arith.constant 2 : index
    %c2_131 = arith.constant 2 : index
    %c0_132 = arith.constant 0 : index
    %139 = vector.load %arg7[%c2_130, %c2_131, %c0_132] : memref<18x18x128xf32, #tpu.memory_space<vmem>>, vector<16x16x128xf32>
    %140 = arith.truncf %139 : vector<16x16x128xf32> to vector<16x16x128xbf16>
    %141 = vector.shape_cast %140 : vector<16x16x128xbf16> to vector<256x128xbf16>
    %c8_133 = arith.constant 8 : index
    %c0_134 = arith.constant 0 : index
    %c0_135 = arith.constant 0 : index
    %142 = vector.load %arg4[%c8_133, %c0_134, %c0_135] : memref<9x128x128xbf16, #tpu.memory_space<vmem>>, vector<1x128x128xbf16>
    %143 = vector.shape_cast %142 : vector<1x128x128xbf16> to vector<128x128xbf16>
    %cst_136 = arith.constant dense<0.000000e+00> : vector<256x128xf32>
    %144 = tpu.matmul %141, %143, %cst_136 {dimension_numbers = #tpu.dot_dimension_numbers<[1], [0], [0], [1], [0, 0, 1, 1], [], []>} : vector<256x128xbf16>, vector<128x128xbf16>, vector<256x128xf32> -> vector<256x128xf32>
    %145 = arith.addf %138, %144 : vector<256x128xf32>
    %c0_137 = arith.constant 0 : index
    %c1_138 = arith.constant 1 : index
    %c1_139 = arith.constant 1 : index
    %c0_140 = arith.constant 0 : index
    %146 = vector.load %arg1[%c0_137, %c1_138, %c1_139, %c0_140] : memref<1x18x18x128xf32, #tpu.memory_space<vmem>>, vector<1x16x16x128xf32>
    %147 = vector.shape_cast %146 : vector<1x16x16x128xf32> to vector<16x16x128xf32>
    %148 = vector.shape_cast %147 : vector<16x16x128xf32> to vector<256x128xf32>
    %c0_141 = arith.constant 0 : index
    %c0_142 = arith.constant 0 : index
    %149 = vector.load %arg5[%c0_141, %c0_142] : memref<1x128xf32, #tpu.memory_space<vmem>>, vector<1x128xf32>
    %150 = vector.broadcast %149 : vector<1x128xf32> to vector<256x128xf32>
    %151 = arith.addf %145, %150 : vector<256x128xf32>
    %152 = arith.addf %151, %148 : vector<256x128xf32>
    %cst_143 = arith.constant 0.000000e+00 : f32
    %153 = vector.broadcast %cst_143 : f32 to vector<256x128xf32>
    %154 = arith.maximumf %152, %153 : vector<256x128xf32>
    %155 = vector.shape_cast %154 : vector<256x128xf32> to vector<1x16x16x128xf32>
    %c0_144 = arith.constant 0 : index
    %c0_145 = arith.constant 0 : index
    %c0_146 = arith.constant 0 : index
    %c0_147 = arith.constant 0 : index
    %156 = vector.load %arg6[%c0_144, %c0_145, %c0_146, %c0_147] : memref<1x16x16x128xf32, #tpu.memory_space<vmem>>, vector<1x16x16x128xf32>
    tpu.vector_store %arg6[%c0_144, %c0_145, %c0_146, %c0_147], %155 {strides = array<i32>} : memref<1x16x16x128xf32, #tpu.memory_space<vmem>>, vector<1x16x16x128xf32>,
    return
  }
  func.func @transform_0(%arg0: i32) -> (i32, i32, i32, i32) {
    %c0_i32 = arith.constant 0 : i32
    %c0_i32_0 = arith.constant 0 : i32
    %c0_i32_1 = arith.constant 0 : i32
    %c0_i32_2 = arith.constant 0 : i32
    return %arg0, %c0_i32, %c0_i32_0, %c0_i32_1 : i32, i32, i32, i32
  }
  func.func @transform_1(%arg0: i32) -> (i32, i32, i32) {
    %c0_i32 = arith.constant 0 : i32
    %c0_i32_0 = arith.constant 0 : i32
    %c0_i32_1 = arith.constant 0 : i32
    %c0_i32_2 = arith.constant 0 : i32
    return %c0_i32, %c0_i32_0, %c0_i32_1 : i32, i32, i32
  }
  func.func @transform_2(%arg0: i32) -> (i32, i32) {
    %c0_i32 = arith.constant 0 : i32
    %c0_i32_0 = arith.constant 0 : i32
    %c0_i32_1 = arith.constant 0 : i32
    return %c0_i32, %c0_i32_0 : i32, i32
  }
  func.func @transform_3(%arg0: i32) -> (i32, i32, i32) {
    %c0_i32 = arith.constant 0 : i32
    %c0_i32_0 = arith.constant 0 : i32
    %c0_i32_1 = arith.constant 0 : i32
    %c0_i32_2 = arith.constant 0 : i32
    return %c0_i32, %c0_i32_0, %c0_i32_1 : i32, i32, i32
  }
  func.func @transform_4(%arg0: i32) -> (i32, i32) {
    %c0_i32 = arith.constant 0 : i32
    %c0_i32_0 = arith.constant 0 : i32
    %c0_i32_1 = arith.constant 0 : i32
    return %c0_i32, %c0_i32_0 : i32, i32
  }
  func.func @transform_5(%arg0: i32) -> (i32, i32, i32, i32) {
    %c0_i32 = arith.constant 0 : i32
    %c0_i32_0 = arith.constant 0 : i32
    %c0_i32_1 = arith.constant 0 : i32
    %c0_i32_2 = arith.constant 0 : i32
    return %arg0, %c0_i32, %c0_i32_0, %c0_i32_1 : i32, i32, i32, i32
  }
}

</mosaic_0001>

<bundles_post_ra>
// kernel: basic_block_forward.1
= control target key start
LH: loop header
LB: loop body
LE: loop exit
PB: predicated region body
PF: predicated region fallthrough
CT: control target
= control target key end

     0   :  { %s7981_s18 = smov 0   ;;  %s9609_s0 = inlined_call_operand.vmem [shape: f32[2,18,18,128], index: 0, kind: input, shape index: {}]   ;;  %s9610_s1 = inlined_call_operand.vmem [shape: bf16[9,128,128], index: 1, kind: input, shape index: {}]   ;;  %s9611_s2 = inlined_call_operand.vmem [shape: f32[1,128], index: 2, kind: input, shape index: {}]   ;;  %s9612_s3 = inlined_call_operand.vmem [shape: bf16[9,128,128], index: 3, kind: input, shape index: {}]   ;;  %s9613_s4 = inlined_call_operand.vmem [shape: f32[1,128], index: 4, kind: input, shape index: {}]   ;;  %s9614_s5 = inlined_call_operand.vmem [shape: f32[2,16,16,128], index: 5, kind: output, shape index: {}]  }
   0x1 LB: > { %s6700_s19 = sadd.s32 4294967295, %s7948_s18   ;;  %p6704_p0 = scmp.ge.s32.totalorder %s7948_s18, 1  ;;  %s7948_s18 = sphi %s7981_s18, %s15_s18  }
   0x2   : > { %p187_p1 = scmp.lt.s32.totalorder %s7948_s18, 3 }
   0x4   : > { %p188_p2 = pnand %p6704_p0, %p187_p1 }
   0x6   : > { %191 = sbr.rel (%p188_p2) target bundleno = 1462 (0x5b6), region = 40 }
   0xb   : > { %v7782_v0 = vld [vmem:[%s9610_s1 + $0x78] sm:$0xff]  ;;  %v7781_v2 = vld [vmem:[%s9610_s1 + $0x70] sm:$0xff]  ;;  %p215_p3 = scmp.lt.s32.totalorder %s6700_s19, 1  ;;  %v7780_v4 = vld [vmem:[%s9610_s1 + $0x68] sm:$0xff] }
   0xc   : > { %v7774_v1 = vld [vmem:[%s9610_s1 + $0x38] sm:$0xff]  ;;  %530 = vmatpush.bf16.msra.mxu0 %v7782_v0  ;;  %7911 = vmatpush.bf16.msra.mxu2 %v7782_v0  ;;  %v7773_v3 = vld [vmem:[%s9610_s1 + $0x30] sm:$0xff]  ;;  %v7772_v5 = vld [vmem:[%s9610_s1 + $0x28] sm:$0xff] }
   0xd   : > { %7919 = vmatpush.bf16.msra.mxu3 %v7774_v1  ;;  %763 = vmatpush.bf16.msra.mxu1 %v7774_v1  ;;  %s9635_s19 = smov (!%p215_p3, %s6700_s19), 1  ;;  %v7779_v6 = vld [vmem:[%s9610_s1 + $0x60] sm:$0xff]  ;;  %v7778_v8 = vld [vmem:[%s9610_s1 + $0x58] sm:$0xff]  ;;  %v7777_v10 = vld [vmem:[%s9610_s1 + $0x50] sm:$0xff] }
   0xe   : > { %s7927_s9 = smul.u32 432, %s9635_s19  ;;  %v7771_v7 = vld [vmem:[%s9610_s1 + $0x20] sm:$0xff]  ;;  %v7770_v9 = vld [vmem:[%s9610_s1 + $0x18] sm:$0xff]  ;;  %v7769_v11 = vld [vmem:[%s9610_s1 + $0x10] sm:$0xff]  ;;  %s7766_s6 = sshll.u32 %s9635_s19, 8 }
   0xf   : > { %v7776_v25 = vld [vmem:[%s9610_s1 + $0x48] sm:$0xff]  ;;  %v7775_v34 = vld [vmem:[%s9610_s1 + $0x40] sm:$0xff]  ;;  %v7790_v40 = vld [vmem:[%s9610_s1 + $0xb8] sm:$0xff] }
  0x10   : > { %531 = vmatpush.bf16.msra.mxu0 %v7781_v2  ;;  %7912 = vmatpush.bf16.msra.mxu2 %v7781_v2  ;;  %s8022_s16 = scalar_lea.vmem %s9609_s0, %s7927_s9  ;;  %v7768_v29 = vld [vmem:[%s9610_s1 + $0x8] sm:$0xff]  ;;  %v7767_v39 = vld [vmem:[%s9610_s1] sm:$0xff]  ;;  %v7798_v41 = vld [vmem:[%s9610_s1 + $0xf8] sm:$0xff]  ;;  %s9449_s9 = scalar_lea.vmem %s9614_s5, %s7766_s6 }
  0x11   : > { %7920 = vmatpush.bf16.msra.mxu3 %v7773_v3  ;;  %764 = vmatpush.bf16.msra.mxu1 %v7773_v3  ;;  %v305_v12 = vld [vmem:[%s8022_s16 + $0x1] sm:$0xff]  ;;  %v306_v13 = vld [vmem:[%s8022_s16 + $0x9] sm:$0xff]  ;;  %v7806_v46 = vld [vmem:[%s9610_s1 + $0x138] sm:$0xff] }
  0x12   : > { %v321_v14 = vld [vmem:[%s8022_s16 + $0xc1] sm:$0xff]  ;;  %v322_v15 = vld [vmem:[%s8022_s16 + $0xc9] sm:$0xff]  ;;  %v337_v20 = vpack.c.bf16 %v305_v12, %v305_v12  ;;  %v338_v21 = vpack.c.bf16 %v306_v13, %v306_v13  ;;  %v307_v49 = vld [vmem:[%s8022_s16 + $0x19] sm:$0xff] }
  0x13   : > { %v241_v16 = vld [vmem:[%s8022_s16 + $0xc0] sm:$0xff]  ;;  %v242_v17 = vld [vmem:[%s8022_s16 + $0xc8] sm:$0xff]  ;;  %v353_v22 = vpack.c.bf16 %v321_v14, %v321_v14  ;;  %v354_v23 = vpack.c.bf16 %v322_v15, %v322_v15  ;;  %v7789_v47 = vld [vmem:[%s9610_s1 + $0xb0] sm:$0xff]  ;;  %v339_v60 = vpack.c.bf16 %v307_v49, %v307_v49 }
  0x14   : > { %532 = vmatpush.bf16.msra.mxu0 %v7780_v4  ;;  %7913 = vmatpush.bf16.msra.mxu2 %v7780_v4  ;;  %v225_v18 = vld [vmem:[%s8022_s16] sm:$0xff]  ;;  %v226_v19 = vld [vmem:[%s8022_s16 + $0x8] sm:$0xff]  ;;  %v273_v24 = vpack.c.bf16 %v241_v16, %v241_v16  ;;  %v274_v26 = vpack.c.bf16 %v242_v17, %v242_v17  ;;  %v418_v30 = vunpack.c.l.b16 %v337_v20  ;;  %v419_v31 = vunpack.c.l.b16 %v338_v21  ;;  %v7797_v48 = vld [vmem:[%s9610_s1 + $0xf0] sm:$0xff] }
  0x15   : > { %7921 = vmatpush.bf16.msra.mxu3 %v7772_v5  ;;  %765 = vmatpush.bf16.msra.mxu1 %v7772_v5  ;;  %v257_v27 = vpack.c.bf16 %v225_v18, %v225_v18  ;;  %v258_v28 = vpack.c.bf16 %v226_v19, %v226_v19  ;;  %v434_v32 = vunpack.c.l.b16 %v353_v22  ;;  %v435_v33 = vunpack.c.l.b16 %v354_v23  ;;  %v308_v50 = vld [vmem:[%s8022_s16 + $0x21] sm:$0xff]  ;;  %v323_v51 = vld [vmem:[%s8022_s16 + $0xd9] sm:$0xff]  ;;  %v7805_v57 = vld [vmem:[%s9610_s1 + $0x130] sm:$0xff] }
  0x16   : > { %v667_v35 = vunpack.c.l.b16 %v273_v24  ;;  %v668_v36 = vunpack.c.l.b16 %v274_v26  ;;  %v450_v42 = vpack.c.b16 %v419_v31, %v418_v30  ;;  %v324_v52 = vld [vmem:[%s8022_s16 + $0xe1] sm:$0xff]  ;;  %v243_v53 = vld [vmem:[%s8022_s16 + $0xd8] sm:$0xff]  ;;  %v340_v61 = vpack.c.bf16 %v308_v50, %v308_v50  ;;  %v245_v21 = vld [vmem:[%s8022_s16 + $0xf0] sm:$0xff] }
  0x17   : > { %v651_v37 = vunpack.c.l.b16 %v257_v27  ;;  %v652_v38 = vunpack.c.l.b16 %v258_v28  ;;  %v458_v43 = vpack.c.b16 %v435_v33, %v434_v32  ;;  %v244_v54 = vld [vmem:[%s8022_s16 + $0xe0] sm:$0xff]  ;;  %v227_v55 = vld [vmem:[%s8022_s16 + $0x18] sm:$0xff]  ;;  %v7788_v58 = vld [vmem:[%s9610_s1 + $0xa8] sm:$0xff]  ;;  %v355_v62 = vpack.c.bf16 %v323_v51, %v323_v51 }
  0x18   : > { %533 = vmatpush.bf16.msra.mxu0 %v7779_v6  ;;  %7914 = vmatpush.bf16.msra.mxu2 %v7779_v6  ;;  %v691_v44 = vpack.c.b16 %v668_v36, %v667_v35  ;;  %v228_v56 = vld [vmem:[%s8022_s16 + $0x20] sm:$0xff]  ;;  %v7796_v59 = vld [vmem:[%s9610_s1 + $0xe8] sm:$0xff]  ;;  %v356_v63 = vpack.c.bf16 %v324_v52, %v324_v52  ;;  %v275_v0 = vpack.c.bf16 %v243_v53, %v243_v53  ;;  %v420_v5 = vunpack.c.l.b16 %v339_v60  ;;  %v309_v17 = vld [vmem:[%s8022_s16 + $0x31] sm:$0xff] }
  0x19   : > { %7922 = vmatpush.bf16.msra.mxu3 %v7771_v7  ;;  %766 = vmatpush.bf16.msra.mxu1 %v7771_v7  ;;  %v683_v45 = vpack.c.b16 %v652_v38, %v651_v37  ;;  %v276_v1 = vpack.c.bf16 %v244_v54, %v244_v54  ;;  %v259_v2 = vpack.c.bf16 %v227_v55, %v227_v55  ;;  %v7804_v4 = vld [vmem:[%s9610_s1 + $0x128] sm:$0xff]  ;;  %v421_v6 = vunpack.c.l.b16 %v340_v61  ;;  %v310_v18 = vld [vmem:[%s8022_s16 + $0x39] sm:$0xff]  ;;  %v325_v19 = vld [vmem:[%s8022_s16 + $0xf1] sm:$0xff] }
  0x1a   : > { %v260_v3 = vpack.c.bf16 %v228_v56, %v228_v56  ;;  %v436_v7 = vunpack.c.l.b16 %v355_v62  ;;  %v326_v20 = vld [vmem:[%s8022_s16 + $0xf9] sm:$0xff]  ;;  %v229_v26 = vld [vmem:[%s8022_s16 + $0x30] sm:$0xff]  ;;  %v341_v28 = vpack.c.bf16 %v309_v17, %v309_v17  ;;  %v357_v30 = vpack.c.bf16 %v325_v19, %v325_v19  ;;  %v247_v52 = vld [vmem:[%s8022_s16 + $0x108] sm:$0xff] }
  0x1b   : > { %v8088_v13 = vpack.c.b16 %v421_v6, %v420_v5  ;;  %v7787_v22 = vld [vmem:[%s9610_s1 + $0xa0] sm:$0xff]  ;;  %v230_v27 = vld [vmem:[%s8022_s16 + $0x38] sm:$0xff]  ;;  %v358_v31 = vpack.c.bf16 %v326_v20, %v326_v20  ;;  %v277_v32 = vpack.c.bf16 %v245_v21, %v245_v21  ;;  %v327_v50 = vld [vmem:[%s8022_s16 + $0x109] sm:$0xff] }
  0x1c   : > { %534 = vmatpush.bf16.msra.mxu0 %v7778_v8  ;;  %7915 = vmatpush.bf16.msra.mxu2 %v7778_v8  ;;  %v437_v8 = vunpack.c.l.b16 %v356_v63  ;;  %v654_v12 = vunpack.c.l.b16 %v260_v3  ;;  %v7795_v23 = vld [vmem:[%s9610_s1 + $0xe0] sm:$0xff]  ;;  %v262_v35 = vpack.c.bf16 %v230_v27, %v230_v27  ;;  %v422_v36 = vunpack.c.l.b16 %v341_v28  ;;  %v312_v49 = vld [vmem:[%s8022_s16 + $0x51] sm:$0xff]  ;;  %v330_v20 = vld [vmem:[%s8022_s16 + $0x129] sm:$0xff] }
  0x1d   : > { %7923 = vmatpush.bf16.msra.mxu3 %v7770_v9  ;;  %767 = vmatpush.bf16.msra.mxu1 %v7770_v9  ;;  %v669_v9 = vunpack.c.l.b16 %v275_v0  ;;  %v7803_v24 = vld [vmem:[%s9610_s1 + $0x120] sm:$0xff]  ;;  %v438_v38 = vunpack.c.l.b16 %v357_v30  ;;  %v328_v51 = vld [vmem:[%s8022_s16 + $0x111] sm:$0xff]  ;;  %v344_v60 = vpack.c.bf16 %v312_v49, %v312_v49  ;;  %v359_v61 = vpack.c.bf16 %v327_v50, %v327_v50  ;;  %v234_v27 = vld [vmem:[%s8022_s16 + $0x68] sm:$0xff] }
  0x1e   : > { %v459_v14 = vpack.c.b16 %v437_v8, %v436_v7  ;;  %v7786_v53 = vld [vmem:[%s9610_s1 + $0x98] sm:$0xff]  ;;  %v248_v56 = vld [vmem:[%s8022_s16 + $0x110] sm:$0xff]  ;;  %v360_v62 = vpack.c.bf16 %v328_v51, %v328_v51  ;;  %v279_v63 = vpack.c.bf16 %v247_v52, %v247_v52  ;;  %v313_v17 = vld [vmem:[%s8022_s16 + $0x61] sm:$0xff] }
  0x1f   : > { %v7794_v54 = vld [vmem:[%s9610_s1 + $0xd8] sm:$0xff]  ;;  %v280_v0 = vpack.c.bf16 %v248_v56, %v248_v56  ;;  %v440_v5 = vunpack.c.l.b16 %v359_v61  ;;  %v329_v19 = vld [vmem:[%s8022_s16 + $0x121] sm:$0xff]  ;;  %v345_v28 = vpack.c.bf16 %v313_v17, %v313_v17 }
  0x20   : > { %535 = vmatpush.bf16.msra.mxu0 %v7777_v10  ;;  %7916 = vmatpush.bf16.msra.mxu2 %v7777_v10  ;;  %v670_v10 = vunpack.c.l.b16 %v276_v1  ;;  %v7802_v55 = vld [vmem:[%s9610_s1 + $0x118] sm:$0xff]  ;;  %v441_v6 = vunpack.c.l.b16 %v360_v62  ;;  %v673_v7 = vunpack.c.l.b16 %v279_v63  ;;  %v249_v21 = vld [vmem:[%s8022_s16 + $0x120] sm:$0xff]  ;;  %v361_v30 = vpack.c.bf16 %v329_v19, %v329_v19  ;;  %v7784_v56 = vld [vmem:[%s9610_s1 + $0x88] sm:$0xff] }
  0x21   : > { %7924 = vmatpush.bf16.msra.mxu3 %v7769_v11  ;;  %768 = vmatpush.bf16.msra.mxu1 %v7769_v11  ;;  %v653_v11 = vunpack.c.l.b16 %v259_v2  ;;  %v674_v8 = vunpack.c.l.b16 %v280_v0  ;;  %v315_v50 = vld [vmem:[%s8022_s16 + $0x79] sm:$0xff]  ;;  %v316_v51 = vld [vmem:[%s8022_s16 + $0x81] sm:$0xff] }
  0x22   : > { %v692_v15 = vpack.c.b16 %v670_v10, %v669_v9  ;;  %v331_v52 = vld [vmem:[%s8022_s16 + $0x139] sm:$0xff]  ;;  %v347_v62 = vpack.c.bf16 %v315_v50, %v315_v50  ;;  %v348_v63 = vpack.c.bf16 %v316_v51, %v316_v51 }
  0x23   : > { %v8090_v16 = vpack.c.b16 %v654_v12, %v653_v11  ;;  %v461_v12 = vpack.c.b16 %v441_v6, %v440_v5  ;;  %v7814_v61 = vld [vmem:[%s9610_s1 + $0x178] sm:$0xff]  ;;  %v363_v0 = vpack.c.bf16 %v331_v52, %v331_v52 }
  0x24   : > { %536 = vmatpush.bf16.msra.mxu0 %v7776_v25  ;;  %7917 = vmatpush.bf16.msra.mxu2 %v7776_v25  ;;  %v246_v25 = vld [vmem:[%s8022_s16 + $0xf8] sm:$0xff]  ;;  %v428_v6 = vunpack.c.l.b16 %v347_v62 }
  0x25   : > { %7925 = vmatpush.bf16.msra.mxu3 %v7768_v29  ;;  %769 = vmatpush.bf16.msra.mxu1 %v7768_v29  ;;  %v342_v29 = vpack.c.bf16 %v310_v18, %v310_v18  ;;  %v278_v33 = vpack.c.bf16 %v246_v25, %v246_v25  ;;  %v314_v18 = vld [vmem:[%s8022_s16 + $0x69] sm:$0xff]  ;;  %v320_v62 = vld [vmem:[%s8022_s16 + $0xb1] sm:$0xff] }
  0x26   : > { %v250_v25 = vld [vmem:[%s8022_s16 + $0x128] sm:$0xff] }
  0x27   : > { %v423_v37 = vunpack.c.l.b16 %v342_v29  ;;  %v346_v29 = vpack.c.bf16 %v314_v18, %v314_v18 }
  0x28   : > { %537 = vmatpush.bf16.msra.mxu0 %v7775_v34  ;;  %7918 = vmatpush.bf16.msra.mxu2 %v7775_v34  ;;  %v261_v34 = vpack.c.bf16 %v229_v26, %v229_v26  ;;  %v233_v26 = vld [vmem:[%s8022_s16 + $0x60] sm:$0xff] }
  0x29   : > { %7926 = vmatpush.bf16.msra.mxu3 %v7767_v39  ;;  %770 = vmatpush.bf16.msra.mxu1 %v7767_v39  ;;  %v439_v39 = vunpack.c.l.b16 %v358_v31  ;;  %v362_v31 = vpack.c.bf16 %v330_v20, %v330_v20 }
  0x2b   : > { %538 = vmatmul.bf16.vlgmr.msra.gmra.mxu0 %v450_v42  ;;  %578 = vmatmul.bf16.vlgmr.msra.gmra.mxu2 %v458_v43  ;;  %v655_v42 = vunpack.c.l.b16 %v261_v34  ;;  %v656_v43 = vunpack.c.l.b16 %v262_v35  ;;  %v265_v34 = vpack.c.bf16 %v233_v26, %v233_v26  ;;  %v266_v35 = vpack.c.bf16 %v234_v27, %v234_v27  ;;  %v253_v26 = vld [vmem:[%s8022_s16 + $0x150] sm:$0xff]  ;;  %v254_v27 = vld [vmem:[%s8022_s16 + $0x158] sm:$0xff] }
  0x2c   : > { %1077 = vmatpush.bf16.msrb.mxu2 %v7790_v40  ;;  %811 = vmatmul.bf16.vlgmr.msra.gmra.mxu3 %v691_v44  ;;  %v671_v40 = vunpack.c.l.b16 %v277_v32  ;;  %v8111_v44 = vpack.c.b16 %v423_v37, %v422_v36  ;;  %v281_v32 = vpack.c.bf16 %v249_v21, %v249_v21  ;;  %v426_v36 = vunpack.c.l.b16 %v345_v28  ;;  %v7813_v28 = vld [vmem:[%s9610_s1 + $0x170] sm:$0xff] }
  0x2d   : > { %1424 = vmatpush.bf16.msrb.mxu3 %v7798_v41  ;;  %771 = vmatmul.bf16.vlgmr.msra.gmra.mxu1 %v683_v45  ;;  %v672_v41 = vunpack.c.l.b16 %v278_v33  ;;  %v460_v45 = vpack.c.b16 %v439_v39, %v438_v38  ;;  %v282_v33 = vpack.c.bf16 %v250_v25, %v250_v25  ;;  %v427_v37 = vunpack.c.l.b16 %v346_v29  ;;  %v334_v25 = vld [vmem:[%s8022_s16 + $0x159] sm:$0xff]  ;;  %v237_v29 = vld [vmem:[%s8022_s16 + $0x90] sm:$0xff] }
  0x2e   : > { %1770 = vmatpush.bf16.msrb.mxu0 %v7806_v46  ;;  %v442_v38 = vunpack.c.l.b16 %v361_v30  ;;  %v443_v39 = vunpack.c.l.b16 %v362_v31  ;;  %2116 = vmatpush.bf16.msrb.mxu1 %v7814_v61  ;;  %v7783_v30 = vld [vmem:[%s9610_s1 + $0x80] sm:$0xff]  ;;  %v319_v61 = vld [vmem:[%s8022_s16 + $0xa9] sm:$0xff] }
  0x2f   : > { %v693_v46 = vpack.c.b16 %v672_v41, %v671_v40  ;;  %v675_v40 = vunpack.c.l.b16 %v281_v32  ;;  %v676_v41 = vunpack.c.l.b16 %v282_v33  ;;  %v7791_v31 = vld [vmem:[%s9610_s1 + $0xc0] sm:$0xff]  ;;  %v238_v32 = vld [vmem:[%s8022_s16 + $0x98] sm:$0xff]  ;;  %v7812_v33 = vld [vmem:[%s9610_s1 + $0x168] sm:$0xff] }
  0x30   : > { %1078 = vmatpush.bf16.msrb.mxu2 %v7789_v47  ;;  %v8113_v47 = vpack.c.b16 %v656_v43, %v655_v42  ;;  %v659_v42 = vunpack.c.l.b16 %v265_v34  ;;  %v660_v43 = vunpack.c.l.b16 %v266_v35  ;;  %v7799_v34 = vld [vmem:[%s9610_s1 + $0x100] sm:$0xff] }
  0x31   : > { %1425 = vmatpush.bf16.msrb.mxu3 %v7797_v48  ;;  %v311_v48 = vld [vmem:[%s8022_s16 + $0x49] sm:$0xff] }
  0x32   : > { %1771 = vmatpush.bf16.msrb.mxu0 %v7805_v57  ;;  %v231_v57 = vld [vmem:[%s8022_s16 + $0x48] sm:$0xff]  ;;  %v8159_v49 = vpack.c.b16 %v660_v43, %v659_v42  ;;  %2117 = vmatpush.bf16.msrb.mxu1 %v7813_v28  ;;  %v270_v42 = vpack.c.bf16 %v238_v32, %v238_v32  ;;  %v7811_v43 = vld [vmem:[%s9610_s1 + $0x160] sm:$0xff] }
  0x33   : > { %v263_v1 = vpack.c.bf16 %v231_v57, %v231_v57  ;;  %v7792_v57 = vld [vmem:[%s9610_s1 + $0xc8] sm:$0xff] }
  0x34   : > { %1079 = vmatpush.bf16.msrb.mxu2 %v7788_v58  ;;  %v232_v58 = vld [vmem:[%s8022_s16 + $0x50] sm:$0xff] }
  0x35   : > { %1426 = vmatpush.bf16.msrb.mxu3 %v7796_v59  ;;  %v343_v59 = vpack.c.bf16 %v311_v48, %v311_v48  ;;  %v264_v2 = vpack.c.bf16 %v232_v58, %v232_v58  ;;  %v657_v9 = vunpack.c.l.b16 %v263_v1  ;;  %v695_v48 = vpack.c.b16 %v676_v41, %v675_v40  ;;  %v7800_v58 = vld [vmem:[%s9610_s1 + $0x108] sm:$0xff] }
  0x36   : > { %1772 = vmatpush.bf16.msrb.mxu0 %v7804_v4  ;;  %v425_v4 = vunpack.c.l.b16 %v344_v60  ;;  %v236_v60 = vld [vmem:[%s8022_s16 + $0x80] sm:$0xff]  ;;  %v286_v40 = vpack.c.bf16 %v254_v27, %v254_v27  ;;  %v269_v41 = vpack.c.bf16 %v237_v29, %v237_v29  ;;  %2118 = vmatpush.bf16.msrb.mxu1 %v7812_v33 }
  0x37   : > { %v424_v3 = vunpack.c.l.b16 %v343_v59  ;;  %v658_v10 = vunpack.c.l.b16 %v264_v2  ;;  %v235_v59 = vld [vmem:[%s8022_s16 + $0x78] sm:$0xff]  ;;  %v268_v5 = vpack.c.bf16 %v236_v60, %v236_v60 }
  0x38   : > { %1080 = vmatpush.bf16.msrb.mxu2 %v7787_v22  ;;  %v7785_v22 = vld [vmem:[%s9610_s1 + $0x90] sm:$0xff] }
  0x39   : > { %1427 = vmatpush.bf16.msrb.mxu3 %v7795_v23  ;;  %v8134_v11 = vpack.c.b16 %v425_v4, %v424_v3  ;;  %v7793_v23 = vld [vmem:[%s9610_s1 + $0xd0] sm:$0xff]  ;;  %v267_v4 = vpack.c.bf16 %v235_v59, %v235_v59  ;;  %v662_v17 = vunpack.c.l.b16 %v268_v5 }
  0x3a   : > { %1773 = vmatpush.bf16.msrb.mxu0 %v7803_v24  ;;  %v7801_v24 = vld [vmem:[%s9610_s1 + $0x110] sm:$0xff]  ;;  %2119 = vmatpush.bf16.msrb.mxu1 %v7811_v43 }
  0x3b   : > { %543 = vmatmul.bf16.gmra.mxu0 %v8088_v13  ;;  %583 = vmatmul.bf16.gmra.mxu2 %v459_v14  ;;  %v694_v14 = vpack.c.b16 %v674_v8, %v673_v7  ;;  %v429_v7 = vunpack.c.l.b16 %v348_v63  ;;  %v444_v8 = vunpack.c.l.b16 %v363_v0  ;;  %v335_v63 = vld [vmem:[%s8022_s16 + $0x169] sm:$0xff]  ;;  %v336_v0 = vld [vmem:[%s8022_s16 + $0x171] sm:$0xff] }
  0x3c   : > { %816 = vmatmul.bf16.gmra.mxu3 %v692_v15  ;;  %1081 = vmatpush.bf16.msrb.mxu2 %v7786_v53  ;;  %v8136_v15 = vpack.c.b16 %v658_v10, %v657_v9  ;;  %v332_v53 = vld [vmem:[%s8022_s16 + $0x141] sm:$0xff]  ;;  %v256_v5 = vld [vmem:[%s8022_s16 + $0x170] sm:$0xff] }
  0x3d   : > { %776 = vmatmul.bf16.gmra.mxu1 %v8090_v16  ;;  %1428 = vmatpush.bf16.msrb.mxu3 %v7794_v54  ;;  %v251_v54 = vld [vmem:[%s8022_s16 + $0x138] sm:$0xff]  ;;  %v364_v1 = vpack.c.bf16 %v332_v53, %v332_v53  ;;  %v8183_v18 = vpack.c.b16 %v429_v7, %v428_v6  ;;  %v680_v53 = vunpack.c.l.b16 %v286_v40  ;;  %v239_v6 = vld [vmem:[%s8022_s16 + $0xa8] sm:$0xff]  ;;  %v240_v7 = vld [vmem:[%s8022_s16 + $0xb0] sm:$0xff] }
  0x3e   : > { %1774 = vmatpush.bf16.msrb.mxu0 %v7802_v55  ;;  %v252_v55 = vld [vmem:[%s8022_s16 + $0x140] sm:$0xff]  ;;  %v283_v2 = vpack.c.bf16 %v251_v54, %v251_v54  ;;  %v663_v54 = vunpack.c.l.b16 %v269_v41 }
  0x3f   : > { %v284_v3 = vpack.c.bf16 %v252_v55, %v252_v55  ;;  %v445_v9 = vunpack.c.l.b16 %v364_v1  ;;  %v664_v55 = vunpack.c.l.b16 %v270_v42  ;;  %v7809_v1 = vld [vmem:[%s9610_s1 + $0x150] sm:$0xff]  ;;  %v6997_v40 = vld [vmem:[%s8022_s16 + $0x22] sm:$0xff] }
  0x40   : > { %1082 = vmatpush.bf16.msrb.mxu2 %v7785_v22  ;;  %v677_v10 = vunpack.c.l.b16 %v283_v2  ;;  %v317_v22 = vld [vmem:[%s8022_s16 + $0x91] sm:$0xff]  ;;  %v255_v2 = vld [vmem:[%s8022_s16 + $0x168] sm:$0xff] }
  0x41   : > { %1429 = vmatpush.bf16.msrb.mxu3 %v7793_v23  ;;  %v463_v19 = vpack.c.b16 %v445_v9, %v444_v8  ;;  %v318_v23 = vld [vmem:[%s8022_s16 + $0x99] sm:$0xff]  ;;  %v349_v35 = vpack.c.bf16 %v317_v22, %v317_v22  ;;  %v8220_v60 = vpack.c.b16 %v664_v55, %v663_v54  ;;  %v351_v8 = vpack.c.bf16 %v319_v61, %v319_v61  ;;  %v7829_v61 = vld [vmem:[%s9610_s1 + $0x1f0] sm:$0xff] }
  0x42   : > { %1775 = vmatpush.bf16.msrb.mxu0 %v7801_v24  ;;  %v333_v24 = vld [vmem:[%s8022_s16 + $0x151] sm:$0xff]  ;;  %v352_v9 = vpack.c.bf16 %v320_v62, %v320_v62  ;;  %v272_v22 = vpack.c.bf16 %v240_v7, %v240_v7 }
  0x43   : > { %v6998_v62 = vld [vmem:[%s8022_s16 + $0x32] sm:$0xff] }
  0x44   : > { %1083 = vmatpush.bf16.msrb.mxu2 %v7784_v56  ;;  %v666_v32 = vunpack.c.l.b16 %v272_v22  ;;  %v7000_v22 = vld [vmem:[%s8022_s16 + $0x4a] sm:$0xff] }
  0x45   : > { %1430 = vmatpush.bf16.msrb.mxu3 %v7792_v57 }
  0x46   : > { %1776 = vmatpush.bf16.msrb.mxu0 %v7800_v58  ;;  %v7810_v58 = vld [vmem:[%s9610_s1 + $0x158] sm:$0xff] }
  0x47   : > { %2120 = vmatpush.bf16.msrb.mxu1 %v7810_v58 }
  0x48   : > { %1084 = vmatpush.bf16.msrb.mxu2 %v7783_v30 }
  0x49   : > { %1431 = vmatpush.bf16.msrb.mxu3 %v7791_v31 }
  0x4a   : > { %1777 = vmatpush.bf16.msrb.mxu0 %v7799_v34 }
  0x4b   : > { %548 = vmatmul.bf16.gmra.mxu0 %v8111_v44  ;;  %588 = vmatmul.bf16.gmra.mxu2 %v460_v45  ;;  %v8157_v45 = vpack.c.b16 %v427_v37, %v426_v36  ;;  %v350_v36 = vpack.c.bf16 %v318_v23, %v318_v23  ;;  %v365_v37 = vpack.c.bf16 %v333_v24, %v333_v24  ;;  %v7807_v23 = vld [vmem:[%s9610_s1 + $0x140] sm:$0xff]  ;;  %v7838_v24 = vld [vmem:[%s9610_s1 + $0x238] sm:$0xff] }
  0x4c   : > { %821 = vmatmul.bf16.gmra.mxu3 %v693_v46  ;;  %v462_v46 = vpack.c.b16 %v443_v39, %v442_v38  ;;  %v366_v38 = vpack.c.bf16 %v334_v25, %v334_v25  ;;  %v285_v39 = vpack.c.bf16 %v253_v26, %v253_v26  ;;  %2121 = vmatpush.bf16.msrb.mxu1 %v7809_v1  ;;  %v432_v25 = vunpack.c.l.b16 %v351_v8 }
  0x4d   : > { %781 = vmatmul.bf16.gmra.mxu1 %v8113_v47  ;;  %v446_v50 = vunpack.c.l.b16 %v365_v37  ;;  %v433_v26 = vunpack.c.l.b16 %v352_v9  ;;  %v852_v37 = vld [vmem:[%s8022_s16 + $0x2] sm:$0xff] }
  0x4e   : > { %v447_v51 = vunpack.c.l.b16 %v366_v38  ;;  %v679_v52 = vunpack.c.l.b16 %v285_v39  ;;  %3155 = vmatpush.bf16.msra.mxu0 %v7838_v24  ;;  %v853_v38 = vld [vmem:[%s8022_s16 + $0xa] sm:$0xff]  ;;  %v6996_v39 = vld [vmem:[%s8022_s16 + $0x1a] sm:$0xff]  ;;  %v884_v41 = vpack.c.bf16 %v852_v37, %v852_v37 }
  0x4f   : > { %v8250_v33 = vpack.c.b16 %v433_v26, %v432_v25  ;;  %v885_v42 = vpack.c.bf16 %v853_v38, %v853_v38  ;;  %v1923_v43 = vpack.c.bf16 %v6996_v39, %v6996_v39 }
  0x50   : > { %v464_v57 = vpack.c.b16 %v447_v51, %v446_v50  ;;  %v697_v59 = vpack.c.b16 %v680_v53, %v679_v52 }
  0x51   : > { %v966_v50 = vunpack.c.l.b16 %v885_v42  ;;  %v2004_v51 = vunpack.c.l.b16 %v1923_v43  ;;  %v7828_v42 = vld [vmem:[%s9610_s1 + $0x1e8] sm:$0xff] }
  0x52   : > { %v7002_v43 = vld [vmem:[%s8022_s16 + $0x62] sm:$0xff] }
  0x5b   : > { %553 = vmatmul.bf16.gmra.mxu0 %v8134_v11  ;;  %593 = vmatmul.bf16.gmra.mxu2 %v461_v12  ;;  %v678_v12 = vunpack.c.l.b16 %v284_v3  ;;  %v7822_v3 = vld [vmem:[%s9610_s1 + $0x1b8] sm:$0xff] }
  0x5c   : > { %826 = vmatmul.bf16.gmra.mxu3 %v694_v14  ;;  %v661_v14 = vunpack.c.l.b16 %v267_v4  ;;  %v7830_v4 = vld [vmem:[%s9610_s1 + $0x1f8] sm:$0xff]  ;;  %2463 = vmatpush.bf16.msra.mxu2 %v7822_v3  ;;  %v1925_v3 = vpack.c.bf16 %v6998_v62, %v6998_v62 }
  0x5d   : > { %786 = vmatmul.bf16.gmra.mxu1 %v8136_v15  ;;  %v696_v20 = vpack.c.b16 %v678_v12, %v677_v10  ;;  %2809 = vmatpush.bf16.msra.mxu3 %v7830_v4  ;;  %v367_v10 = vpack.c.bf16 %v335_v63, %v335_v63  ;;  %v368_v12 = vpack.c.bf16 %v336_v0, %v336_v0  ;;  %v6999_v63 = vld [vmem:[%s8022_s16 + $0x3a] sm:$0xff] }
  0x5e   : > { %v8185_v21 = vpack.c.b16 %v662_v17, %v661_v14  ;;  %v7808_v14 = vld [vmem:[%s9610_s1 + $0x148] sm:$0xff]  ;;  %v287_v17 = vpack.c.bf16 %v255_v2, %v255_v2  ;;  %v2006_v7 = vunpack.c.l.b16 %v1925_v3 }
  0x5f   : > { %2122 = vmatpush.bf16.msrb.mxu1 %v7808_v14  ;;  %v448_v27 = vunpack.c.l.b16 %v367_v10  ;;  %v449_v28 = vunpack.c.l.b16 %v368_v12 }
  0x60   : > { %v681_v29 = vunpack.c.l.b16 %v287_v17 }
  0x61   : > { %v465_v34 = vpack.c.b16 %v449_v28, %v448_v27  ;;  %2810 = vmatpush.bf16.msra.mxu3 %v7829_v61  ;;  %v1927_v28 = vpack.c.bf16 %v7000_v22, %v7000_v22 }
  0x63   : > { %2123 = vmatpush.bf16.msrb.mxu1 %v7807_v23  ;;  %v7001_v23 = vld [vmem:[%s8022_s16 + $0x52] sm:$0xff] }
  0x65   : > { %2811 = vmatpush.bf16.msra.mxu3 %v7828_v42 }
  0x6b   : > { %558 = vmatmul.bf16.gmra.mxu0 %v8157_v45  ;;  %598 = vmatmul.bf16.gmra.mxu2 %v462_v46  ;;  %v430_v46 = vunpack.c.l.b16 %v349_v35 }
  0x6c   : > { %831 = vmatmul.bf16.gmra.mxu3 %v695_v48  ;;  %v431_v48 = vunpack.c.l.b16 %v350_v36 }
  0x6d   : > { %791 = vmatmul.bf16.gmra.mxu1 %v8159_v49 }
  0x6e   : > { %v8215_v56 = vpack.c.b16 %v431_v48, %v430_v46  ;;  %v1924_v46 = vpack.c.bf16 %v6997_v40, %v6997_v40  ;;  %v965_v48 = vunpack.c.l.b16 %v884_v41  ;;  %v7820_v41 = vld [vmem:[%s9610_s1 + $0x1a8] sm:$0xff] }
  0x70   : > { %v2005_v52 = vunpack.c.l.b16 %v1924_v46  ;;  %v997_v53 = vpack.c.b16 %v966_v50, %v965_v48  ;;  %v7003_v46 = vld [vmem:[%s8022_s16 + $0x6a] sm:$0xff] }
  0x72   : > { %v2036_v55 = vpack.c.b16 %v2005_v52, %v2004_v51  ;;  %v1929_v52 = vpack.c.bf16 %v7002_v43, %v7002_v43  ;;  %v7835_v43 = vld [vmem:[%s9610_s1 + $0x220] sm:$0xff] }
  0x7b   : > { %563 = vmatmul.bf16.gmra.mxu0 %v8183_v18  ;;  %603 = vmatmul.bf16.gmra.mxu2 %v463_v19  ;;  %v288_v19 = vpack.c.bf16 %v256_v5, %v256_v5 }
  0x7c   : > { %836 = vmatmul.bf16.gmra.mxu3 %v696_v20  ;;  %v271_v20 = vpack.c.bf16 %v239_v6, %v239_v6  ;;  %v7837_v6 = vld [vmem:[%s9610_s1 + $0x230] sm:$0xff] }
  0x7d   : > { %796 = vmatmul.bf16.gmra.mxu1 %v8185_v21  ;;  %v682_v30 = vunpack.c.l.b16 %v288_v19  ;;  %3156 = vmatpush.bf16.msra.mxu0 %v7837_v6 }
  0x7e   : > { %v665_v31 = vunpack.c.l.b16 %v271_v20 }
  0x7f   : > { %v698_v35 = vpack.c.b16 %v682_v30, %v681_v29  ;;  %v1928_v29 = vpack.c.bf16 %v7001_v23, %v7001_v23 }
  0x80   : > { %v8252_v36 = vpack.c.b16 %v666_v32, %v665_v31  ;;  %v2008_v32 = vunpack.c.l.b16 %v1927_v28 }
  0x8b   : > { %568 = vmatmul.bf16.gmra.mxu0 %v8215_v56  ;;  %608 = vmatmul.bf16.gmra.mxu2 %v464_v57 }
  0x8c   : > { %841 = vmatmul.bf16.gmra.mxu3 %v697_v59  ;;  %v7821_v59 = vld [vmem:[%s9610_s1 + $0x1b0] sm:$0xff] }
  0x8d   : > { %801 = vmatmul.bf16.gmra.mxu1 %v8220_v60  ;;  %2464 = vmatpush.bf16.msra.mxu2 %v7821_v59 }
  0x91   : > { %2465 = vmatpush.bf16.msra.mxu2 %v7820_v41 }
  0x9b   : > { %573 = vmatmul.bf16.gmra.mxu0 %v8250_v33  ;;  %613 = vmatmul.bf16.gmra.mxu2 %v465_v34  ;;  %v2009_v34 = vunpack.c.l.b16 %v1928_v29 }
  0x9c   : > { %846 = vmatmul.bf16.gmra.mxu3 %v698_v35 }
  0x9d   : > { %806 = vmatmul.bf16.gmra.mxu1 %v8252_v36  ;;  %v2038_v38 = vpack.c.b16 %v2009_v34, %v2008_v32  ;;  %v7827_v32 = vld [vmem:[%s9610_s1 + $0x1e0] sm:$0xff]  ;;  %v7006_v34 = vld [vmem:[%s8022_s16 + $0x92] sm:$0xff] }
  0x9e   : > { %2812 = vmatpush.bf16.msra.mxu3 %v7827_v32  ;;  %v6851_v32 = vld [vmem:[%s8022_s16 + $0xc8] sm:$0xff] }
  0xa8   : > { %v539_v54 = vpop.f32.mrf.mxu0 }
  0xaa   : > { %v772_v57 = vpop.f32.mrf.mxu1 }
  0xab   : > { %v8260_v58 = vadd.f32 %v772_v57, %v539_v54  ;;  %1085 = vmatmul.bf16.vlgmr.msrb.gmra.mxu2 %v997_v53  ;;  %1778 = vmatmul.bf16.vlgmr.msrb.gmra.mxu0 %v8088_v13  ;;  %v2010_v57 = vunpack.c.l.b16 %v1929_v52 }
  0xac   : > { %1432 = vmatmul.bf16.vlgmr.msrb.gmra.mxu3 %v8090_v16  ;;  %v1926_v16 = vpack.c.bf16 %v6999_v63, %v6999_v63 }
  0xad   : > { %2124 = vmatmul.bf16.vlgmr.msrb.gmra.mxu1 %v2036_v55 }
  0xae   : > { %v579_v0 = vpop.f32.mrf.mxu2  ;;  %v2007_v8 = vunpack.c.l.b16 %v1926_v16  ;;  %v7004_v16 = vld [vmem:[%s8022_s16 + $0x7a] sm:$0xff] }
  0xaf   : > { %v812_v1 = vpop.f32.mrf.mxu3 }
  0xb0   : > { %v8272_v2 = vadd.f32 %v812_v1, %v579_v0  ;;  %v541_v13 = vpop.f32.mrf.mxu0  ;;  %v2037_v17 = vpack.c.b16 %v2007_v8, %v2006_v7 }
  0xb2   : > { %v774_v4 = vpop.f32.mrf.mxu1 }
  0xb3   : > { %v8274_v5 = vadd.f32 %v774_v4, %v541_v13  ;;  %v7005_v4 = vld [vmem:[%s8022_s16 + $0x82] sm:$0xff] }
  0xb6   : > { %v581_v9 = vpop.f32.mrf.mxu2 }
  0xb7   : > { %v814_v10 = vpop.f32.mrf.mxu3 }
  0xb8   : > { %v8279_v12 = vadd.f32 %v814_v10, %v581_v9  ;;  %v544_v14 = vpop.f32.mrf.mxu0  ;;  %v1931_v10 = vpack.c.bf16 %v7004_v16, %v7004_v16 }
  0xba   : > { %v777_v19 = vpop.f32.mrf.mxu1  ;;  %v2012_v22 = vunpack.c.l.b16 %v1931_v10 }
  0xbb   : > { %v8281_v20 = vadd.f32 %v777_v19, %v544_v14  ;;  %1090 = vmatmul.bf16.gmra.mxu2 %v2036_v55  ;;  %1783 = vmatmul.bf16.gmra.mxu0 %v8111_v44  ;;  %v7836_v55 = vld [vmem:[%s9610_s1 + $0x228] sm:$0xff]  ;;  %v1932_v14 = vpack.c.bf16 %v7005_v4, %v7005_v4 }
  0xbc   : > { %1437 = vmatmul.bf16.gmra.mxu3 %v8113_v47  ;;  %3157 = vmatpush.bf16.msra.mxu0 %v7836_v55 }
  0xbd   : > { %2129 = vmatmul.bf16.gmra.mxu1 %v2037_v17  ;;  %v2013_v23 = vunpack.c.l.b16 %v1932_v14 }
  0xbe   : > { %v584_v24 = vpop.f32.mrf.mxu2 }
  0xbf   : > { %v817_v25 = vpop.f32.mrf.mxu3 }
  0xc0   : > { %v8287_v26 = vadd.f32 %v817_v25, %v584_v24  ;;  %v546_v27 = vpop.f32.mrf.mxu0  ;;  %3158 = vmatpush.bf16.msra.mxu0 %v7835_v43 }
  0xc2   : > { %v779_v30 = vpop.f32.mrf.mxu1 }
  0xc3   : > { %v8289_v31 = vadd.f32 %v779_v30, %v546_v27  ;;  %v2040_v27 = vpack.c.b16 %v2013_v23, %v2012_v22  ;;  %v7819_v30 = vld [vmem:[%s9610_s1 + $0x1a0] sm:$0xff] }
  0xc4   : > { %2466 = vmatpush.bf16.msra.mxu2 %v7819_v30  ;;  %v7826_v30 = vld [vmem:[%s9610_s1 + $0x1d8] sm:$0xff] }
  0xc5   : > { %2813 = vmatpush.bf16.msra.mxu3 %v7826_v30 }
  0xc6   : > { %v586_v44 = vpop.f32.mrf.mxu2 }
  0xc7   : > { %v819_v35 = vpop.f32.mrf.mxu3 }
  0xc8   : > { %v8291_v47 = vadd.f32 %v819_v35, %v586_v44  ;;  %v549_v37 = vpop.f32.mrf.mxu0  ;;  %v7007_v44 = vld [vmem:[%s8022_s16 + $0x9a] sm:$0xff] }
  0xca   : > { %v782_v39 = vpop.f32.mrf.mxu1 }
  0xcb   : > { %v8293_v40 = vadd.f32 %v782_v39, %v549_v37  ;;  %1095 = vmatmul.bf16.gmra.mxu2 %v2037_v17  ;;  %1788 = vmatmul.bf16.gmra.mxu0 %v8134_v11  ;;  %v1933_v39 = vpack.c.bf16 %v7006_v34, %v7006_v34  ;;  %v7010_v34 = vld [vmem:[%s8022_s16 + $0xc2] sm:$0xff] }
  0xcc   : > { %1442 = vmatmul.bf16.gmra.mxu3 %v8136_v15  ;;  %v1930_v15 = vpack.c.bf16 %v7003_v46, %v7003_v46  ;;  %v1937_v43 = vpack.c.bf16 %v7010_v34, %v7010_v34 }
  0xcd   : > { %2134 = vmatmul.bf16.gmra.mxu1 %v2038_v38  ;;  %v2014_v46 = vunpack.c.l.b16 %v1933_v39 }
  0xce   : > { %v589_v48 = vpop.f32.mrf.mxu2  ;;  %v2011_v59 = vunpack.c.l.b16 %v1930_v15 }
  0xcf   : > { %v822_v50 = vpop.f32.mrf.mxu3 }
  0xd0   : > { %v8305_v51 = vadd.f32 %v822_v50, %v589_v48  ;;  %v551_v11 = vpop.f32.mrf.mxu0  ;;  %v2039_v1 = vpack.c.b16 %v2011_v59, %v2010_v57  ;;  %v7008_v59 = vld [vmem:[%s8022_s16 + $0xaa] sm:$0xff] }
  0xd1   : > { %v1935_v16 = vpack.c.bf16 %v7008_v59, %v7008_v59  ;;  %v2018_v59 = vunpack.c.l.b16 %v1937_v43 }
  0xd2   : > { %v784_v53 = vpop.f32.mrf.mxu1 }
  0xd3   : > { %v8307_v54 = vadd.f32 %v784_v53, %v551_v11 }
  0xd6   : > { %v591_v61 = vpop.f32.mrf.mxu2 }
  0xd7   : > { %v824_v62 = vpop.f32.mrf.mxu3 }
  0xd8   : > { %v8312_v63 = vadd.f32 %v824_v62, %v591_v61  ;;  %v554_v0 = vpop.f32.mrf.mxu0  ;;  %v7009_v61 = vld [vmem:[%s8022_s16 + $0xb2] sm:$0xff] }
  0xd9   : > { %v1936_v4 = vpack.c.bf16 %v7009_v61, %v7009_v61 }
  0xda   : > { %v787_v13 = vpop.f32.mrf.mxu1 }
  0xdb   : > { %v8314_v3 = vadd.f32 %v787_v13, %v554_v0  ;;  %1100 = vmatmul.bf16.gmra.mxu2 %v2038_v38  ;;  %1793 = vmatmul.bf16.gmra.mxu0 %v8157_v45 }
  0xdc   : > { %1447 = vmatmul.bf16.gmra.mxu3 %v8159_v49 }
  0xdd   : > { %2139 = vmatmul.bf16.gmra.mxu1 %v2039_v1 }
  0xde   : > { %v594_v6 = vpop.f32.mrf.mxu2 }
  0xdf   : > { %v827_v7 = vpop.f32.mrf.mxu3 }
  0xe0   : > { %v8320_v8 = vadd.f32 %v827_v7, %v594_v6  ;;  %v556_v9 = vpop.f32.mrf.mxu0 }
  0xe2   : > { %v789_v17 = vpop.f32.mrf.mxu1 }
  0xe3   : > { %v8322_v19 = vadd.f32 %v789_v17, %v556_v9  ;;  %v2016_v9 = vunpack.c.l.b16 %v1935_v16 }
  0xe6   : > { %v596_v45 = vpop.f32.mrf.mxu2 }
  0xe7   : > { %v829_v24 = vpop.f32.mrf.mxu3 }
  0xe8   : > { %v8324_v49 = vadd.f32 %v829_v24, %v596_v45  ;;  %v559_v25 = vpop.f32.mrf.mxu0  ;;  %v6850_v24 = vld [vmem:[%s8022_s16 + $0xc0] sm:$0xff] }
  0xea   : > { %v792_v28 = vpop.f32.mrf.mxu1 }
  0xeb   : > { %v8326_v29 = vadd.f32 %v792_v28, %v559_v25  ;;  %1105 = vmatmul.bf16.gmra.mxu2 %v2039_v1  ;;  %1798 = vmatmul.bf16.gmra.mxu0 %v8183_v18  ;;  %v6930_v25 = vld [vmem:[%s8022_s16 + $0xc1] sm:$0xff]  ;;  %v7818_v28 = vld [vmem:[%s9610_s1 + $0x198] sm:$0xff] }
  0xec   : > { %1452 = vmatmul.bf16.gmra.mxu3 %v8185_v21  ;;  %v1934_v21 = vpack.c.bf16 %v7007_v44, %v7007_v44  ;;  %v7011_v44 = vld [vmem:[%s8022_s16 + $0xca] sm:$0xff]  ;;  %2467 = vmatpush.bf16.msra.mxu2 %v7818_v28  ;;  %v7013_v28 = vld [vmem:[%s8022_s16 + $0xe2] sm:$0xff] }
  0xed   : > { %2144 = vmatmul.bf16.gmra.mxu1 %v2040_v27 }
  0xee   : > { %v599_v35 = vpop.f32.mrf.mxu2  ;;  %v2015_v48 = vunpack.c.l.b16 %v1934_v21 }
  0xef   : > { %v832_v37 = vpop.f32.mrf.mxu3 }
  0xf0   : > { %v8338_v38 = vadd.f32 %v832_v37, %v599_v35  ;;  %v561_v18 = vpop.f32.mrf.mxu0  ;;  %v2041_v53 = vpack.c.b16 %v2015_v48, %v2014_v46  ;;  %v1245_v37 = vpack.c.bf16 %v6850_v24, %v6850_v24  ;;  %v1938_v46 = vpack.c.bf16 %v7011_v44, %v7011_v44  ;;  %v6933_v24 = vld [vmem:[%s8022_s16 + $0xe1] sm:$0xff] }
  0xf2   : > { %v794_v41 = vpop.f32.mrf.mxu1  ;;  %v2019_v61 = vunpack.c.l.b16 %v1938_v46 }
  0xf3   : > { %v8340_v42 = vadd.f32 %v794_v41, %v561_v18  ;;  %v1591_v18 = vpack.c.bf16 %v6930_v25, %v6930_v25  ;;  %v1246_v41 = vpack.c.bf16 %v6851_v32, %v6851_v32  ;;  %v6853_v25 = vld [vmem:[%s8022_s16 + $0xe0] sm:$0xff] }
  0xf6   : > { %v601_v50 = vpop.f32.mrf.mxu2 }
  0xf7   : > { %v834_v11 = vpop.f32.mrf.mxu3 }
  0xf8   : > { %v8345_v52 = vadd.f32 %v834_v11, %v601_v50  ;;  %v564_v15 = vpop.f32.mrf.mxu0  ;;  %v1672_v11 = vunpack.c.l.b16 %v1591_v18  ;;  %v1248_v18 = vpack.c.bf16 %v6853_v25, %v6853_v25  ;;  %v7817_v25 = vld [vmem:[%s9610_s1 + $0x190] sm:$0xff] }
  0xf9   : > { %2468 = vmatpush.bf16.msra.mxu2 %v7817_v25 }
  0xfa   : > { %v797_v55 = vpop.f32.mrf.mxu1 }
  0xfb   : > { %v8347_v57 = vadd.f32 %v797_v55, %v564_v15  ;;  %1110 = vmatmul.bf16.gmra.mxu2 %v2040_v27  ;;  %1803 = vmatmul.bf16.gmra.mxu0 %v8215_v56  ;;  %v2017_v56 = vunpack.c.l.b16 %v1936_v4  ;;  %v6931_v27 = vld [vmem:[%s8022_s16 + $0xc9] sm:$0xff]  ;;  %v1327_v55 = vunpack.c.l.b16 %v1246_v41  ;;  %v7854_v41 = vld [vmem:[%s9612_s3 + $0x78] sm:$0xff] }
  0xfc   : > { %1457 = vmatmul.bf16.gmra.mxu3 %v8220_v60  ;;  %3736 = vmatpush.bf16.msra.mxu1 %v7854_v41 }
  0xfd   : > { %2149 = vmatmul.bf16.gmra.mxu1 %v2041_v53  ;;  %v2042_v22 = vpack.c.b16 %v2017_v56, %v2016_v9  ;;  %v2043_v56 = vpack.c.b16 %v2019_v61, %v2018_v59 }
  0xfe   : > { %v604_v62 = vpop.f32.mrf.mxu2 }
  0xff   : > { %v837_v0 = vpop.f32.mrf.mxu3 }
 0x100   : > { %v8353_v1 = vadd.f32 %v837_v0, %v604_v62  ;;  %v566_v13 = vpop.f32.mrf.mxu0  ;;  %v7834_v62 = vld [vmem:[%s9610_s1 + $0x218] sm:$0xff] }
 0x101   : > { %3159 = vmatpush.bf16.msra.mxu0 %v7834_v62 }
 0x102   : > { %v799_v6 = vpop.f32.mrf.mxu1 }
 0x103   : > { %v8355_v7 = vadd.f32 %v799_v6, %v566_v13 }
 0x106   : > { %v606_v10 = vpop.f32.mrf.mxu2 }
 0x107   : > { %v839_v60 = vpop.f32.mrf.mxu3 }
 0x108   : > { %v8357_v14 = vadd.f32 %v839_v60, %v606_v10  ;;  %v569_v17 = vpop.f32.mrf.mxu0 }
 0x10a   : > { %v802_v23 = vpop.f32.mrf.mxu1 }
 0x10b   : > { %v8359_v45 = vadd.f32 %v802_v23, %v569_v17  ;;  %1115 = vmatmul.bf16.gmra.mxu2 %v2041_v53  ;;  %1808 = vmatmul.bf16.gmra.mxu0 %v8250_v33  ;;  %v1326_v53 = vunpack.c.l.b16 %v1245_v37  ;;  %v6852_v17 = vld [vmem:[%s8022_s16 + $0xd8] sm:$0xff] }
 0x10c   : > { %1462 = vmatmul.bf16.gmra.mxu3 %v8252_v36  ;;  %v1592_v36 = vpack.c.bf16 %v6931_v27, %v6931_v27  ;;  %v6932_v23 = vld [vmem:[%s8022_s16 + $0xd9] sm:$0xff]  ;;  %v1247_v34 = vpack.c.bf16 %v6852_v17, %v6852_v17 }
 0x10d   : > { %2154 = vmatmul.bf16.gmra.mxu1 %v2042_v22  ;;  %v1351_v9 = vpack.c.b16 %v1327_v55, %v1326_v53  ;;  %v7012_v27 = vld [vmem:[%s8022_s16 + $0xda] sm:$0xff]  ;;  %v1593_v44 = vpack.c.bf16 %v6932_v23, %v6932_v23  ;;  %v6934_v23 = vld [vmem:[%s8022_s16 + $0xf1] sm:$0xff] }
 0x10e   : > { %v609_v35 = vpop.f32.mrf.mxu2  ;;  %v1673_v15 = vunpack.c.l.b16 %v1592_v36  ;;  %v1939_v36 = vpack.c.bf16 %v7012_v27, %v7012_v27  ;;  %v6855_v17 = vld [vmem:[%s8022_s16 + $0xf8] sm:$0xff] }
 0x10f   : > { %v842_v33 = vpop.f32.mrf.mxu3  ;;  %v1674_v46 = vunpack.c.l.b16 %v1593_v44  ;;  %v7014_v27 = vld [vmem:[%s8022_s16 + $0xf2] sm:$0xff]  ;;  %v1595_v44 = vpack.c.bf16 %v6934_v23, %v6934_v23 }
 0x110   : > { %v8375_v39 = vadd.f32 %v842_v33, %v609_v35  ;;  %v571_v21 = vpop.f32.mrf.mxu0  ;;  %v1697_v16 = vpack.c.b16 %v1673_v15, %v1672_v11  ;;  %v1594_v35 = vpack.c.bf16 %v6933_v24, %v6933_v24  ;;  %v1328_v11 = vunpack.c.l.b16 %v1247_v34  ;;  %v6935_v24 = vld [vmem:[%s8022_s16 + $0xf9] sm:$0xff] }
 0x111   : > { %v1329_v15 = vunpack.c.l.b16 %v1248_v18  ;;  %v2020_v53 = vunpack.c.l.b16 %v1939_v36  ;;  %v1250_v36 = vpack.c.bf16 %v6855_v17, %v6855_v17 }
 0x112   : > { %v804_v48 = vpop.f32.mrf.mxu1 }
 0x113   : > { %v8377_v50 = vadd.f32 %v804_v48, %v571_v21  ;;  %v1675_v48 = vunpack.c.l.b16 %v1594_v35  ;;  %v1596_v35 = vpack.c.bf16 %v6935_v24, %v6935_v24 }
 0x115   : > { %v1698_v62 = vpack.c.b16 %v1675_v48, %v1674_v46 }
 0x116   : > { %v611_v0 = vpop.f32.mrf.mxu2 }
 0x117   : > { %v844_v13 = vpop.f32.mrf.mxu3 }
 0x118   : > { %v8382_v4 = vadd.f32 %v844_v13, %v611_v0  ;;  %v574_v6 = vpop.f32.mrf.mxu0 }
 0x11a   : > { %v807_v10 = vpop.f32.mrf.mxu1 }
 0x11b   : > { %v8384_v60 = vadd.f32 %v807_v10, %v574_v6  ;;  %1120 = vmatmul.bf16.gmra.mxu2 %v2042_v22  ;;  %1813 = vmatmul.bf16.gmra.mxu0 %v1697_v16  ;;  %v1940_v22 = vpack.c.bf16 %v7013_v28, %v7013_v28  ;;  %v1352_v16 = vpack.c.b16 %v1329_v15, %v1328_v11  ;;  %v6854_v10 = vld [vmem:[%s8022_s16 + $0xf0] sm:$0xff]  ;;  %v7015_v28 = vld [vmem:[%s8022_s16 + $0xfa] sm:$0xff]  ;;  %v1676_v11 = vunpack.c.l.b16 %v1595_v44 }
 0x11c   : > { %1467 = vmatmul.bf16.gmra.mxu3 %v1351_v9  ;;  %v1249_v18 = vpack.c.bf16 %v6854_v10, %v6854_v10  ;;  %v1677_v15 = vunpack.c.l.b16 %v1596_v35  ;;  %v7016_v44 = vld [vmem:[%s8022_s16 + $0x10a] sm:$0xff]  ;;  %v7017_v35 = vld [vmem:[%s8022_s16 + $0x112] sm:$0xff] }
 0x11d   : > { %2159 = vmatmul.bf16.gmra.mxu1 %v2043_v56  ;;  %v2021_v55 = vunpack.c.l.b16 %v1940_v22  ;;  %v1941_v22 = vpack.c.bf16 %v7014_v27, %v7014_v27 }
 0x11e   : > { %v614_v30 = vpop.f32.mrf.mxu2 }
 0x11f   : > { %v847_v32 = vpop.f32.mrf.mxu3  ;;  %v2044_v6 = vpack.c.b16 %v2021_v55, %v2020_v53  ;;  %v1330_v53 = vunpack.c.l.b16 %v1249_v18  ;;  %v1331_v55 = vunpack.c.l.b16 %v1250_v36 }
 0x120   : > { %v8392_v33 = vadd.f32 %v847_v32, %v614_v30  ;;  %v576_v37 = vpop.f32.mrf.mxu0  ;;  %v7825_v30 = vld [vmem:[%s9610_s1 + $0x1d0] sm:$0xff] }
 0x121   : > { %2814 = vmatpush.bf16.msra.mxu3 %v7825_v30  ;;  %v1353_v24 = vpack.c.b16 %v1331_v55, %v1330_v53  ;;  %v6856_v30 = vld [vmem:[%s8022_s16 + $0x108] sm:$0xff] }
 0x122   : > { %v809_v21 = vpop.f32.mrf.mxu1 }
 0x123   : > { %v8397_v43 = vadd.f32 %v809_v21, %v576_v37  ;;  %v1942_v21 = vpack.c.bf16 %v7015_v28, %v7015_v28 }
 0x126   : > { %v616_v59 = vpop.f32.mrf.mxu2 }
 0x127   : > { %v849_v61 = vpop.f32.mrf.mxu3 }
 0x128   : > { %v8399_v0 = vadd.f32 %v849_v61, %v616_v59  ;;  %v1779_v13 = vpop.f32.mrf.mxu0  ;;  %v2022_v59 = vunpack.c.l.b16 %v1941_v22  ;;  %v2023_v61 = vunpack.c.l.b16 %v1942_v21 }
 0x12a   : > { %v2125_v9 = vpop.f32.mrf.mxu1 }
 0x12b   : > { %1125 = vmatmul.bf16.gmra.mxu2 %v2043_v56  ;;  %1818 = vmatmul.bf16.gmra.mxu0 %v1698_v62 }
 0x12c   : > { %1472 = vmatmul.bf16.gmra.mxu3 %v1352_v16 }
 0x12d   : > { %2164 = vmatmul.bf16.gmra.mxu1 %v2044_v6 }
 0x12e   : > { %v1086_v32 = vpop.f32.mrf.mxu2 }
 0x12f   : > { %v1166_v56 = vadd.f32 %v1086_v32, %v8260_v58  ;;  %v1433_v34 = vpop.f32.mrf.mxu3  ;;  %v7833_v58 = vld [vmem:[%s9610_s1 + $0x210] sm:$0xff] }
 0x130   : > { %v1781_v37 = vpop.f32.mrf.mxu0  ;;  %3160 = vmatpush.bf16.msra.mxu0 %v7833_v58  ;;  %v6936_v32 = vld [vmem:[%s8022_s16 + $0x109] sm:$0xff] }
 0x131   : > { %v1513_v41 = vadd.f32 %v1433_v34, %v1166_v56  ;;  %v6857_v34 = vld [vmem:[%s8022_s16 + $0x110] sm:$0xff]  ;;  %v1597_v21 = vpack.c.bf16 %v6936_v32, %v6936_v32 }
 0x132   : > { %v2127_v46 = vpop.f32.mrf.mxu1 }
 0x133   : > { %v1859_v48 = vadd.f32 %v1779_v13, %v1513_v41  ;;  %v1699_v13 = vpack.c.b16 %v1677_v15, %v1676_v11  ;;  %v1252_v11 = vpack.c.bf16 %v6857_v34, %v6857_v34  ;;  %v1944_v15 = vpack.c.bf16 %v7017_v35, %v7017_v35 }
 0x135   : > { %v8414_v62 = vadd.f32 %v2125_v9, %v1859_v48  ;;  %v2045_v9 = vpack.c.b16 %v2023_v61, %v2022_v59  ;;  %v1678_v61 = vunpack.c.l.b16 %v1597_v21 }
 0x136   : > { %v1088_v16 = vpop.f32.mrf.mxu2 }
 0x137   : > { %v1167_v10 = vadd.f32 %v1088_v16, %v8274_v5  ;;  %v1435_v17 = vpop.f32.mrf.mxu3  ;;  %v6937_v5 = vld [vmem:[%s8022_s16 + $0x111] sm:$0xff] }
 0x138   : > { %v1784_v23 = vpop.f32.mrf.mxu0  ;;  %v1598_v41 = vpack.c.bf16 %v6937_v5, %v6937_v5 }
 0x139   : > { %v1514_v25 = vadd.f32 %v1435_v17, %v1167_v10  ;;  %v2025_v17 = vunpack.c.l.b16 %v1944_v15 }
 0x13a   : > { %v2130_v27 = vpop.f32.mrf.mxu1  ;;  %v1679_v58 = vunpack.c.l.b16 %v1598_v41  ;;  %v7018_v41 = vld [vmem:[%s8022_s16 + $0x122] sm:$0xff] }
 0x13b   : > { %1130 = vmatmul.bf16.gmra.mxu2 %v2044_v6  ;;  %1823 = vmatmul.bf16.gmra.mxu0 %v1699_v13  ;;  %v1860_v28 = vadd.f32 %v1781_v37, %v1514_v25  ;;  %v1251_v6 = vpack.c.bf16 %v6856_v30, %v6856_v30  ;;  %v1943_v37 = vpack.c.bf16 %v7016_v44, %v7016_v44 }
 0x13c   : > { %1477 = vmatmul.bf16.gmra.mxu3 %v1353_v24  ;;  %v1700_v30 = vpack.c.b16 %v1679_v58, %v1678_v61  ;;  %v1945_v58 = vpack.c.bf16 %v7018_v41, %v7018_v41 }
 0x13d   : > { %2169 = vmatmul.bf16.gmra.mxu1 %v2045_v9  ;;  %v8423_v56 = vadd.f32 %v2127_v46, %v1860_v28  ;;  %v7853_v46 = vld [vmem:[%s9612_s3 + $0x70] sm:$0xff]  ;;  %v1332_v16 = vunpack.c.l.b16 %v1251_v6  ;;  %v2024_v10 = vunpack.c.l.b16 %v1943_v37 }
 0x13e   : > { %v1091_v18 = vpop.f32.mrf.mxu2  ;;  %3737 = vmatpush.bf16.msra.mxu1 %v7853_v46  ;;  %v7019_v6 = vld [vmem:[%s8022_s16 + $0x12a] sm:$0xff] }
 0x13f   : > { %v1168_v36 = vadd.f32 %v1091_v18, %v8281_v20  ;;  %v1438_v22 = vpop.f32.mrf.mxu3  ;;  %v1333_v20 = vunpack.c.l.b16 %v1252_v11  ;;  %v2046_v5 = vpack.c.b16 %v2025_v17, %v2024_v10  ;;  %v6858_v18 = vld [vmem:[%s8022_s16 + $0x120] sm:$0xff] }
 0x140   : > { %v1786_v48 = vpop.f32.mrf.mxu0 }
 0x141   : > { %v1515_v53 = vadd.f32 %v1438_v22, %v1168_v36  ;;  %v6938_v36 = vld [vmem:[%s8022_s16 + $0x121] sm:$0xff]  ;;  %v6939_v22 = vld [vmem:[%s8022_s16 + $0x129] sm:$0xff] }
 0x142   : > { %v2132_v55 = vpop.f32.mrf.mxu1  ;;  %v1599_v15 = vpack.c.bf16 %v6938_v36, %v6938_v36 }
 0x143   : > { %v1861_v59 = vadd.f32 %v1784_v23, %v1515_v53  ;;  %v1354_v23 = vpack.c.b16 %v1333_v20, %v1332_v16  ;;  %v1600_v53 = vpack.c.bf16 %v6939_v22, %v6939_v22 }
 0x144   : > { %v1680_v17 = vunpack.c.l.b16 %v1599_v15  ;;  %v7020_v15 = vld [vmem:[%s8022_s16 + $0x13a] sm:$0xff] }
 0x145   : > { %v8432_v13 = vadd.f32 %v2130_v27, %v1861_v59  ;;  %v6859_v27 = vld [vmem:[%s8022_s16 + $0x128] sm:$0xff]  ;;  %v1253_v59 = vpack.c.bf16 %v6858_v18, %v6858_v18 }
 0x146   : > { %v1093_v24 = vpop.f32.mrf.mxu2  ;;  %v1254_v61 = vpack.c.bf16 %v6859_v27, %v6859_v27 }
 0x147   : > { %v1169_v25 = vadd.f32 %v1093_v24, %v8289_v31  ;;  %v1440_v28 = vpop.f32.mrf.mxu3  ;;  %v7816_v31 = vld [vmem:[%s9610_s1 + $0x188] sm:$0xff]  ;;  %v1681_v24 = vunpack.c.l.b16 %v1600_v53 }
 0x148   : > { %v1789_v32 = vpop.f32.mrf.mxu0  ;;  %2469 = vmatpush.bf16.msra.mxu2 %v7816_v31  ;;  %v7021_v53 = vld [vmem:[%s8022_s16 + $0x142] sm:$0xff] }
 0x149   : > { %v1516_v34 = vadd.f32 %v1440_v28, %v1169_v25  ;;  %v1334_v25 = vunpack.c.l.b16 %v1253_v59  ;;  %v1335_v28 = vunpack.c.l.b16 %v1254_v61 }
 0x14a   : > { %v2135_v44 = vpop.f32.mrf.mxu1 }
 0x14b   : > { %1135 = vmatmul.bf16.gmra.mxu2 %v2045_v9  ;;  %1828 = vmatmul.bf16.gmra.mxu0 %v1700_v30  ;;  %v1862_v35 = vadd.f32 %v1786_v48, %v1516_v34  ;;  %v7824_v9 = vld [vmem:[%s9610_s1 + $0x1c8] sm:$0xff]  ;;  %v2026_v30 = vunpack.c.l.b16 %v1945_v58  ;;  %v1355_v22 = vpack.c.b16 %v1335_v28, %v1334_v25 }
 0x14c   : > { %1482 = vmatmul.bf16.gmra.mxu3 %v1354_v23 }
 0x14d   : > { %2174 = vmatmul.bf16.gmra.mxu1 %v2046_v5  ;;  %v8442_v21 = vadd.f32 %v2132_v55, %v1862_v35  ;;  %2815 = vmatpush.bf16.msra.mxu3 %v7824_v9  ;;  %v1946_v55 = vpack.c.bf16 %v7019_v6, %v7019_v6  ;;  %v6860_v9 = vld [vmem:[%s8022_s16 + $0x138] sm:$0xff] }
 0x14e   : > { %v1096_v11 = vpop.f32.mrf.mxu2 }
 0x14f   : > { %v1170_v48 = vadd.f32 %v1096_v11, %v8293_v40  ;;  %v1443_v37 = vpop.f32.mrf.mxu3  ;;  %v2027_v23 = vunpack.c.l.b16 %v1946_v55  ;;  %v7832_v40 = vld [vmem:[%s9610_s1 + $0x208] sm:$0xff]  ;;  %v6940_v11 = vld [vmem:[%s8022_s16 + $0x139] sm:$0xff] }
 0x150   : > { %v1791_v46 = vpop.f32.mrf.mxu0  ;;  %3161 = vmatpush.bf16.msra.mxu0 %v7832_v40  ;;  %v1601_v55 = vpack.c.bf16 %v6940_v11, %v6940_v11 }
 0x151   : > { %v1517_v16 = vadd.f32 %v1443_v37, %v1170_v48  ;;  %v6861_v37 = vld [vmem:[%s8022_s16 + $0x140] sm:$0xff] }
 0x152   : > { %v2137_v20 = vpop.f32.mrf.mxu1 }
 0x153   : > { %v1863_v10 = vadd.f32 %v1789_v32, %v1517_v16  ;;  %v1701_v32 = vpack.c.b16 %v1681_v24, %v1680_v17  ;;  %v1256_v17 = vpack.c.bf16 %v6861_v37, %v6861_v37  ;;  %v1948_v24 = vpack.c.bf16 %v7021_v53, %v7021_v53 }
 0x155   : > { %v8450_v34 = vadd.f32 %v2135_v44, %v1863_v10  ;;  %v2047_v44 = vpack.c.b16 %v2027_v23, %v2026_v30  ;;  %v1682_v23 = vunpack.c.l.b16 %v1601_v55 }
 0x156   : > { %v1098_v35 = vpop.f32.mrf.mxu2 }
 0x157   : > { %v1171_v18 = vadd.f32 %v1098_v35, %v8307_v54  ;;  %v1445_v27 = vpop.f32.mrf.mxu3  ;;  %v6941_v54 = vld [vmem:[%s8022_s16 + $0x141] sm:$0xff] }
 0x158   : > { %v1794_v36 = vpop.f32.mrf.mxu0  ;;  %v1602_v16 = vpack.c.bf16 %v6941_v54, %v6941_v54 }
 0x159   : > { %v1518_v31 = vadd.f32 %v1445_v27, %v1171_v18  ;;  %v2029_v27 = vunpack.c.l.b16 %v1948_v24 }
 0x15a   : > { %v2140_v41 = vpop.f32.mrf.mxu1  ;;  %v1683_v40 = vunpack.c.l.b16 %v1602_v16  ;;  %v7022_v16 = vld [vmem:[%s8022_s16 + $0x152] sm:$0xff] }
 0x15b   : > { %1140 = vmatmul.bf16.gmra.mxu2 %v2046_v5  ;;  %1833 = vmatmul.bf16.gmra.mxu0 %v1701_v32  ;;  %v1864_v6 = vadd.f32 %v1791_v46, %v1518_v31  ;;  %v1255_v5 = vpack.c.bf16 %v6860_v9, %v6860_v9  ;;  %v1947_v46 = vpack.c.bf16 %v7020_v15, %v7020_v15 }
 0x15c   : > { %1487 = vmatmul.bf16.gmra.mxu3 %v1355_v22  ;;  %v1702_v9 = vpack.c.b16 %v1683_v40, %v1682_v23  ;;  %v1949_v40 = vpack.c.bf16 %v7022_v16, %v7022_v16 }
 0x15d   : > { %2179 = vmatmul.bf16.gmra.mxu1 %v2047_v44  ;;  %v8459_v48 = vadd.f32 %v2137_v20, %v1864_v6  ;;  %v7852_v20 = vld [vmem:[%s9612_s3 + $0x68] sm:$0xff]  ;;  %v1336_v35 = vunpack.c.l.b16 %v1255_v5  ;;  %v2028_v18 = vunpack.c.l.b16 %v1947_v46  ;;  %v7023_v5 = vld [vmem:[%s8022_s16 + $0x15a] sm:$0xff] }
 0x15e   : > { %v1101_v59 = vpop.f32.mrf.mxu2  ;;  %3738 = vmatpush.bf16.msra.mxu1 %v7852_v20 }
 0x15f   : > { %v1172_v61 = vadd.f32 %v1101_v59, %v8314_v3  ;;  %v1448_v58 = vpop.f32.mrf.mxu3  ;;  %v1337_v3 = vunpack.c.l.b16 %v1256_v17  ;;  %v2048_v54 = vpack.c.b16 %v2029_v27, %v2028_v18  ;;  %v6862_v59 = vld [vmem:[%s8022_s16 + $0x150] sm:$0xff] }
 0x160   : > { %v1796_v10 = vpop.f32.mrf.mxu0 }
 0x161   : > { %v1519_v25 = vadd.f32 %v1448_v58, %v1172_v61  ;;  %v6942_v61 = vld [vmem:[%s8022_s16 + $0x151] sm:$0xff]  ;;  %v6943_v58 = vld [vmem:[%s8022_s16 + $0x159] sm:$0xff] }
 0x162   : > { %v2142_v28 = vpop.f32.mrf.mxu1  ;;  %v1603_v24 = vpack.c.bf16 %v6942_v61, %v6942_v61 }
 0x163   : > { %v1865_v30 = vadd.f32 %v1794_v36, %v1519_v25  ;;  %v1356_v36 = vpack.c.b16 %v1337_v3, %v1336_v35  ;;  %v1604_v25 = vpack.c.bf16 %v6943_v58, %v6943_v58 }
 0x164   : > { %v1684_v27 = vunpack.c.l.b16 %v1603_v24  ;;  %v7025_v24 = vld [vmem:[%s8022_s16 + $0x172] sm:$0xff] }
 0x165   : > { %v8468_v32 = vadd.f32 %v2140_v41, %v1865_v30  ;;  %v6863_v41 = vld [vmem:[%s8022_s16 + $0x158] sm:$0xff]  ;;  %v1257_v30 = vpack.c.bf16 %v6862_v59, %v6862_v59 }
 0x166   : > { %v1103_v22 = vpop.f32.mrf.mxu2  ;;  %v1258_v23 = vpack.c.bf16 %v6863_v41, %v6863_v41 }
 0x167   : > { %v1173_v31 = vadd.f32 %v1103_v22, %v8322_v19  ;;  %v1450_v6 = vpop.f32.mrf.mxu3  ;;  %v7815_v19 = vld [vmem:[%s9610_s1 + $0x180] sm:$0xff]  ;;  %v1685_v22 = vunpack.c.l.b16 %v1604_v25 }
 0x168   : > { %v1799_v11 = vpop.f32.mrf.mxu0  ;;  %2470 = vmatpush.bf16.msra.mxu2 %v7815_v19 }
 0x169   : > { %v1520_v37 = vadd.f32 %v1450_v6, %v1173_v31  ;;  %v1338_v31 = vunpack.c.l.b16 %v1257_v30  ;;  %v1339_v6 = vunpack.c.l.b16 %v1258_v23 }
 0x16a   : > { %v2145_v15 = vpop.f32.mrf.mxu1 }
 0x16b   : > { %1145 = vmatmul.bf16.gmra.mxu2 %v2047_v44  ;;  %1838 = vmatmul.bf16.gmra.mxu0 %v1702_v9  ;;  %v1866_v53 = vadd.f32 %v1796_v10, %v1520_v37  ;;  %v7823_v44 = vld [vmem:[%s9610_s1 + $0x1c0] sm:$0xff]  ;;  %v2030_v9 = vunpack.c.l.b16 %v1949_v40  ;;  %v1357_v58 = vpack.c.b16 %v1339_v6, %v1338_v31 }
 0x16c   : > { %1492 = vmatmul.bf16.gmra.mxu3 %v1356_v36  ;;  %v7831_v37 = vld [vmem:[%s9610_s1 + $0x200] sm:$0xff] }
 0x16d   : > { %2184 = vmatmul.bf16.gmra.mxu1 %v2048_v54  ;;  %v8478_v55 = vadd.f32 %v2142_v28, %v1866_v53  ;;  %2816 = vmatpush.bf16.msra.mxu3 %v7823_v44  ;;  %v1950_v28 = vpack.c.bf16 %v7023_v5, %v7023_v5  ;;  %v6864_v44 = vld [vmem:[%s8022_s16 + $0x168] sm:$0xff]  ;;  %v7851_v6 = vld [vmem:[%s9612_s3 + $0x60] sm:$0xff] }
 0x16e   : > { %v1106_v17 = vpop.f32.mrf.mxu2  ;;  %3162 = vmatpush.bf16.msra.mxu0 %v7831_v37  ;;  %3739 = vmatpush.bf16.msra.mxu1 %v7851_v6 }
 0x16f   : > { %v1174_v10 = vadd.f32 %v1106_v17, %v8326_v29  ;;  %v1453_v46 = vpop.f32.mrf.mxu3  ;;  %v2031_v36 = vunpack.c.l.b16 %v1950_v28  ;;  %v6945_v17 = vld [vmem:[%s8022_s16 + $0x171] sm:$0xff] }
 0x170   : > { %v1801_v20 = vpop.f32.mrf.mxu0  ;;  %v1606_v28 = vpack.c.bf16 %v6945_v17, %v6945_v17 }
 0x171   : > { %v1521_v35 = vadd.f32 %v1453_v46, %v1174_v10  ;;  %v6865_v10 = vld [vmem:[%s8022_s16 + $0x170] sm:$0xff] }
 0x172   : > { %v8486_v3 = vpop.f32.mrf.mxu1  ;;  %v7024_v46 = vld [vmem:[%s8022_s16 + $0x16a] sm:$0xff]  ;;  %v1687_v37 = vunpack.c.l.b16 %v1606_v28 }
 0x173   : > { %v1867_v18 = vadd.f32 %v1799_v11, %v1521_v35  ;;  %v1703_v11 = vpack.c.b16 %v1685_v22, %v1684_v27  ;;  %v1951_v27 = vpack.c.bf16 %v7024_v46, %v7024_v46  ;;  %v7027_v28 = vld [vmem:[%s8022_s16 + $0x18a] sm:$0xff] }
 0x175   : > { %v8488_v29 = vadd.f32 %v2145_v15, %v1867_v18  ;;  %v2049_v15 = vpack.c.b16 %v2031_v36, %v2030_v9  ;;  %v1259_v18 = vpack.c.bf16 %v6864_v44, %v6864_v44 }
 0x176   : > { %v1108_v53 = vpop.f32.mrf.mxu2 }
 0x177   : > { %v1175_v59 = vadd.f32 %v1108_v53, %v8340_v42  ;;  %v1455_v41 = vpop.f32.mrf.mxu3  ;;  %v6944_v42 = vld [vmem:[%s8022_s16 + $0x169] sm:$0xff] }
 0x178   : > { %v1804_v61 = vpop.f32.mrf.mxu0  ;;  %v1605_v40 = vpack.c.bf16 %v6944_v42, %v6944_v42 }
 0x179   : > { %v1522_v19 = vadd.f32 %v1455_v41, %v1175_v59  ;;  %v2032_v59 = vunpack.c.l.b16 %v1951_v27 }
 0x17a   : > { %v2150_v16 = vpop.f32.mrf.mxu1  ;;  %v1686_v36 = vunpack.c.l.b16 %v1605_v40  ;;  %v7026_v40 = vld [vmem:[%s8022_s16 + $0x182] sm:$0xff] }
 0x17b   : > { %1150 = vmatmul.bf16.gmra.mxu2 %v2048_v54  ;;  %1843 = vmatmul.bf16.gmra.mxu0 %v1703_v11  ;;  %v8494_v5 = vadd.f32 %v1801_v20, %v1522_v19  ;;  %v1260_v54 = vpack.c.bf16 %v6865_v10, %v6865_v10  ;;  %v1952_v20 = vpack.c.bf16 %v7025_v24, %v7025_v24 }
 0x17c   : > { %1497 = vmatmul.bf16.gmra.mxu3 %v1357_v58  ;;  %v1704_v42 = vpack.c.b16 %v1687_v37, %v1686_v36  ;;  %v1953_v36 = vpack.c.bf16 %v7026_v40, %v7026_v40 }
 0x17d   : > { %2189 = vmatmul.bf16.gmra.mxu1 %v2049_v15  ;;  %v1341_v53 = vunpack.c.l.b16 %v1260_v54  ;;  %v2033_v41 = vunpack.c.l.b16 %v1952_v20 }
 0x17e   : > { %v1111_v25 = vpop.f32.mrf.mxu2 }
 0x17f   : > { %v1176_v30 = vadd.f32 %v1111_v25, %v8347_v57  ;;  %v1458_v23 = vpop.f32.mrf.mxu3  ;;  %v1340_v57 = vunpack.c.l.b16 %v1259_v18  ;;  %v2050_v10 = vpack.c.b16 %v2033_v41, %v2032_v59 }
 0x180   : > { %v1806_v35 = vpop.f32.mrf.mxu0 }
 0x181   : > { %v1523_v22 = vadd.f32 %v1458_v23, %v1176_v30  ;;  %v1358_v17 = vpack.c.b16 %v1341_v53, %v1340_v57  ;;  %v6946_v30 = vld [vmem:[%s8022_s16 + $0x181] sm:$0xff]  ;;  %v6947_v23 = vld [vmem:[%s8022_s16 + $0x189] sm:$0xff] }
 0x182   : > { %v8503_v31 = vpop.f32.mrf.mxu1  ;;  %v1607_v20 = vpack.c.bf16 %v6946_v30, %v6946_v30 }
 0x183   : > { %v1869_v9 = vadd.f32 %v1804_v61, %v1523_v22  ;;  %v1608_v22 = vpack.c.bf16 %v6947_v23, %v6947_v23 }
 0x184   : > { %v1688_v59 = vunpack.c.l.b16 %v1607_v20  ;;  %v7156_v20 = vld [vmem:[%s8022_s16 + $0x31] sm:$0xff] }
 0x185   : > { %v8508_v11 = vadd.f32 %v2150_v16, %v1869_v9  ;;  %v6866_v16 = vld [vmem:[%s8022_s16 + $0x180] sm:$0xff]  ;;  %v1689_v41 = vunpack.c.l.b16 %v1608_v22 }
 0x186   : > { %v1113_v58 = vpop.f32.mrf.mxu2  ;;  %v1261_v9 = vpack.c.bf16 %v6866_v16, %v6866_v16  ;;  %v7157_v22 = vld [vmem:[%s8022_s16 + $0x39] sm:$0xff] }
 0x187   : > { %v1177_v19 = vadd.f32 %v1113_v58, %v8355_v7  ;;  %v1460_v44 = vpop.f32.mrf.mxu3  ;;  %v6867_v7 = vld [vmem:[%s8022_s16 + $0x188] sm:$0xff]  ;;  %v1705_v30 = vpack.c.b16 %v1689_v41, %v1688_v59  ;;  %v2616_v41 = vpack.c.bf16 %v7156_v20, %v7156_v20 }
 0x188   : > { %v1809_v61 = vpop.f32.mrf.mxu0  ;;  %v1342_v58 = vunpack.c.l.b16 %v1261_v9 }
 0x189   : > { %v1524_v46 = vadd.f32 %v1460_v44, %v1177_v19  ;;  %v2034_v44 = vunpack.c.l.b16 %v1953_v36 }
 0x18a   : > { %v2155_v24 = vpop.f32.mrf.mxu1 }
 0x18b   : > { %1155 = vmatmul.bf16.gmra.mxu2 %v2049_v15  ;;  %1848 = vmatmul.bf16.gmra.mxu0 %v1704_v42  ;;  %v8511_v25 = vadd.f32 %v1806_v35, %v1524_v46  ;;  %v1262_v15 = vpack.c.bf16 %v6867_v7, %v6867_v7  ;;  %v1954_v35 = vpack.c.bf16 %v7027_v28, %v7027_v28 }
 0x18c   : > { %1502 = vmatmul.bf16.gmra.mxu3 %v1358_v17 }
 0x18d   : > { %2194 = vmatmul.bf16.gmra.mxu1 %v2050_v10  ;;  %v1343_v19 = vunpack.c.l.b16 %v1262_v15  ;;  %v2035_v42 = vunpack.c.l.b16 %v1954_v35 }
 0x18e   : > { %v1116_v18 = vpop.f32.mrf.mxu2 }
 0x18f   : > { %v1178_v54 = vadd.f32 %v1116_v18, %v8359_v45  ;;  %v1463_v27 = vpop.f32.mrf.mxu3  ;;  %v1359_v23 = vpack.c.b16 %v1343_v19, %v1342_v58  ;;  %v2051_v7 = vpack.c.b16 %v2035_v42, %v2034_v44  ;;  %v7850_v44 = vld [vmem:[%s9612_s3 + $0x58] sm:$0xff] }
 0x190   : > { %v1811_v6 = vpop.f32.mrf.mxu0  ;;  %3740 = vmatpush.bf16.msra.mxu1 %v7850_v44 }
 0x191   : > { %v1525_v37 = vadd.f32 %v1463_v27, %v1178_v54  ;;  %v7077_v54 = vld [vmem:[%s8022_s16 + $0x38] sm:$0xff] }
 0x192   : > { %v8520_v57 = vpop.f32.mrf.mxu1  ;;  %v7236_v27 = vld [vmem:[%s8022_s16 + $0x32] sm:$0xff] }
 0x193   : > { %v1871_v53 = vadd.f32 %v1809_v61, %v1525_v37  ;;  %v2271_v37 = vpack.c.bf16 %v7077_v54, %v7077_v54 }
 0x195   : > { %v8522_v45 = vadd.f32 %v2155_v24, %v1871_v53  ;;  %v7076_v24 = vld [vmem:[%s8022_s16 + $0x30] sm:$0xff]  ;;  %v2962_v53 = vpack.c.bf16 %v7236_v27, %v7236_v27 }
 0x196   : > { %v1118_v17 = vpop.f32.mrf.mxu2  ;;  %v2270_v15 = vpack.c.bf16 %v7076_v24, %v7076_v24 }
 0x197   : > { %v1179_v46 = vadd.f32 %v1118_v17, %v8377_v50  ;;  %v1465_v16 = vpop.f32.mrf.mxu3  ;;  %v7237_v50 = vld [vmem:[%s8022_s16 + $0x3a] sm:$0xff] }
 0x198   : > { %v1814_v61 = vpop.f32.mrf.mxu0  ;;  %v2963_v59 = vpack.c.bf16 %v7237_v50, %v7237_v50  ;;  %v2351_v42 = vunpack.c.l.b16 %v2270_v15 }
 0x199   : > { %v1526_v40 = vadd.f32 %v1465_v16, %v1179_v46  ;;  %v2352_v46 = vunpack.c.l.b16 %v2271_v37  ;;  %v3043_v16 = vunpack.c.l.b16 %v2962_v53  ;;  %v7239_v37 = vld [vmem:[%s8022_s16 + $0x52] sm:$0xff]  ;;  %v7158_v53 = vld [vmem:[%s8022_s16 + $0x49] sm:$0xff] }
 0x19a   : > { %v2160_v28 = vpop.f32.mrf.mxu1 }
 0x19b   : > { %1160 = vmatmul.bf16.gmra.mxu2 %v2050_v10  ;;  %1853 = vmatmul.bf16.gmra.mxu0 %v1705_v30  ;;  %v8525_v18 = vadd.f32 %v1811_v6, %v1526_v40  ;;  %v2617_v6 = vpack.c.bf16 %v7157_v22, %v7157_v22  ;;  %v3044_v30 = vunpack.c.l.b16 %v2963_v59  ;;  %v2383_v27 = vpack.c.b16 %v2352_v46, %v2351_v42 }
 0x19c   : > { %1507 = vmatmul.bf16.gmra.mxu3 %v1359_v23 }
 0x19d   : > { %2199 = vmatmul.bf16.gmra.mxu1 %v2051_v7  ;;  %v2698_v23 = vunpack.c.l.b16 %v2617_v6 }
 0x19e   : > { %v1121_v9 = vpop.f32.mrf.mxu2 }
 0x19f   : > { %v1180_v36 = vadd.f32 %v1121_v9, %v8384_v60  ;;  %v1468_v35 = vpop.f32.mrf.mxu3  ;;  %v2697_v60 = vunpack.c.l.b16 %v2616_v41 }
 0x1a0   : > { %v1816_v10 = vpop.f32.mrf.mxu0 }
 0x1a1   : > { %v1527_v58 = vadd.f32 %v1468_v35, %v1180_v36  ;;  %v2729_v20 = vpack.c.b16 %v2698_v23, %v2697_v60  ;;  %v7079_v36 = vld [vmem:[%s8022_s16 + $0x50] sm:$0xff] }
 0x1a2   : > { %v8534_v19 = vpop.f32.mrf.mxu1  ;;  %v7238_v35 = vld [vmem:[%s8022_s16 + $0x4a] sm:$0xff]  ;;  %v2273_v44 = vpack.c.bf16 %v7079_v36, %v7079_v36 }
 0x1a3   : > { %v1873_v17 = vadd.f32 %v1814_v61, %v1527_v58  ;;  %v3075_v61 = vpack.c.b16 %v3044_v30, %v3043_v16  ;;  %v2964_v42 = vpack.c.bf16 %v7238_v35, %v7238_v35  ;;  %v2618_v16 = vpack.c.bf16 %v7158_v53, %v7158_v53 }
 0x1a5   : > { %v8539_v7 = vadd.f32 %v2160_v28, %v1873_v17  ;;  %v7078_v28 = vld [vmem:[%s8022_s16 + $0x48] sm:$0xff]  ;;  %v2965_v17 = vpack.c.bf16 %v7239_v37, %v7239_v37 }
 0x1a6   : > { %v1123_v40 = vpop.f32.mrf.mxu2  ;;  %v2272_v41 = vpack.c.bf16 %v7078_v28, %v7078_v28 }
 0x1a7   : > { %v1181_v24 = vadd.f32 %v1123_v40, %v8397_v43  ;;  %v1470_v54 = vpop.f32.mrf.mxu3  ;;  %v7159_v43 = vld [vmem:[%s8022_s16 + $0x51] sm:$0xff] }
 0x1a8   : > { %v1819_v50 = vpop.f32.mrf.mxu0  ;;  %v2619_v30 = vpack.c.bf16 %v7159_v43, %v7159_v43  ;;  %v2353_v23 = vunpack.c.l.b16 %v2272_v41 }
 0x1a9   : > { %v1528_v22 = vadd.f32 %v1470_v54, %v1181_v24  ;;  %v2354_v24 = vunpack.c.l.b16 %v2273_v44  ;;  %v3045_v54 = vunpack.c.l.b16 %v2964_v42  ;;  %v7241_v44 = vld [vmem:[%s8022_s16 + $0x6a] sm:$0xff]  ;;  %v7160_v42 = vld [vmem:[%s8022_s16 + $0x61] sm:$0xff] }
 0x1aa   : > { %v2165_v9 = vpop.f32.mrf.mxu1 }
 0x1ab   : > { %2471 = vmatmul.bf16.vlgmr.msra.gmra.mxu2 %v2383_v27  ;;  %3163 = vmatmul.bf16.vlgmr.msra.gmra.mxu0 %v3075_v61  ;;  %v8542_v15 = vadd.f32 %v1816_v10, %v1528_v22  ;;  %v3046_v27 = vunpack.c.l.b16 %v2965_v17  ;;  %v2699_v61 = vunpack.c.l.b16 %v2618_v16  ;;  %v2384_v35 = vpack.c.b16 %v2354_v24, %v2353_v23 }
 0x1ac   : > { %2817 = vmatmul.bf16.vlgmr.msra.gmra.mxu3 %v2729_v20  ;;  %v2700_v20 = vunpack.c.l.b16 %v2619_v30  ;;  %v2967_v24 = vpack.c.bf16 %v7241_v44, %v7241_v44 }
 0x1ad   : > { %v3076_v37 = vpack.c.b16 %v3046_v27, %v3045_v54  ;;  %v2620_v27 = vpack.c.bf16 %v7160_v42, %v7160_v42 }
 0x1ae   : > { %v1126_v59 = vpop.f32.mrf.mxu2  ;;  %v2730_v53 = vpack.c.b16 %v2700_v20, %v2699_v61 }
 0x1af   : > { %v1182_v6 = vadd.f32 %v1126_v59, %v8272_v2  ;;  %v1473_v58 = vpop.f32.mrf.mxu3 }
 0x1b0   : > { %v1821_v46 = vpop.f32.mrf.mxu0 }
 0x1b1   : > { %v1529_v10 = vadd.f32 %v1473_v58, %v1182_v6  ;;  %v7081_v6 = vld [vmem:[%s8022_s16 + $0x68] sm:$0xff] }
 0x1b2   : > { %v8551_v60 = vpop.f32.mrf.mxu1  ;;  %v7240_v58 = vld [vmem:[%s8022_s16 + $0x62] sm:$0xff]  ;;  %v2275_v23 = vpack.c.bf16 %v7081_v6, %v7081_v6 }
 0x1b3   : > { %v1875_v40 = vadd.f32 %v1819_v50, %v1529_v10 }
 0x1b5   : > { %v8553_v2 = vadd.f32 %v2165_v9, %v1875_v40  ;;  %v7080_v9 = vld [vmem:[%s8022_s16 + $0x60] sm:$0xff]  ;;  %v2966_v40 = vpack.c.bf16 %v7240_v58, %v7240_v58 }
 0x1b6   : > { %v1128_v22 = vpop.f32.mrf.mxu2  ;;  %v2274_v16 = vpack.c.bf16 %v7080_v9, %v7080_v9 }
 0x1b7   : > { %v1183_v28 = vadd.f32 %v1128_v22, %v8279_v12  ;;  %v1475_v36 = vpop.f32.mrf.mxu3  ;;  %v7161_v12 = vld [vmem:[%s8022_s16 + $0x69] sm:$0xff] }
 0x1b8   : > { %v1824_v50 = vpop.f32.mrf.mxu0  ;;  %v2621_v61 = vpack.c.bf16 %v7161_v12, %v7161_v12  ;;  %v7849_v22 = vld [vmem:[%s9612_s3 + $0x50] sm:$0xff] }
 0x1b9   : > { %v1530_v43 = vadd.f32 %v1475_v36, %v1183_v28  ;;  %v2355_v28 = vunpack.c.l.b16 %v2274_v16  ;;  %3741 = vmatpush.bf16.msra.mxu1 %v7849_v22 }
 0x1ba   : > { %v2170_v59 = vpop.f32.mrf.mxu1 }
 0x1bb   : > { %2476 = vmatmul.bf16.gmra.mxu2 %v2384_v35  ;;  %3168 = vmatmul.bf16.gmra.mxu0 %v3076_v37  ;;  %v8556_v41 = vadd.f32 %v1821_v46, %v1530_v43  ;;  %v2356_v35 = vunpack.c.l.b16 %v2275_v23  ;;  %v3047_v37 = vunpack.c.l.b16 %v2966_v40  ;;  %v2702_v43 = vunpack.c.l.b16 %v2621_v61  ;;  %v7083_v23 = vld [vmem:[%s8022_s16 + $0x80] sm:$0xff] }
 0x1bc   : > { %2822 = vmatmul.bf16.gmra.mxu3 %v2730_v53  ;;  %v3048_v53 = vunpack.c.l.b16 %v2967_v24  ;;  %v7242_v40 = vld [vmem:[%s8022_s16 + $0x7a] sm:$0xff]  ;;  %v7243_v24 = vld [vmem:[%s8022_s16 + $0x82] sm:$0xff] }
 0x1bd   : > { %v2385_v42 = vpack.c.b16 %v2356_v35, %v2355_v28  ;;  %v2968_v35 = vpack.c.bf16 %v7242_v40, %v7242_v40 }
 0x1be   : > { %v1131_v17 = vpop.f32.mrf.mxu2 }
 0x1bf   : > { %v1184_v30 = vadd.f32 %v1131_v17, %v8287_v26  ;;  %v1478_v10 = vpop.f32.mrf.mxu3  ;;  %v2701_v26 = vunpack.c.l.b16 %v2620_v27  ;;  %v7162_v27 = vld [vmem:[%s8022_s16 + $0x79] sm:$0xff] }
 0x1c0   : > { %v1826_v54 = vpop.f32.mrf.mxu0 }
 0x1c1   : > { %v1531_v46 = vadd.f32 %v1478_v10, %v1184_v30  ;;  %v2731_v17 = vpack.c.b16 %v2702_v43, %v2701_v26  ;;  %v2622_v26 = vpack.c.bf16 %v7162_v27, %v7162_v27 }
 0x1c2   : > { %v8565_v20 = vpop.f32.mrf.mxu1 }
 0x1c3   : > { %v1877_v36 = vadd.f32 %v1824_v50, %v1531_v46  ;;  %v3077_v50 = vpack.c.b16 %v3048_v53, %v3047_v37  ;;  %v2969_v37 = vpack.c.bf16 %v7243_v24, %v7243_v24 }
 0x1c5   : > { %v8570_v9 = vadd.f32 %v2170_v59, %v1877_v36  ;;  %v7082_v59 = vld [vmem:[%s8022_s16 + $0x78] sm:$0xff]  ;;  %v2277_v36 = vpack.c.bf16 %v7083_v23, %v7083_v23 }
 0x1c6   : > { %v1133_v6 = vpop.f32.mrf.mxu2  ;;  %v2276_v46 = vpack.c.bf16 %v7082_v59, %v7082_v59 }
 0x1c7   : > { %v1185_v58 = vadd.f32 %v1133_v6, %v8291_v47  ;;  %v1480_v44 = vpop.f32.mrf.mxu3  ;;  %v7163_v47 = vld [vmem:[%s8022_s16 + $0x81] sm:$0xff] }
 0x1c8   : > { %v1829_v12 = vpop.f32.mrf.mxu0  ;;  %v2623_v43 = vpack.c.bf16 %v7163_v47, %v7163_v47 }
 0x1c9   : > { %v1532_v16 = vadd.f32 %v1480_v44, %v1185_v58  ;;  %v2357_v58 = vunpack.c.l.b16 %v2276_v46 }
 0x1ca   : > { %v2175_v30 = vpop.f32.mrf.mxu1  ;;  %v2704_v59 = vunpack.c.l.b16 %v2623_v43 }
 0x1cb   : > { %2481 = vmatmul.bf16.gmra.mxu2 %v2385_v42  ;;  %3173 = vmatmul.bf16.gmra.mxu0 %v3077_v50  ;;  %v8573_v10 = vadd.f32 %v1826_v54, %v1532_v16  ;;  %v2358_v42 = vunpack.c.l.b16 %v2277_v36  ;;  %v3049_v50 = vunpack.c.l.b16 %v2968_v35  ;;  %v2703_v16 = vunpack.c.l.b16 %v2622_v26  ;;  %v7085_v36 = vld [vmem:[%s8022_s16 + $0x98] sm:$0xff] }
 0x1cc   : > { %2827 = vmatmul.bf16.gmra.mxu3 %v2731_v17  ;;  %v3050_v17 = vunpack.c.l.b16 %v2969_v37  ;;  %v7244_v35 = vld [vmem:[%s8022_s16 + $0x92] sm:$0xff]  ;;  %v7245_v37 = vld [vmem:[%s8022_s16 + $0x9a] sm:$0xff] }
 0x1cd   : > { %v2386_v27 = vpack.c.b16 %v2358_v42, %v2357_v58  ;;  %v7164_v26 = vld [vmem:[%s8022_s16 + $0x91] sm:$0xff]  ;;  %v2279_v42 = vpack.c.bf16 %v7085_v36, %v7085_v36 }
 0x1ce   : > { %v1136_v61 = vpop.f32.mrf.mxu2  ;;  %v3078_v47 = vpack.c.b16 %v3050_v17, %v3049_v50  ;;  %v2970_v50 = vpack.c.bf16 %v7244_v35, %v7244_v35  ;;  %v2971_v17 = vpack.c.bf16 %v7245_v37, %v7245_v37 }
 0x1cf   : > { %v1186_v22 = vadd.f32 %v1136_v61, %v8305_v51  ;;  %v1483_v28 = vpop.f32.mrf.mxu3  ;;  %v2732_v61 = vpack.c.b16 %v2704_v59, %v2703_v16  ;;  %v2624_v59 = vpack.c.bf16 %v7164_v26, %v7164_v26 }
 0x1d0   : > { %v1831_v53 = vpop.f32.mrf.mxu0 }
 0x1d1   : > { %v1533_v54 = vadd.f32 %v1483_v28, %v1186_v22 }
 0x1d2   : > { %v8582_v6 = vpop.f32.mrf.mxu1 }
 0x1d3   : > { %v1879_v44 = vadd.f32 %v1829_v12, %v1533_v54 }
 0x1d5   : > { %v8584_v51 = vadd.f32 %v2175_v30, %v1879_v44  ;;  %v7084_v30 = vld [vmem:[%s8022_s16 + $0x90] sm:$0xff] }
 0x1d6   : > { %v1138_v23 = vpop.f32.mrf.mxu2  ;;  %v2278_v54 = vpack.c.bf16 %v7084_v30, %v7084_v30  ;;  %v3052_v30 = vunpack.c.l.b16 %v2971_v17  ;;  %v7087_v17 = vld [vmem:[%s8022_s16 + $0xb0] sm:$0xff] }
 0x1d7   : > { %v1187_v40 = vadd.f32 %v1138_v23, %v8312_v63  ;;  %v1485_v24 = vpop.f32.mrf.mxu3  ;;  %v7165_v63 = vld [vmem:[%s8022_s16 + $0x99] sm:$0xff] }
 0x1d8   : > { %v1834_v12 = vpop.f32.mrf.mxu0  ;;  %v2625_v23 = vpack.c.bf16 %v7165_v63, %v7165_v63 }
 0x1d9   : > { %v1534_v46 = vadd.f32 %v1485_v24, %v1187_v40  ;;  %v7848_v24 = vld [vmem:[%s9612_s3 + $0x48] sm:$0xff] }
 0x1da   : > { %v2180_v22 = vpop.f32.mrf.mxu1  ;;  %3742 = vmatpush.bf16.msra.mxu1 %v7848_v24  ;;  %v2706_v36 = vunpack.c.l.b16 %v2625_v23  ;;  %v7247_v23 = vld [vmem:[%s8022_s16 + $0xb2] sm:$0xff] }
 0x1db   : > { %2486 = vmatmul.bf16.gmra.mxu2 %v2386_v27  ;;  %3178 = vmatmul.bf16.gmra.mxu0 %v3078_v47  ;;  %v8587_v28 = vadd.f32 %v1831_v53, %v1534_v46  ;;  %v2359_v27 = vunpack.c.l.b16 %v2278_v54  ;;  %v3051_v46 = vunpack.c.l.b16 %v2970_v50 }
 0x1dc   : > { %2832 = vmatmul.bf16.gmra.mxu3 %v2732_v61  ;;  %v2360_v61 = vunpack.c.l.b16 %v2279_v42 }
 0x1de   : > { %v1141_v43 = vpop.f32.mrf.mxu2 }
 0x1df   : > { %v1188_v58 = vadd.f32 %v1141_v43, %v8320_v8  ;;  %v1488_v44 = vpop.f32.mrf.mxu3  ;;  %v2705_v8 = vunpack.c.l.b16 %v2624_v59  ;;  %v2387_v43 = vpack.c.b16 %v2360_v61, %v2359_v27  ;;  %v7246_v59 = vld [vmem:[%s8022_s16 + $0xaa] sm:$0xff] }
 0x1e0   : > { %v1836_v16 = vpop.f32.mrf.mxu0 }
 0x1e1   : > { %v1535_v53 = vadd.f32 %v1488_v44, %v1188_v58  ;;  %v2733_v58 = vpack.c.b16 %v2706_v36, %v2705_v8  ;;  %v2973_v8 = vpack.c.bf16 %v7247_v23, %v7247_v23 }
 0x1e2   : > { %v8596_v40 = vpop.f32.mrf.mxu1 }
 0x1e3   : > { %9616 = vst [vmem:[#allocation3_spill] sm:$0xff] %v8596_v40  ;;  %v1881_v47 = vadd.f32 %v1834_v12, %v1535_v53  ;;  %v3079_v12 = vpack.c.b16 %v3052_v30, %v3051_v46  ;;  %v7166_v53 = vld [vmem:[%s8022_s16 + $0xa9] sm:$0xff]  ;;  %v2281_v46 = vpack.c.bf16 %v7087_v17, %v7087_v17  ;;  %v2972_v30 = vpack.c.bf16 %v7246_v59, %v7246_v59 }
 0x1e4   : > { %v3054_v40 = vunpack.c.l.b16 %v2973_v8  ;;  %v7249_v8 = vld [vmem:[%s8022_s16 + $0xca] sm:$0xff] }
 0x1e5   : > { %v8601_v35 = vadd.f32 %v2180_v22, %v1881_v47  ;;  %v7086_v22 = vld [vmem:[%s8022_s16 + $0xa8] sm:$0xff] }
 0x1e6   : > { %v1143_v37 = vpop.f32.mrf.mxu2  ;;  %v2280_v47 = vpack.c.bf16 %v7086_v22, %v7086_v22 }
 0x1e7   : > { %v1189_v26 = vadd.f32 %v1143_v37, %v8324_v49  ;;  %v1490_v63 = vpop.f32.mrf.mxu3  ;;  %v7167_v49 = vld [vmem:[%s8022_s16 + $0xb1] sm:$0xff]  ;;  %v2626_v37 = vpack.c.bf16 %v7166_v53, %v7166_v53 }
 0x1e8   : > { %v1839_v54 = vpop.f32.mrf.mxu0 }
 0x1e9   : > { %v1536_v44 = vadd.f32 %v1490_v63, %v1189_v26  ;;  %v2627_v26 = vpack.c.bf16 %v7167_v49, %v7167_v49 }
 0x1ea   : > { %v2185_v42 = vpop.f32.mrf.mxu1 }
 0x1eb   : > { %2491 = vmatmul.bf16.gmra.mxu2 %v2387_v43  ;;  %3183 = vmatmul.bf16.gmra.mxu0 %v3079_v12  ;;  %v8604_v50 = vadd.f32 %v1836_v16, %v1536_v44  ;;  %v2361_v43 = vunpack.c.l.b16 %v2280_v47  ;;  %v3053_v44 = vunpack.c.l.b16 %v2972_v30  ;;  %v2708_v22 = vunpack.c.l.b16 %v2627_v26  ;;  %v7248_v30 = vld [vmem:[%s8022_s16 + $0xc2] sm:$0xff] }
 0x1ec   : > { %2837 = vmatmul.bf16.gmra.mxu3 %v2733_v58  ;;  %v2362_v58 = vunpack.c.l.b16 %v2281_v46  ;;  %v7089_v46 = vld [vmem:[%s8022_s16 + $0xc8] sm:$0xff] }
 0x1ed   : > { %9617 = vst [vmem:[#allocation4_spill] sm:$0xff] %v8604_v50  ;;  %v2707_v50 = vunpack.c.l.b16 %v2626_v37  ;;  %v3080_v49 = vpack.c.b16 %v3054_v40, %v3053_v44  ;;  %v7168_v37 = vld [vmem:[%s8022_s16 + $0xc1] sm:$0xff] }
 0x1ee   : > { %v1146_v24 = vpop.f32.mrf.mxu2  ;;  %v2388_v53 = vpack.c.b16 %v2362_v58, %v2361_v43  ;;  %v2975_v58 = vpack.c.bf16 %v7249_v8, %v7249_v8 }
 0x1ef   : > { %v1190_v27 = vadd.f32 %v1146_v24, %v8338_v38  ;;  %v1493_v61 = vpop.f32.mrf.mxu3  ;;  %v2734_v24 = vpack.c.b16 %v2708_v22, %v2707_v50  ;;  %v2974_v50 = vpack.c.bf16 %v7248_v30, %v7248_v30  ;;  %v2628_v22 = vpack.c.bf16 %v7168_v37, %v7168_v37 }
 0x1f0   : > { %v1841_v36 = vpop.f32.mrf.mxu0 }
 0x1f1   : > { %v1537_v16 = vadd.f32 %v1493_v61, %v1190_v27 }
 0x1f2   : > { %v8613_v63 = vpop.f32.mrf.mxu1 }
 0x1f3   : > { %v1883_v12 = vadd.f32 %v1839_v54, %v1537_v16 }
 0x1f5   : > { %v8615_v38 = vadd.f32 %v2185_v42, %v1883_v12  ;;  %v7088_v42 = vld [vmem:[%s8022_s16 + $0xc0] sm:$0xff]  ;;  %v2283_v12 = vpack.c.bf16 %v7089_v46, %v7089_v46 }
 0x1f6   : > { %v1148_v17 = vpop.f32.mrf.mxu2  ;;  %v2282_v16 = vpack.c.bf16 %v7088_v42, %v7088_v42  ;;  %v2709_v42 = vunpack.c.l.b16 %v2628_v22  ;;  %v7251_v22 = vld [vmem:[%s8022_s16 + $0xe2] sm:$0xff] }
 0x1f7   : > { %v1191_v59 = vadd.f32 %v1148_v17, %v8345_v52  ;;  %v1495_v23 = vpop.f32.mrf.mxu3  ;;  %v7169_v52 = vld [vmem:[%s8022_s16 + $0xc9] sm:$0xff] }
 0x1f8   : > { %v1844_v54 = vpop.f32.mrf.mxu0  ;;  %v2629_v17 = vpack.c.bf16 %v7169_v52, %v7169_v52 }
 0x1f9   : > { %v1538_v47 = vadd.f32 %v1495_v23, %v1191_v59  ;;  %v7847_v59 = vld [vmem:[%s9612_s3 + $0x40] sm:$0xff]  ;;  %v2363_v23 = vunpack.c.l.b16 %v2282_v16 }
 0x1fa   : > { %v2190_v27 = vpop.f32.mrf.mxu1  ;;  %3743 = vmatpush.bf16.msra.mxu1 %v7847_v59  ;;  %v2710_v46 = vunpack.c.l.b16 %v2629_v17  ;;  %v7171_v59 = vld [vmem:[%s8022_s16 + $0xe1] sm:$0xff] }
 0x1fb   : > { %2496 = vmatmul.bf16.gmra.mxu2 %v2388_v53  ;;  %3188 = vmatmul.bf16.gmra.mxu0 %v3080_v49  ;;  %v8618_v61 = vadd.f32 %v1841_v36, %v1538_v47  ;;  %v7950_v53 = vmov 0.0   ;;  %v3055_v47 = vunpack.c.l.b16 %v2974_v50  ;;  %v7091_v50 = vld [vmem:[%s8022_s16 + $0xe0] sm:$0xff] }
 0x1fc   : > { %2842 = vmatmul.bf16.gmra.mxu3 %v2734_v24  ;;  %3347 = vst [vmem:[#allocation2 + $0x18] sm:$0xff] %v7950_v53  ;;  %v2364_v24 = vunpack.c.l.b16 %v2283_v12  ;;  %v7090_v12 = vld [vmem:[%s8022_s16 + $0xd8] sm:$0xff] }
 0x1fd   : > { %3348 = vst [vmem:[#allocation2 + $0x20] sm:$0xff] %v7950_v53 }
 0x1fe   : > { %v1151_v26 = vpop.f32.mrf.mxu2  ;;  %3344 = vst [vmem:[#allocation2] sm:$0xff] %v7950_v53 }
 0x1ff   : > { %v1192_v43 = vadd.f32 %v1151_v26, %v8353_v1  ;;  %v1498_v40 = vpop.f32.mrf.mxu3  ;;  %v3056_v1 = vunpack.c.l.b16 %v2975_v58  ;;  %3345 = vst [vmem:[#allocation2 + $0x8] sm:$0xff] %v7950_v53  ;;  %v2389_v26 = vpack.c.b16 %v2364_v24, %v2363_v23  ;;  %v7250_v58 = vld [vmem:[%s8022_s16 + $0xda] sm:$0xff] }
 0x200   : > { %v1846_v44 = vpop.f32.mrf.mxu0  ;;  %3346 = vst [vmem:[#allocation2 + $0x10] sm:$0x3] %v7950_v53 }
 0x201   : > { %v1539_v36 = vadd.f32 %v1498_v40, %v1192_v43  ;;  %v3081_v16 = vpack.c.b16 %v3056_v1, %v3055_v47  ;;  %3349 = vst [vmem:[#allocation2 + $0x28] sm:$0x3] %v7950_v53  ;;  %v2735_v40 = vpack.c.b16 %v2710_v46, %v2709_v42  ;;  %v2285_v1 = vpack.c.bf16 %v7091_v50, %v7091_v50 }
 0x202   : > { %v8632_v30 = vpop.f32.mrf.mxu1  ;;  %3350 = vst [vmem:[#allocation2 + $0x30] sm:$0xff] %v7950_v53 }
 0x203   : > { %v1885_v49 = vadd.f32 %v1844_v54, %v1539_v36  ;;  %9618 = vst [vmem:[#allocation5_spill] sm:$0xff] %v8632_v30  ;;  %v7170_v36 = vld [vmem:[%s8022_s16 + $0xd9] sm:$0xff] }
 0x204   : > { %3351 = vst [vmem:[#allocation2 + $0x38] sm:$0xff] %v7950_v53 }
 0x205   : > { %v8635_v8 = vadd.f32 %v2190_v27, %v1885_v49  ;;  %3352 = vst [vmem:[#allocation2 + $0x40] sm:$0x3] %v7950_v53 }
 0x206   : > { %v1153_v37 = vpop.f32.mrf.mxu2  ;;  %3353 = vst [vmem:[#allocation2 + $0x48] sm:$0xff] %v7950_v53  ;;  %v3511_v17 = vld [vmem:[#allocation2 + $0x1] sm:$0xff] }
 0x207   : > { %v1193_v54 = vadd.f32 %v1153_v37, %v8357_v14  ;;  %v1500_v52 = vpop.f32.mrf.mxu3  ;;  %3354 = vst [vmem:[#allocation2 + $0x50] sm:$0xff] %v7950_v53  ;;  %v3512_v23 = vld [vmem:[#allocation2 + $0x9] sm:$0xff]  ;;  %v3543_v49 = vpack.c.bf16 %v3511_v17, %v3511_v17 }
 0x208   : > { %v1849_v43 = vpop.f32.mrf.mxu0  ;;  %3355 = vst [vmem:[#allocation2 + $0x58] sm:$0x3] %v7950_v53  ;;  %v3544_v42 = vpack.c.bf16 %v3512_v23, %v3512_v23  ;;  %v2366_v23 = vunpack.c.l.b16 %v2285_v1 }
 0x209   : > { %v1540_v27 = vadd.f32 %v1500_v52, %v1193_v54  ;;  %3356 = vst [vmem:[#allocation2 + $0x60] sm:$0xff] %v7950_v53  ;;  %v2976_v54 = vpack.c.bf16 %v7250_v58, %v7250_v58  ;;  %v2977_v52 = vpack.c.bf16 %v7251_v22, %v7251_v22 }
 0x20a   : > { %v2195_v47 = vpop.f32.mrf.mxu1  ;;  %3357 = vst [vmem:[#allocation2 + $0x68] sm:$0xff] %v7950_v53  ;;  %v3625_v17 = vunpack.c.l.b16 %v3544_v42 }
 0x20b   : > { %2501 = vmatmul.bf16.gmra.mxu2 %v2389_v26  ;;  %3193 = vmatmul.bf16.gmra.mxu0 %v3081_v16  ;;  %v8644_v14 = vadd.f32 %v1846_v44, %v1540_v27  ;;  %v2284_v44 = vpack.c.bf16 %v7090_v12, %v7090_v12  ;;  %v3624_v26 = vunpack.c.l.b16 %v3543_v49  ;;  %v2631_v27 = vpack.c.bf16 %v7171_v59, %v7171_v59 }
 0x20c   : > { %2847 = vmatmul.bf16.gmra.mxu3 %v2735_v40  ;;  %v2630_v40 = vpack.c.bf16 %v7170_v36, %v7170_v36  ;;  %3358 = vst [vmem:[#allocation2 + $0x70] sm:$0x3] %v7950_v53  ;;  %v3057_v58 = vunpack.c.l.b16 %v2976_v54  ;;  %v3058_v22 = vunpack.c.l.b16 %v2977_v52  ;;  %v7862_v54 = vld [vmem:[%s9612_s3 + $0xb8] sm:$0xff] }
 0x20d   : > { %3359 = vst [vmem:[#allocation2 + $0x78] sm:$0xff] %v7950_v53  ;;  %v2365_v12 = vunpack.c.l.b16 %v2284_v44  ;;  %v3656_v50 = vpack.c.b16 %v3625_v17, %v3624_v26  ;;  %v7092_v26 = vld [vmem:[%s8022_s16 + $0xf0] sm:$0xff]  ;;  %v7253_v17 = vld [vmem:[%s8022_s16 + $0xfa] sm:$0xff]  ;;  %4283 = vmatpush.bf16.msrb.mxu3 %v7862_v54 }
 0x20e   : > { %v1156_v24 = vpop.f32.mrf.mxu2  ;;  %3360 = vst [vmem:[#allocation2 + $0x80] sm:$0xff] %v7950_v53  ;;  %v2711_v49 = vunpack.c.l.b16 %v2630_v40  ;;  %v3082_v1 = vpack.c.b16 %v3058_v22, %v3057_v58  ;;  %v7093_v40 = vld [vmem:[%s8022_s16 + $0xf8] sm:$0xff] }
 0x20f   : > { %v1194_v46 = vadd.f32 %v1156_v24, %v8375_v39  ;;  %v1503_v37 = vpop.f32.mrf.mxu3  ;;  %3361 = vst [vmem:[#allocation2 + $0x88] sm:$0x3] %v7950_v53  ;;  %v2712_v24 = vunpack.c.l.b16 %v2631_v27  ;;  %3744 = vmatmul.bf16.vlgmr.msra.gmra.mxu1 %v3656_v50  ;;  %v7252_v27 = vld [vmem:[%s8022_s16 + $0xf2] sm:$0xff]  ;;  %v2287_v22 = vpack.c.bf16 %v7093_v40, %v7093_v40 }
 0x210   : > { %v1851_v16 = vpop.f32.mrf.mxu0  ;;  %3362 = vst [vmem:[#allocation2 + $0x90] sm:$0xff] %v7950_v53  ;;  %v7173_v50 = vld [vmem:[%s8022_s16 + $0xf9] sm:$0xff] }
 0x211   : > { %v1541_v30 = vadd.f32 %v1503_v37, %v1194_v46  ;;  %3363 = vst [vmem:[#allocation2 + $0x98] sm:$0xff] %v7950_v53  ;;  %v2736_v46 = vpack.c.b16 %v2712_v24, %v2711_v49  ;;  %v2978_v49 = vpack.c.bf16 %v7252_v27, %v7252_v27  ;;  %v2979_v24 = vpack.c.bf16 %v7253_v17, %v7253_v17 }
 0x212   : > { %3364 = vst [vmem:[#allocation2 + $0xa0] sm:$0x3] %v7950_v53 }
 0x213   : > { %v1887_v39 = vadd.f32 %v1849_v43, %v1541_v30  ;;  %v2390_v43 = vpack.c.b16 %v2366_v23, %v2365_v12  ;;  %3365 = vst [vmem:[#allocation2 + $0xa8] sm:$0xff] %v7950_v53  ;;  %v7172_v12 = vld [vmem:[%s8022_s16 + $0xf1] sm:$0xff]  ;;  %v2286_v23 = vpack.c.bf16 %v7092_v26, %v7092_v26  ;;  %v3059_v54 = vunpack.c.l.b16 %v2978_v49 }
 0x214   : > { %3366 = vst [vmem:[#allocation2 + $0xb0] sm:$0xff] %v7950_v53  ;;  %v3060_v26 = vunpack.c.l.b16 %v2979_v24  ;;  %v7094_v24 = vld [vmem:[%s8022_s16 + $0x108] sm:$0xff] }
 0x215   : > { %v8663_v36 = vadd.f32 %v2195_v47, %v1887_v39  ;;  %v8669_v47 = vpop.f32.mrf.mxu1  ;;  %3367 = vst [vmem:[#allocation2 + $0xb8] sm:$0x3] %v7950_v53 }
 0x216   : > { %v1158_v59 = vpop.f32.mrf.mxu2  ;;  %3368 = vst [vmem:[#allocation2 + $0xc0] sm:$0xff] %v7950_v53 }
 0x217   : > { %v1195_v44 = vadd.f32 %v1158_v59, %v8382_v4  ;;  %v1505_v30 = vpop.f32.mrf.mxu3  ;;  %v7846_v4 = vld [vmem:[%s9612_s3 + $0x38] sm:$0xff]  ;;  %3369 = vst [vmem:[#allocation2 + $0xc8] sm:$0xff] %v7950_v53 }
 0x218   : > { %v1854_v42 = vpop.f32.mrf.mxu0  ;;  %3370 = vst [vmem:[#allocation2 + $0xd0] sm:$0x3] %v7950_v53  ;;  %3969 = vmatpush.bf16.msrb.mxu2 %v7846_v4  ;;  %v2368_v4 = vunpack.c.l.b16 %v2287_v22 }
 0x219   : > { %v1542_v37 = vadd.f32 %v1505_v30, %v1195_v44  ;;  %3371 = vst [vmem:[#allocation2 + $0xd8] sm:$0xff] %v7950_v53  ;;  %v2632_v44 = vpack.c.bf16 %v7172_v12, %v7172_v12  ;;  %v2633_v30 = vpack.c.bf16 %v7173_v50, %v7173_v50 }
 0x21a   : > { %3372 = vst [vmem:[#allocation2 + $0xe0] sm:$0xff] %v7950_v53 }
 0x21b   : > { %2506 = vmatmul.bf16.gmra.mxu2 %v2390_v43  ;;  %3198 = vmatmul.bf16.gmra.mxu0 %v3082_v1  ;;  %v8680_v52 = vadd.f32 %v1851_v16, %v1542_v37  ;;  %3373 = vst [vmem:[#allocation2 + $0xe8] sm:$0x3] %v7950_v53  ;;  %v7870_v1 = vld [vmem:[%s9612_s3 + $0xf8] sm:$0xff]  ;;  %v2713_v40 = vunpack.c.l.b16 %v2632_v44  ;;  %v2714_v27 = vunpack.c.l.b16 %v2633_v30  ;;  %v7095_v44 = vld [vmem:[%s8022_s16 + $0x110] sm:$0xff] }
 0x21c   : > { %2852 = vmatmul.bf16.gmra.mxu3 %v2736_v46  ;;  %3374 = vst [vmem:[#allocation2 + $0xf0] sm:$0xff] %v7950_v53  ;;  %4629 = vmatpush.bf16.msrb.mxu0 %v7870_v1  ;;  %v7254_v30 = vld [vmem:[%s8022_s16 + $0x10a] sm:$0xff] }
 0x21d   : > { %3375 = vst [vmem:[#allocation2 + $0xf8] sm:$0xff] %v7950_v53  ;;  %v2200_v46 = vpop.f32.mrf.mxu1  ;;  %v7174_v1 = vld [vmem:[%s8022_s16 + $0x109] sm:$0xff] }
 0x21e   : > { %v1161_v39 = vpop.f32.mrf.mxu2  ;;  %3376 = vst [vmem:[#allocation2 + $0x100] sm:$0x3] %v7950_v53 }
 0x21f   : > { %v1196_v16 = vadd.f32 %v1161_v39, %v8392_v33  ;;  %v1508_v58 = vpop.f32.mrf.mxu3  ;;  %v2367_v33 = vunpack.c.l.b16 %v2286_v23  ;;  %3377 = vst [vmem:[#allocation2 + $0x108] sm:$0xff] %v7950_v53  ;;  %v3083_v23 = vpack.c.b16 %v3060_v26, %v3059_v54  ;;  %v2289_v54 = vpack.c.bf16 %v7095_v44, %v7095_v44 }
 0x220   : > { %v1856_v59 = vpop.f32.mrf.mxu0  ;;  %3378 = vst [vmem:[#allocation2 + $0x110] sm:$0xff] %v7950_v53  ;;  %v2980_v26 = vpack.c.bf16 %v7254_v30, %v7254_v30 }
 0x221   : > { %v1543_v43 = vadd.f32 %v1508_v58, %v1196_v16  ;;  %3379 = vst [vmem:[#allocation2 + $0x118] sm:$0x3] %v7950_v53  ;;  %v2391_v39 = vpack.c.b16 %v2368_v4, %v2367_v33  ;;  %v2737_v58 = vpack.c.b16 %v2714_v27, %v2713_v40 }
 0x222   : > { %3380 = vst [vmem:[#allocation2 + $0x120] sm:$0xff] %v7950_v53 }
 0x223   : > { %v1889_v37 = vadd.f32 %v1854_v42, %v1543_v43  ;;  %3381 = vst [vmem:[#allocation2 + $0x128] sm:$0xff] %v7950_v53  ;;  %v7255_v43 = vld [vmem:[%s8022_s16 + $0x112] sm:$0xff] }
 0x224   : > { %3382 = vst [vmem:[#allocation2 + $0x130] sm:$0x3] %v7950_v53  ;;  %v2981_v40 = vpack.c.bf16 %v7255_v43, %v7255_v43 }
 0x225   : > { %v8702_v17 = vadd.f32 %v2200_v46, %v1889_v37  ;;  %3383 = vst [vmem:[#allocation2 + $0x138] sm:$0xff] %v7950_v53  ;;  %v7175_v46 = vld [vmem:[%s8022_s16 + $0x111] sm:$0xff]  ;;  %v2288_v37 = vpack.c.bf16 %v7094_v24, %v7094_v24 }
 0x226   : > { %v1163_v12 = vpop.f32.mrf.mxu2  ;;  %3384 = vst [vmem:[#allocation2 + $0x140] sm:$0xff] %v7950_v53 }
 0x227   : > { %v1197_v50 = vadd.f32 %v1163_v12, %v8399_v0  ;;  %v1510_v42 = vpop.f32.mrf.mxu3  ;;  %v7878_v0 = vld [vmem:[%s9612_s3 + $0x138] sm:$0xff]  ;;  %3385 = vst [vmem:[#allocation2 + $0x148] sm:$0x3] %v7950_v53  ;;  %v2634_v12 = vpack.c.bf16 %v7174_v1, %v7174_v1 }
 0x228   : > { %v3164_v16 = vpop.f32.mrf.mxu0  ;;  %3386 = vst [vmem:[#allocation2 + $0x150] sm:$0xff] %v7950_v53  ;;  %4975 = vmatpush.bf16.msrb.mxu1 %v7878_v0  ;;  %v3062_v0 = vunpack.c.l.b16 %v2981_v40 }
 0x229   : > { %v1544_v22 = vadd.f32 %v1510_v42, %v1197_v50  ;;  %3387 = vst [vmem:[#allocation2 + $0x158] sm:$0xff] %v7950_v53  ;;  %v2635_v50 = vpack.c.bf16 %v7175_v46, %v7175_v46  ;;  %v2715_v24 = vunpack.c.l.b16 %v2634_v12  ;;  %v7097_v12 = vld [vmem:[%s8022_s16 + $0x128] sm:$0xff] }
 0x22a   : > { %3388 = vst [vmem:[#allocation2 + $0x160] sm:$0x3] %v7950_v53 }
 0x22b   : > { %2511 = vmatmul.bf16.gmra.mxu2 %v2391_v39  ;;  %3203 = vmatmul.bf16.gmra.mxu0 %v3083_v23  ;;  %v8714_v49 = vadd.f32 %v1856_v59, %v1544_v22  ;;  %3389 = vst [vmem:[#allocation2 + $0x168] sm:$0xff] %v7950_v53  ;;  %v8732_v39 = vld [vmem:[%s9611_s2] ss:$0 sm:$0xff]  ;;  %v3061_v22 = vunpack.c.l.b16 %v2980_v26  ;;  %v2716_v44 = vunpack.c.l.b16 %v2635_v50  ;;  %v7845_v26 = vld [vmem:[%s9612_s3 + $0x30] sm:$0xff]  ;;  %v7256_v50 = vld [vmem:[%s8022_s16 + $0x122] sm:$0xff] }
 0x22c   : > { %2857 = vmatmul.bf16.gmra.mxu3 %v2737_v58  ;;  %3390 = vst [vmem:[#allocation2 + $0x170] sm:$0xff] %v7950_v53  ;;  %v2370_v58 = vunpack.c.l.b16 %v2289_v54  ;;  %3970 = vmatpush.bf16.msrb.mxu2 %v7845_v26 }
 0x22d   : > { %9619 = vst [vmem:[#allocation6_spill] sm:$0xff] %v8714_v49 }
 0x22e   : > { %v2472_v33 = vpop.f32.mrf.mxu2  ;;  %3391 = vst [vmem:[#allocation2 + $0x178] sm:$0x3] %v7950_v53 }
 0x22f   : > { %v2552_v59 = vadd.f32 %v2472_v33, %v8414_v62  ;;  %v2818_v4 = vpop.f32.mrf.mxu3  ;;  %3392 = vst [vmem:[#allocation2 + $0x180] sm:$0xff] %v7950_v53  ;;  %v2369_v62 = vunpack.c.l.b16 %v2288_v37  ;;  %v3084_v37 = vpack.c.b16 %v3062_v0, %v3061_v22 }
 0x230   : > { %v3166_v27 = vpop.f32.mrf.mxu0  ;;  %3393 = vst [vmem:[#allocation2 + $0x188] sm:$0xff] %v7950_v53 }
 0x231   : > { %v2898_v42 = vadd.f32 %v2818_v4, %v2552_v59  ;;  %3394 = vst [vmem:[#allocation2 + $0x190] sm:$0x3] %v7950_v53  ;;  %v2392_v33 = vpack.c.b16 %v2370_v58, %v2369_v62  ;;  %v2738_v4 = vpack.c.b16 %v2716_v44, %v2715_v24  ;;  %v7177_v58 = vld [vmem:[%s8022_s16 + $0x129] sm:$0xff]  ;;  %v2291_v24 = vpack.c.bf16 %v7097_v12, %v7097_v12 }
 0x232   : > { %3395 = vst [vmem:[#allocation2 + $0x198] sm:$0xff] %v7950_v53  ;;  %v2982_v44 = vpack.c.bf16 %v7256_v50, %v7256_v50 }
 0x233   : > { %v3244_v23 = vadd.f32 %v3164_v16, %v2898_v42  ;;  %3396 = vst [vmem:[#allocation2 + $0x1a0] sm:$0xff] %v7950_v53  ;;  %v7257_v42 = vld [vmem:[%s8022_s16 + $0x12a] sm:$0xff] }
 0x234   : > { %3397 = vst [vmem:[#allocation2 + $0x1a8] sm:$0x3] %v7950_v53  ;;  %v7861_v53 = vld [vmem:[%s9612_s3 + $0xb0] sm:$0xff]  ;;  %v3063_v12 = vunpack.c.l.b16 %v2982_v44 }
 0x235   : > { %v3280_v30 = vadd.f32 %v8732_v39, %v3244_v23  ;;  %v7176_v23 = vld [vmem:[%s8022_s16 + $0x121] sm:$0xff]  ;;  %4284 = vmatpush.bf16.msrb.mxu3 %v7861_v53  ;;  %v7869_v53 = vld [vmem:[%s9612_s3 + $0xf0] sm:$0xff] }
 0x236   : > { %v2474_v43 = vpop.f32.mrf.mxu2  ;;  %4630 = vmatpush.bf16.msrb.mxu0 %v7869_v53  ;;  %v7178_v53 = vld [vmem:[%s8022_s16 + $0x139] sm:$0xff] }
 0x237   : > { %v3312_v1 = vmax.f32 %v3280_v30, 0.0  ;;  %v2553_v16 = vadd.f32 %v2474_v43, %v8423_v56  ;;  %v2820_v46 = vpop.f32.mrf.mxu3  ;;  %v7096_v56 = vld [vmem:[%s8022_s16 + $0x120] sm:$0xff] }
 0x238   : > { %v3169_v59 = vpop.f32.mrf.mxu0  ;;  %v2290_v0 = vpack.c.bf16 %v7096_v56, %v7096_v56  ;;  %v2372_v56 = vunpack.c.l.b16 %v2291_v24 }
 0x239   : > { %3399 = vst [vmem:[#allocation2 + $0x19] sm:$0xff] %v3312_v1  ;;  %v2899_v54 = vadd.f32 %v2820_v46, %v2553_v16  ;;  %v2983_v16 = vpack.c.bf16 %v7257_v42, %v7257_v42  ;;  %v3545_v46 = vpack.c.bf16 %v3312_v1, %v3312_v1 }
 0x23b   : > { %v3245_v40 = vadd.f32 %v3166_v27, %v2899_v54  ;;  %2516 = vmatmul.bf16.gmra.mxu2 %v2392_v33  ;;  %3208 = vmatmul.bf16.gmra.mxu0 %v3084_v37  ;;  %v2636_v37 = vpack.c.bf16 %v7176_v23, %v7176_v23  ;;  %v3626_v49 = vunpack.c.l.b16 %v3545_v46 }
 0x23c   : > { %2862 = vmatmul.bf16.gmra.mxu3 %v2738_v4  ;;  %v2637_v4 = vpack.c.bf16 %v7177_v58, %v7177_v58 }
 0x23d   : > { %v3281_v62 = vadd.f32 %v8732_v39, %v3245_v40  ;;  %v2371_v40 = vunpack.c.l.b16 %v2290_v0  ;;  %v2717_v42 = vunpack.c.l.b16 %v2636_v37  ;;  %v7098_v37 = vld [vmem:[%s8022_s16 + $0x138] sm:$0xff] }
 0x23e   : > { %v2477_v22 = vpop.f32.mrf.mxu2  ;;  %v2718_v1 = vunpack.c.l.b16 %v2637_v4  ;;  %v7258_v4 = vld [vmem:[%s8022_s16 + $0x13a] sm:$0xff] }
 0x23f   : > { %v3313_v30 = vmax.f32 %v3281_v62, 0.0  ;;  %v2554_v27 = vadd.f32 %v2477_v22, %v8432_v13  ;;  %v2823_v43 = vpop.f32.mrf.mxu3  ;;  %v3064_v62 = vunpack.c.l.b16 %v2983_v16  ;;  %v2393_v24 = vpack.c.b16 %v2372_v56, %v2371_v40  ;;  %v7179_v40 = vld [vmem:[%s8022_s16 + $0x141] sm:$0xff] }
 0x240   : > { %v3171_v33 = vpop.f32.mrf.mxu0 }
 0x241   : > { %3400 = vst [vmem:[#allocation2 + $0x21] sm:$0xff] %v3313_v30  ;;  %v2900_v54 = vadd.f32 %v2823_v43, %v2554_v27  ;;  %v3546_v26 = vpack.c.bf16 %v3313_v30, %v3313_v30  ;;  %v2739_v43 = vpack.c.b16 %v2718_v1, %v2717_v42 }
 0x243   : > { %v3246_v50 = vadd.f32 %v3169_v59, %v2900_v54  ;;  %v3627_v13 = vunpack.c.l.b16 %v3546_v26  ;;  %v3085_v59 = vpack.c.b16 %v3064_v62, %v3063_v12  ;;  %v7259_v54 = vld [vmem:[%s8022_s16 + $0x142] sm:$0xff]  ;;  %v2292_v12 = vpack.c.bf16 %v7098_v37, %v7098_v37 }
 0x244   : > { %v2984_v62 = vpack.c.bf16 %v7258_v4, %v7258_v4  ;;  %v2985_v1 = vpack.c.bf16 %v7259_v54, %v7259_v54 }
 0x245   : > { %v3282_v23 = vadd.f32 %v8732_v39, %v3246_v50  ;;  %v3657_v58 = vpack.c.b16 %v3627_v13, %v3626_v49  ;;  %v7877_v49 = vld [vmem:[%s9612_s3 + $0x130] sm:$0xff] }
 0x246   : > { %v2479_v22 = vpop.f32.mrf.mxu2  ;;  %4976 = vmatpush.bf16.msrb.mxu1 %v7877_v49 }
 0x247   : > { %v3314_v30 = vmax.f32 %v3282_v23, 0.0  ;;  %v2555_v27 = vadd.f32 %v2479_v22, %v8442_v21  ;;  %v2825_v0 = vpop.f32.mrf.mxu3  ;;  %3749 = vmatmul.bf16.gmra.mxu1 %v3657_v58  ;;  %v7099_v21 = vld [vmem:[%s8022_s16 + $0x140] sm:$0xff]  ;;  %v2638_v22 = vpack.c.bf16 %v7178_v53, %v7178_v53 }
 0x248   : > { %v3174_v44 = vpop.f32.mrf.mxu0  ;;  %v2293_v50 = vpack.c.bf16 %v7099_v21, %v7099_v21 }
 0x249   : > { %3401 = vst [vmem:[#allocation2 + $0x31] sm:$0xff] %v3314_v30  ;;  %v2901_v16 = vadd.f32 %v2825_v0, %v2555_v27  ;;  %v3547_v23 = vpack.c.bf16 %v3314_v30, %v3314_v30  ;;  %v2639_v27 = vpack.c.bf16 %v7179_v40, %v7179_v40  ;;  %v2719_v4 = vunpack.c.l.b16 %v2638_v22  ;;  %v7260_v22 = vld [vmem:[%s8022_s16 + $0x152] sm:$0xff] }
 0x24b   : > { %v3247_v46 = vadd.f32 %v3171_v33, %v2901_v16  ;;  %2521 = vmatmul.bf16.gmra.mxu2 %v2393_v24  ;;  %3213 = vmatmul.bf16.gmra.mxu0 %v3085_v59  ;;  %v2373_v59 = vunpack.c.l.b16 %v2292_v12  ;;  %v3065_v16 = vunpack.c.l.b16 %v2984_v62  ;;  %v3628_v37 = vunpack.c.l.b16 %v3547_v23  ;;  %v7101_v23 = vld [vmem:[%s8022_s16 + $0x158] sm:$0xff] }
 0x24c   : > { %2867 = vmatmul.bf16.gmra.mxu3 %v2739_v43  ;;  %v2374_v43 = vunpack.c.l.b16 %v2293_v50 }
 0x24d   : > { %v3283_v26 = vadd.f32 %v8732_v39, %v3247_v46  ;;  %v3066_v46 = vunpack.c.l.b16 %v2985_v1  ;;  %v7100_v1 = vld [vmem:[%s8022_s16 + $0x150] sm:$0xff] }
 0x24e   : > { %v2482_v56 = vpop.f32.mrf.mxu2  ;;  %v2394_v12 = vpack.c.b16 %v2374_v43, %v2373_v59  ;;  %v7181_v59 = vld [vmem:[%s8022_s16 + $0x159] sm:$0xff] }
 0x24f   : > { %v3315_v13 = vmax.f32 %v3283_v26, 0.0  ;;  %v2556_v42 = vadd.f32 %v2482_v56, %v8450_v34  ;;  %v2828_v33 = vpop.f32.mrf.mxu3  ;;  %v2720_v26 = vunpack.c.l.b16 %v2639_v27  ;;  %v3086_v50 = vpack.c.b16 %v3066_v46, %v3065_v16  ;;  %v7261_v27 = vld [vmem:[%s8022_s16 + $0x15a] sm:$0xff] }
 0x250   : > { %v3176_v58 = vpop.f32.mrf.mxu0  ;;  %v2294_v16 = vpack.c.bf16 %v7100_v1, %v7100_v1  ;;  %v2986_v46 = vpack.c.bf16 %v7260_v22, %v7260_v22 }
 0x251   : > { %3402 = vst [vmem:[#allocation2 + $0x39] sm:$0xff] %v3315_v13  ;;  %v2902_v0 = vadd.f32 %v2828_v33, %v2556_v42  ;;  %v3548_v24 = vpack.c.bf16 %v3315_v13, %v3315_v13  ;;  %v2740_v62 = vpack.c.b16 %v2720_v26, %v2719_v4  ;;  %v7844_v42 = vld [vmem:[%s9612_s3 + $0x28] sm:$0xff]  ;;  %v2987_v4 = vpack.c.bf16 %v7261_v27, %v7261_v27 }
 0x252   : > { %3971 = vmatpush.bf16.msrb.mxu2 %v7844_v42 }
 0x253   : > { %v3248_v49 = vadd.f32 %v3174_v44, %v2902_v0  ;;  %v3629_v21 = vunpack.c.l.b16 %v3548_v24  ;;  %v7180_v24 = vld [vmem:[%s8022_s16 + $0x151] sm:$0xff] }
 0x255   : > { %v3284_v34 = vadd.f32 %v8732_v39, %v3248_v49  ;;  %v3658_v56 = vpack.c.b16 %v3629_v21, %v3628_v37  ;;  %v2295_v49 = vpack.c.bf16 %v7101_v23, %v7101_v23 }
 0x256   : > { %v2484_v54 = vpop.f32.mrf.mxu2 }
 0x257   : > { %v3316_v30 = vmax.f32 %v3284_v34, 0.0  ;;  %v2557_v53 = vadd.f32 %v2484_v54, %v8459_v48  ;;  %v2830_v40 = vpop.f32.mrf.mxu3  ;;  %3754 = vmatmul.bf16.gmra.mxu1 %v3658_v56  ;;  %v7860_v48 = vld [vmem:[%s9612_s3 + $0xa8] sm:$0xff]  ;;  %v2640_v56 = vpack.c.bf16 %v7180_v24, %v7180_v24  ;;  %v2641_v54 = vpack.c.bf16 %v7181_v59, %v7181_v59 }
 0x258   : > { %v3179_v44 = vpop.f32.mrf.mxu0  ;;  %4285 = vmatpush.bf16.msrb.mxu3 %v7860_v48  ;;  %v3068_v48 = vunpack.c.l.b16 %v2987_v4  ;;  %v7262_v4 = vld [vmem:[%s8022_s16 + $0x16a] sm:$0xff] }
 0x259   : > { %3403 = vst [vmem:[#allocation2 + $0x49] sm:$0xff] %v3316_v30  ;;  %v2903_v13 = vadd.f32 %v2830_v40, %v2557_v53  ;;  %v3549_v26 = vpack.c.bf16 %v3316_v30, %v3316_v30  ;;  %v2721_v1 = vunpack.c.l.b16 %v2640_v56  ;;  %v2722_v30 = vunpack.c.l.b16 %v2641_v54  ;;  %v7182_v54 = vld [vmem:[%s8022_s16 + $0x169] sm:$0xff] }
 0x25b   : > { %v3249_v33 = vadd.f32 %v3176_v58, %v2903_v13  ;;  %2526 = vmatmul.bf16.gmra.mxu2 %v2394_v12  ;;  %3218 = vmatmul.bf16.gmra.mxu0 %v3086_v50  ;;  %v7868_v12 = vld [vmem:[%s9612_s3 + $0xe8] sm:$0xff]  ;;  %v2375_v50 = vunpack.c.l.b16 %v2294_v16  ;;  %v3067_v13 = vunpack.c.l.b16 %v2986_v46 }
 0x25c   : > { %2872 = vmatmul.bf16.gmra.mxu3 %v2740_v62  ;;  %v2376_v62 = vunpack.c.l.b16 %v2295_v49  ;;  %4631 = vmatpush.bf16.msrb.mxu0 %v7868_v12  ;;  %v2741_v49 = vpack.c.b16 %v2722_v30, %v2721_v1  ;;  %v2642_v1 = vpack.c.bf16 %v7182_v54, %v7182_v54 }
 0x25d   : > { %v3285_v0 = vadd.f32 %v8732_v39, %v3249_v33  ;;  %v3630_v33 = vunpack.c.l.b16 %v3549_v26  ;;  %v7263_v26 = vld [vmem:[%s8022_s16 + $0x172] sm:$0xff] }
 0x25e   : > { %v2487_v43 = vpop.f32.mrf.mxu2 }
 0x25f   : > { %v3317_v37 = vmax.f32 %v3285_v0, 0.0  ;;  %v2558_v58 = vadd.f32 %v2487_v43, %v8468_v32  ;;  %v2833_v21 = vpop.f32.mrf.mxu3  ;;  %v2395_v43 = vpack.c.b16 %v2376_v62, %v2375_v50  ;;  %v2988_v62 = vpack.c.bf16 %v7262_v4, %v7262_v4 }
 0x260   : > { %v3181_v34 = vpop.f32.mrf.mxu0 }
 0x261   : > { %3404 = vst [vmem:[#allocation2 + $0x51] sm:$0xff] %v3317_v37  ;;  %v2904_v53 = vadd.f32 %v2833_v21, %v2558_v58  ;;  %v3550_v40 = vpack.c.bf16 %v3317_v37, %v3317_v37  ;;  %v7876_v37 = vld [vmem:[%s9612_s3 + $0x128] sm:$0xff] }
 0x262   : > { %v7102_v21 = vld [vmem:[%s8022_s16 + $0x168] sm:$0xff]  ;;  %4977 = vmatpush.bf16.msrb.mxu1 %v7876_v37  ;;  %v2723_v37 = vunpack.c.l.b16 %v2642_v1  ;;  %v7866_v1 = vld [vmem:[%s9612_s3 + $0xd8] sm:$0xff] }
 0x263   : > { %v3250_v42 = vadd.f32 %v3179_v44, %v2904_v53  ;;  %v3631_v32 = vunpack.c.l.b16 %v3550_v40  ;;  %v3087_v44 = vpack.c.b16 %v3068_v48, %v3067_v13  ;;  %v7183_v53 = vld [vmem:[%s8022_s16 + $0x171] sm:$0xff]  ;;  %v2296_v12 = vpack.c.bf16 %v7102_v21, %v7102_v21 }
 0x264   : > { %v2989_v48 = vpack.c.bf16 %v7263_v26, %v7263_v26  ;;  %v2643_v30 = vpack.c.bf16 %v7183_v53, %v7183_v53  ;;  %v7843_v53 = vld [vmem:[%s9612_s3 + $0x20] sm:$0xff] }
 0x265   : > { %v3286_v23 = vadd.f32 %v8732_v39, %v3250_v42  ;;  %v3659_v22 = vpack.c.b16 %v3631_v32, %v3630_v33  ;;  %3972 = vmatpush.bf16.msrb.mxu2 %v7843_v53 }
 0x266   : > { %v2489_v27 = vpop.f32.mrf.mxu2 }
 0x267   : > { %v3318_v0 = vmax.f32 %v3286_v23, 0.0  ;;  %v2559_v24 = vadd.f32 %v2489_v27, %v8478_v55  ;;  %v2835_v59 = vpop.f32.mrf.mxu3  ;;  %3759 = vmatmul.bf16.gmra.mxu1 %v3659_v22  ;;  %v7103_v55 = vld [vmem:[%s8022_s16 + $0x170] sm:$0xff]  ;;  %v2377_v27 = vunpack.c.l.b16 %v2296_v12 }
 0x268   : > { %v3184_v16 = vpop.f32.mrf.mxu0  ;;  %v2297_v50 = vpack.c.bf16 %v7103_v55, %v7103_v55 }
 0x269   : > { %3405 = vst [vmem:[#allocation2 + $0x61] sm:$0xff] %v3318_v0  ;;  %v2905_v46 = vadd.f32 %v2835_v59, %v2559_v24  ;;  %v3551_v33 = vpack.c.bf16 %v3318_v0, %v3318_v0  ;;  %v3069_v59 = vunpack.c.l.b16 %v2988_v62  ;;  %v7104_v62 = vld [vmem:[%s8022_s16 + $0x180] sm:$0xff] }
 0x26a   : > { %v2378_v24 = vunpack.c.l.b16 %v2297_v50 }
 0x26b   : > { %v3251_v58 = vadd.f32 %v3181_v34, %v2905_v46  ;;  %2531 = vmatmul.bf16.gmra.mxu2 %v2395_v43  ;;  %3223 = vmatmul.bf16.gmra.mxu0 %v3087_v44  ;;  %v3070_v44 = vunpack.c.l.b16 %v2989_v48  ;;  %v7842_v48 = vld [vmem:[%s9612_s3 + $0x18] sm:$0xff] }
 0x26c   : > { %2877 = vmatmul.bf16.gmra.mxu3 %v2741_v49  ;;  %v3632_v49 = vunpack.c.l.b16 %v3551_v33  ;;  %v2396_v54 = vpack.c.b16 %v2378_v24, %v2377_v27  ;;  %v7858_v33 = vld [vmem:[%s9612_s3 + $0x98] sm:$0xff]  ;;  %3973 = vmatpush.bf16.msrb.mxu2 %v7842_v48  ;;  %v2298_v24 = vpack.c.bf16 %v7104_v62, %v7104_v62  ;;  %v7840_v62 = vld [vmem:[%s9612_s3 + $0x8] sm:$0xff] }
 0x26d   : > { %v3287_v56 = vadd.f32 %v8732_v39, %v3251_v58  ;;  %v2724_v58 = vunpack.c.l.b16 %v2643_v30  ;;  %v7265_v30 = vld [vmem:[%s8022_s16 + $0x18a] sm:$0xff] }
 0x26e   : > { %v2492_v40 = vpop.f32.mrf.mxu2 }
 0x26f   : > { %v3319_v13 = vmax.f32 %v3287_v56, 0.0  ;;  %v2560_v42 = vadd.f32 %v2492_v40, %v8488_v29  ;;  %v2838_v34 = vpop.f32.mrf.mxu3  ;;  %v2214_v29 = vadd.f32 %v8486_v3, %v8494_v5  ;;  %v7859_v3 = vld [vmem:[%s9612_s3 + $0xa0] sm:$0xff]  ;;  %v2742_v12 = vpack.c.b16 %v2724_v58, %v2723_v37 }
 0x270   : > { %v3186_v32 = vpop.f32.mrf.mxu0  ;;  %v7867_v5 = vld [vmem:[%s9612_s3 + $0xe0] sm:$0xff]  ;;  %4286 = vmatpush.bf16.msrb.mxu3 %v7859_v3  ;;  %v2991_v37 = vpack.c.bf16 %v7265_v30, %v7265_v30 }
 0x271   : > { %3406 = vst [vmem:[#allocation2 + $0x69] sm:$0xff] %v3319_v13  ;;  %v2906_v23 = vadd.f32 %v2838_v34, %v2560_v42  ;;  %v3552_v22 = vpack.c.bf16 %v3319_v13, %v3319_v13  ;;  %v7105_v13 = vld [vmem:[%s8022_s16 + $0x188] sm:$0xff]  ;;  %4632 = vmatpush.bf16.msrb.mxu0 %v7867_v5 }
 0x272   : > { %v7264_v42 = vld [vmem:[%s8022_s16 + $0x182] sm:$0xff]  ;;  %v3072_v5 = vunpack.c.l.b16 %v2991_v37 }
 0x273   : > { %v3252_v43 = vadd.f32 %v3184_v16, %v2906_v23  ;;  %v3633_v46 = vunpack.c.l.b16 %v3552_v22  ;;  %v3088_v16 = vpack.c.b16 %v3070_v44, %v3069_v59  ;;  %v7184_v22 = vld [vmem:[%s8022_s16 + $0x181] sm:$0xff]  ;;  %v2299_v59 = vpack.c.bf16 %v7105_v13, %v7105_v13 }
 0x274   : > { %4287 = vmatpush.bf16.msrb.mxu3 %v7858_v33  ;;  %v7856_v13 = vld [vmem:[%s9612_s3 + $0x88] sm:$0xff] }
 0x275   : > { %v3288_v0 = vadd.f32 %v8732_v39, %v3252_v43  ;;  %v3660_v21 = vpack.c.b16 %v3633_v46, %v3632_v49  ;;  %v2990_v43 = vpack.c.bf16 %v7264_v42, %v7264_v42  ;;  %4633 = vmatpush.bf16.msrb.mxu0 %v7866_v1  ;;  %v7864_v42 = vld [vmem:[%s9612_s3 + $0xc8] sm:$0xff] }
 0x276   : > { %v2494_v55 = vpop.f32.mrf.mxu2 }
 0x277   : > { %v3320_v4 = vmax.f32 %v3288_v0, 0.0  ;;  %v2561_v26 = vadd.f32 %v2494_v55, %v2214_v29  ;;  %v2840_v56 = vpop.f32.mrf.mxu3  ;;  %3764 = vmatmul.bf16.gmra.mxu1 %v3660_v21  ;;  %v7841_v29 = vld [vmem:[%s9612_s3 + $0x10] sm:$0xff]  ;;  %v3071_v53 = vunpack.c.l.b16 %v2990_v43 }
 0x278   : > { %v3189_v40 = vpop.f32.mrf.mxu0  ;;  %v7857_v0 = vld [vmem:[%s9612_s3 + $0x90] sm:$0xff]  ;;  %3974 = vmatpush.bf16.msrb.mxu2 %v7841_v29  ;;  %v7107_v29 = vld [vmem:[%s8022_s16 + $0x1a0] sm:$0xff] }
 0x279   : > { %3407 = vst [vmem:[#allocation2 + $0x79] sm:$0xff] %v3320_v4  ;;  %v2907_v50 = vadd.f32 %v2840_v56, %v2561_v26  ;;  %v3553_v58 = vpack.c.bf16 %v3320_v4, %v3320_v4  ;;  %v7865_v21 = vld [vmem:[%s9612_s3 + $0xd0] sm:$0xff]  ;;  %v2644_v26 = vpack.c.bf16 %v7184_v22, %v7184_v22  ;;  %4288 = vmatpush.bf16.msrb.mxu3 %v7857_v0  ;;  %v2379_v4 = vunpack.c.l.b16 %v2298_v24  ;;  %v7266_v0 = vld [vmem:[%s8022_s16 + $0x19a] sm:$0xff] }
 0x27a   : > { %4634 = vmatpush.bf16.msrb.mxu0 %v7865_v21  ;;  %v3089_v24 = vpack.c.b16 %v3072_v5, %v3071_v53  ;;  %v7267_v21 = vld [vmem:[%s8022_s16 + $0x1a2] sm:$0xff]  ;;  %v2992_v53 = vpack.c.bf16 %v7266_v0, %v7266_v0 }
 0x27b   : > { %v3253_v34 = vadd.f32 %v3186_v32, %v2907_v50  ;;  %2536 = vmatmul.bf16.gmra.mxu2 %v2396_v54  ;;  %3228 = vmatmul.bf16.gmra.mxu0 %v3088_v16  ;;  %v7185_v32 = vld [vmem:[%s8022_s16 + $0x189] sm:$0xff]  ;;  %v2380_v16 = vunpack.c.l.b16 %v2299_v59  ;;  %v7839_v59 = vld [vmem:[%s9612_s3] sm:$0xff] }
 0x27c   : > { %2882 = vmatmul.bf16.gmra.mxu3 %v2742_v12  ;;  %v2645_v56 = vpack.c.bf16 %v7185_v32, %v7185_v32  ;;  %v3634_v12 = vunpack.c.l.b16 %v3553_v58  ;;  %3975 = vmatpush.bf16.msrb.mxu2 %v7840_v62  ;;  %v7106_v58 = vld [vmem:[%s8022_s16 + $0x198] sm:$0xff] }
 0x27d   : > { %v3289_v23 = vadd.f32 %v8732_v39, %v3253_v34  ;;  %v2725_v34 = vunpack.c.l.b16 %v2644_v26  ;;  %4289 = vmatpush.bf16.msrb.mxu3 %v7856_v13 }
 0x27e   : > { %v2497_v27 = vpop.f32.mrf.mxu2  ;;  %v2726_v48 = vunpack.c.l.b16 %v2645_v56  ;;  %4635 = vmatpush.bf16.msrb.mxu0 %v7864_v42  ;;  %v7186_v56 = vld [vmem:[%s8022_s16 + $0x199] sm:$0xff] }
 0x27f   : > { %v3321_v44 = vmax.f32 %v3289_v23, 0.0  ;;  %v2562_v49 = vadd.f32 %v2497_v27, %v8508_v11  ;;  %v2843_v46 = vpop.f32.mrf.mxu3  ;;  %v2397_v27 = vpack.c.b16 %v2380_v16, %v2379_v4  ;;  %v2300_v4 = vpack.c.bf16 %v7106_v58, %v7106_v58 }
 0x280   : > { %v3191_v55 = vpop.f32.mrf.mxu0  ;;  %3976 = vmatpush.bf16.msrb.mxu2 %v7839_v59  ;;  %v2301_v16 = vpack.c.bf16 %v7107_v29, %v7107_v29  ;;  %v2646_v13 = vpack.c.bf16 %v7186_v56, %v7186_v56 }
 0x281   : > { %3408 = vst [vmem:[#allocation2 + $0x81] sm:$0xff] %v3321_v44  ;;  %v2908_v11 = vadd.f32 %v2843_v46, %v2562_v49  ;;  %v3554_v54 = vpack.c.bf16 %v3321_v44, %v3321_v44  ;;  %v2743_v44 = vpack.c.b16 %v2726_v48, %v2725_v34  ;;  %v7875_v46 = vld [vmem:[%s9612_s3 + $0x120] sm:$0xff] }
 0x282   : > { %4978 = vmatpush.bf16.msrb.mxu1 %v7875_v46 }
 0x283   : > { %v3254_v3 = vadd.f32 %v3189_v40, %v2908_v11  ;;  %v3635_v50 = vunpack.c.l.b16 %v3554_v54  ;;  %v2216_v40 = vadd.f32 %v8503_v31, %v8511_v25  ;;  %v7855_v31 = vld [vmem:[%s9612_s3 + $0x80] sm:$0xff] }
 0x284   : > { %v7863_v25 = vld [vmem:[%s9612_s3 + $0xc0] sm:$0xff]  ;;  %4290 = vmatpush.bf16.msrb.mxu3 %v7855_v31 }
 0x285   : > { %v3290_v33 = vadd.f32 %v8732_v39, %v3254_v3  ;;  %v3661_v1 = vpack.c.b16 %v3635_v50, %v3634_v12  ;;  %4636 = vmatpush.bf16.msrb.mxu0 %v7863_v25  ;;  %v7187_v11 = vld [vmem:[%s8022_s16 + $0x1a1] sm:$0xff]  ;;  %v2993_v12 = vpack.c.bf16 %v7267_v21, %v7267_v21 }
 0x286   : > { %v2499_v30 = vpop.f32.mrf.mxu2  ;;  %v2647_v42 = vpack.c.bf16 %v7187_v11, %v7187_v11  ;;  %v4405_v11 = vld [vmem:[#allocation2 + $0x20] sm:$0xff] }
 0x287   : > { %v3322_v23 = vmax.f32 %v3290_v33, 0.0  ;;  %v2563_v22 = vadd.f32 %v2499_v30, %v2216_v40  ;;  %v2845_v32 = vpop.f32.mrf.mxu3  ;;  %3769 = vmatmul.bf16.gmra.mxu1 %v3661_v1  ;;  %v2381_v40 = vunpack.c.l.b16 %v2300_v4  ;;  %v2382_v33 = vunpack.c.l.b16 %v2301_v16 }
 0x288   : > { %v3194_v43 = vpop.f32.mrf.mxu0  ;;  %v3073_v1 = vunpack.c.l.b16 %v2992_v53  ;;  %v2728_v59 = vunpack.c.l.b16 %v2647_v42  ;;  %v7939_v53 = vld [vmem:[#allocation2] sm:$0xff]  ;;  %v4437_v42 = vpack.c.bf16 %v4405_v11, %v4405_v11 }
 0x289   : > { %3409 = vst [vmem:[#allocation2 + $0x91] sm:$0xff] %v3322_v23  ;;  %v2909_v49 = vadd.f32 %v2845_v32, %v2563_v22  ;;  %v3555_v50 = vpack.c.bf16 %v3322_v23, %v3322_v23  ;;  %v3074_v22 = vunpack.c.l.b16 %v2993_v12  ;;  %v4060_v11 = vld [vmem:[#allocation2 + $0x1a] sm:$0xff] }
 0x28b   : > { %v3255_v37 = vadd.f32 %v3191_v55, %v2909_v49  ;;  %2541 = vmatmul.bf16.gmra.mxu2 %v2397_v27  ;;  %3233 = vmatmul.bf16.gmra.mxu0 %v3089_v24  ;;  %v3636_v32 = vunpack.c.l.b16 %v3555_v50  ;;  %v2727_v24 = vunpack.c.l.b16 %v2646_v13  ;;  %v3090_v58 = vpack.c.b16 %v3074_v22, %v3073_v1 }
 0x28c   : > { %2887 = vmatmul.bf16.gmra.mxu3 %v2743_v44 }
 0x28d   : > { %v3291_v26 = vadd.f32 %v8732_v39, %v3255_v37  ;;  %v2398_v37 = vpack.c.b16 %v2382_v33, %v2381_v40 }
 0x28e   : > { %v2502_v54 = vpop.f32.mrf.mxu2 }
 0x28f   : > { %v3323_v3 = vmax.f32 %v3291_v26, 0.0  ;;  %v2564_v5 = vadd.f32 %v2502_v54, %v8522_v45  ;;  %v2848_v55 = vpop.f32.mrf.mxu3  ;;  %v2218_v45 = vadd.f32 %v8520_v57, %v8525_v18  ;;  %v4058_v18 = vld [vmem:[#allocation2 + $0x2] sm:$0xff]  ;;  %v4059_v26 = vld [vmem:[#allocation2 + $0xa] sm:$0xff] }
 0x290   : > { %v3196_v62 = vpop.f32.mrf.mxu0  ;;  %v4090_v50 = vpack.c.bf16 %v4058_v18, %v4058_v18 }
 0x291   : > { %3410 = vst [vmem:[#allocation2 + $0x99] sm:$0xff] %v3323_v3  ;;  %v2910_v34 = vadd.f32 %v2848_v55, %v2564_v5  ;;  %v3556_v48 = vpack.c.bf16 %v3323_v3, %v3323_v3  ;;  %v3463_v3 = vpack.c.bf16 %v7939_v53, %v7939_v53  ;;  %v4404_v5 = vld [vmem:[#allocation2 + $0x18] sm:$0xff]  ;;  %v4406_v53 = vld [vmem:[#allocation2 + $0x30] sm:$0xff] }
 0x292   : > { %v4171_v22 = vunpack.c.l.b16 %v4090_v50  ;;  %v4092_v50 = vpack.c.bf16 %v4060_v11, %v4060_v11 }
 0x293   : > { %v3256_v30 = vadd.f32 %v3194_v43, %v2910_v34  ;;  %v3637_v27 = vunpack.c.l.b16 %v3556_v48  ;;  %v2744_v43 = vpack.c.b16 %v2728_v59, %v2727_v24  ;;  %v4436_v48 = vpack.c.bf16 %v4404_v5, %v4404_v5 }
 0x294   : > { %v3857_v33 = vunpack.c.l.b16 %v3463_v3  ;;  %v4518_v24 = vunpack.c.l.b16 %v4437_v42  ;;  %v4438_v42 = vpack.c.bf16 %v4406_v53, %v4406_v53 }
 0x295   : > { %v3292_v23 = vadd.f32 %v8732_v39, %v3256_v30  ;;  %v3662_v31 = vpack.c.b16 %v3637_v27, %v3636_v32 }
 0x296   : > { %v2504_v25 = vpop.f32.mrf.mxu2 }
 0x297   : > { %v3324_v44 = vmax.f32 %v3292_v23, 0.0  ;;  %v2565_v49 = vadd.f32 %v2504_v25, %v2218_v45  ;;  %v2850_v46 = vpop.f32.mrf.mxu3  ;;  %3774 = vmatmul.bf16.gmra.mxu1 %v3662_v31 }
 0x298   : > { %v3199_v29 = vpop.f32.mrf.mxu0 }
 0x299   : > { %3411 = vst [vmem:[#allocation2 + $0xa9] sm:$0xff] %v3324_v44  ;;  %v2911_v0 = vadd.f32 %v2850_v46, %v2565_v49  ;;  %v3557_v55 = vpack.c.bf16 %v3324_v44, %v3324_v44  ;;  %v3889_v44 = vpack.c.b16 %v3857_v33, %v3857_v33  ;;  %v4517_v49 = vunpack.c.l.b16 %v4436_v48 }
 0x29b   : > { %v3257_v21 = vadd.f32 %v3196_v62, %v2911_v0  ;;  %2546 = vmatmul.bf16.gmra.mxu2 %v2398_v37  ;;  %3238 = vmatmul.bf16.gmra.mxu0 %v3090_v58  ;;  %v4091_v62 = vpack.c.bf16 %v4059_v26, %v4059_v26  ;;  %v3638_v1 = vunpack.c.l.b16 %v3557_v55 }
 0x29c   : > { %2892 = vmatmul.bf16.gmra.mxu3 %v2744_v43 }
 0x29d   : > { %v3293_v57 = vadd.f32 %v8732_v39, %v3257_v21  ;;  %v4172_v32 = vunpack.c.l.b16 %v4091_v62 }
 0x29e   : > { %v2507_v56 = vpop.f32.mrf.mxu2 }
 0x29f   : > { %v3325_v54 = vmax.f32 %v3293_v57, 0.0  ;;  %v2566_v4 = vadd.f32 %v2507_v56, %v8539_v7  ;;  %v2853_v16 = vpop.f32.mrf.mxu3  ;;  %v2220_v7 = vadd.f32 %v8534_v19, %v8542_v15  ;;  %v4203_v37 = vpack.c.b16 %v4172_v32, %v4171_v22  ;;  %v7874_v19 = vld [vmem:[%s9612_s3 + $0x118] sm:$0xff]  ;;  %v8886_v15 = vpop.f32.mrf.mxu1 }
 0x2a0   : > { %v3201_v12 = vpop.f32.mrf.mxu0  ;;  %4979 = vmatpush.bf16.msrb.mxu1 %v7874_v19  ;;  %v4407_v57 = vld [vmem:[#allocation2 + $0x38] sm:$0xff]  ;;  %v4173_v22 = vunpack.c.l.b16 %v4092_v50 }
 0x2a1   : > { %3412 = vst [vmem:[#allocation2 + $0xb1] sm:$0xff] %v3325_v54  ;;  %v2912_v13 = vadd.f32 %v2853_v16, %v2566_v4  ;;  %v3558_v34 = vpack.c.bf16 %v3325_v54, %v3325_v54  ;;  %v4061_v54 = vld [vmem:[#allocation2 + $0x22] sm:$0xff]  ;;  %v4439_v5 = vpack.c.bf16 %v4407_v57, %v4407_v57 }
 0x2a2   : > { %v4093_v62 = vpack.c.bf16 %v4061_v54, %v4061_v54 }
 0x2a3   : > { %v3258_v40 = vadd.f32 %v3199_v29, %v2912_v13  ;;  %v3639_v30 = vunpack.c.l.b16 %v3558_v34  ;;  %v4549_v29 = vpack.c.b16 %v4518_v24, %v4517_v49  ;;  %v4520_v33 = vunpack.c.l.b16 %v4439_v5 }
 0x2a4   : > { %v4174_v32 = vunpack.c.l.b16 %v4093_v62 }
 0x2a5   : > { %v3294_v27 = vadd.f32 %v8732_v39, %v3258_v40  ;;  %v3663_v59 = vpack.c.b16 %v3639_v30, %v3638_v1 }
 0x2a6   : > { %v2509_v45 = vpop.f32.mrf.mxu2 }
 0x2a7   : > { %v3326_v23 = vmax.f32 %v3294_v27, 0.0  ;;  %v2567_v31 = vadd.f32 %v2509_v45, %v2220_v7  ;;  %v2855_v25 = vpop.f32.mrf.mxu3  ;;  %3779 = vmatmul.bf16.gmra.mxu1 %v3663_v59  ;;  %v4519_v59 = vunpack.c.l.b16 %v4438_v42 }
 0x2a8   : > { %v3204_v46 = vpop.f32.mrf.mxu0 }
 0x2a9   : > { %3413 = vst [vmem:[#allocation2 + $0xc1] sm:$0xff] %v3326_v23  ;;  %v2913_v58 = vadd.f32 %v2855_v25, %v2567_v31  ;;  %v3559_v4 = vpack.c.bf16 %v3326_v23, %v3326_v23  ;;  %v4550_v31 = vpack.c.b16 %v4520_v33, %v4519_v59  ;;  %v4204_v25 = vpack.c.b16 %v4174_v32, %v4173_v22  ;;  %v4411_v59 = vld [vmem:[#allocation2 + $0x68] sm:$0xff] }
 0x2ab   : > { %v3259_v43 = vadd.f32 %v3201_v12, %v2913_v58  ;;  %3977 = vmatmul.bf16.vlgmr.msrb.gmra.mxu2 %v3889_v44  ;;  %4637 = vmatmul.bf16.vlgmr.msrb.gmra.mxu0 %v4549_v29  ;;  %v8890_v12 = vpop.f32.mrf.mxu1  ;;  %v3640_v34 = vunpack.c.l.b16 %v3559_v4 }
 0x2ac   : > { %4291 = vmatmul.bf16.vlgmr.msrb.gmra.mxu3 %v4203_v37 }
 0x2ad   : > { %v3295_v0 = vadd.f32 %v8732_v39, %v3259_v43  ;;  %v4062_v43 = vld [vmem:[#allocation2 + $0x32] sm:$0xff] }
 0x2ae   : > { %v2512_v21 = vpop.f32.mrf.mxu2  ;;  %v4094_v11 = vpack.c.bf16 %v4062_v43, %v4062_v43 }
 0x2af   : > { %v3327_v18 = vmax.f32 %v3295_v0, 0.0  ;;  %v2568_v26 = vadd.f32 %v2512_v21, %v8553_v2  ;;  %v2858_v56 = vpop.f32.mrf.mxu3  ;;  %v2222_v2 = vadd.f32 %v8551_v60, %v8556_v41  ;;  %v4063_v0 = vld [vmem:[#allocation2 + $0x3a] sm:$0xff] }
 0x2b0   : > { %v3206_v16 = vpop.f32.mrf.mxu0  ;;  %v4095_v54 = vpack.c.bf16 %v4063_v0, %v4063_v0  ;;  %v4175_v42 = vunpack.c.l.b16 %v4094_v11 }
 0x2b1   : > { %3414 = vst [vmem:[#allocation2 + $0xc9] sm:$0xff] %v3327_v18  ;;  %v2914_v3 = vadd.f32 %v2858_v56, %v2568_v26  ;;  %v3560_v55 = vpack.c.bf16 %v3327_v18, %v3327_v18  ;;  %v4408_v18 = vld [vmem:[#allocation2 + $0x48] sm:$0xff] }
 0x2b3   : > { %v3260_v13 = vadd.f32 %v3204_v46, %v2914_v3  ;;  %v3641_v48 = vunpack.c.l.b16 %v3560_v55  ;;  %v8895_v60 = vpop.f32.mrf.mxu1  ;;  %v4409_v46 = vld [vmem:[#allocation2 + $0x50] sm:$0xff] }
 0x2b5   : > { %v3296_v40 = vadd.f32 %v8732_v39, %v3260_v13  ;;  %v3664_v1 = vpack.c.b16 %v3641_v48, %v3640_v34  ;;  %v4176_v34 = vunpack.c.l.b16 %v4095_v54 }
 0x2b6   : > { %v2514_v30 = vpop.f32.mrf.mxu2 }
 0x2b7   : > { %v3328_v7 = vmax.f32 %v3296_v40, 0.0  ;;  %v2569_v27 = vadd.f32 %v2514_v30, %v2222_v2  ;;  %v2860_v24 = vpop.f32.mrf.mxu3  ;;  %3784 = vmatmul.bf16.gmra.mxu1 %v3664_v1 }
 0x2b8   : > { %v3209_v45 = vpop.f32.mrf.mxu0 }
 0x2b9   : > { %3415 = vst [vmem:[#allocation2 + $0xd9] sm:$0xff] %v3328_v7  ;;  %v2915_v23 = vadd.f32 %v2860_v24, %v2569_v27  ;;  %v3561_v21 = vpack.c.bf16 %v3328_v7, %v3328_v7 }
 0x2bb   : > { %v3261_v44 = vadd.f32 %v3206_v16, %v2915_v23  ;;  %3982 = vmatmul.bf16.gmra.mxu2 %v4549_v29  ;;  %4642 = vmatmul.bf16.gmra.mxu0 %v4550_v31  ;;  %v4441_v29 = vpack.c.bf16 %v4409_v46, %v4409_v46  ;;  %v4440_v16 = vpack.c.bf16 %v4408_v18, %v4408_v18  ;;  %v3642_v53 = vunpack.c.l.b16 %v3561_v21 }
 0x2bc   : > { %4296 = vmatmul.bf16.gmra.mxu3 %v4204_v25 }
 0x2bd   : > { %v3297_v41 = vadd.f32 %v8732_v39, %v3261_v44  ;;  %v4522_v50 = vunpack.c.l.b16 %v4441_v29  ;;  %v4521_v33 = vunpack.c.l.b16 %v4440_v16  ;;  %v4064_v44 = vld [vmem:[#allocation2 + $0x4a] sm:$0xff]  ;;  %v8918_v29 = vld [vmem:[%s9611_s2] ss:$0 sm:$0xff] }
 0x2be   : > { %v2517_v49 = vpop.f32.mrf.mxu2  ;;  %v4096_v43 = vpack.c.bf16 %v4064_v44, %v4064_v44 }
 0x2bf   : > { %v3329_v37 = vmax.f32 %v3297_v41, 0.0  ;;  %v2570_v58 = vadd.f32 %v2517_v49, %v8570_v9  ;;  %v2863_v19 = vpop.f32.mrf.mxu3  ;;  %v2224_v9 = vadd.f32 %v8565_v20, %v8573_v10  ;;  %v4551_v22 = vpack.c.b16 %v4522_v50, %v4521_v33  ;;  %v7873_v20 = vld [vmem:[%s9612_s3 + $0x110] sm:$0xff] }
 0x2c0   : > { %v3211_v57 = vpop.f32.mrf.mxu0  ;;  %v4205_v10 = vpack.c.b16 %v4176_v34, %v4175_v42  ;;  %4980 = vmatpush.bf16.msrb.mxu1 %v7873_v20  ;;  %v4065_v41 = vld [vmem:[#allocation2 + $0x52] sm:$0xff]  ;;  %v4177_v16 = vunpack.c.l.b16 %v4096_v43  ;;  %v4066_v20 = vld [vmem:[#allocation2 + $0x62] sm:$0xff] }
 0x2c1   : > { %3416 = vst [vmem:[#allocation2 + $0xe1] sm:$0xff] %v3329_v37  ;;  %v2916_v26 = vadd.f32 %v2863_v19, %v2570_v58  ;;  %v3562_v56 = vpack.c.bf16 %v3329_v37, %v3329_v37  ;;  %v4410_v37 = vld [vmem:[#allocation2 + $0x60] sm:$0xff]  ;;  %v4443_v58 = vpack.c.bf16 %v4411_v59, %v4411_v59  ;;  %v4097_v0 = vpack.c.bf16 %v4065_v41, %v4065_v41 }
 0x2c3   : > { %v3262_v4 = vadd.f32 %v3209_v45, %v2916_v26  ;;  %v3643_v3 = vunpack.c.l.b16 %v3562_v56  ;;  %v4524_v11 = vunpack.c.l.b16 %v4443_v58 }
 0x2c4   : > { %v8899_v5 = vpop.f32.mrf.mxu1 }
 0x2c5   : > { %v3298_v55 = vadd.f32 %v8732_v39, %v3262_v4  ;;  %v3665_v62 = vpack.c.b16 %v3643_v3, %v3642_v53  ;;  %v4178_v53 = vunpack.c.l.b16 %v4097_v0 }
 0x2c6   : > { %v2519_v13 = vpop.f32.mrf.mxu2 }
 0x2c7   : > { %v3330_v48 = vmax.f32 %v3298_v55, 0.0  ;;  %v2571_v2 = vadd.f32 %v2519_v13, %v2224_v9  ;;  %v2865_v40 = vpop.f32.mrf.mxu3  ;;  %3789 = vmatmul.bf16.gmra.mxu1 %v3665_v62  ;;  %v4206_v13 = vpack.c.b16 %v4178_v53, %v4177_v16  ;;  %v7872_v53 = vld [vmem:[%s9612_s3 + $0x108] sm:$0xff] }
 0x2c8   : > { %v3214_v1 = vpop.f32.mrf.mxu0  ;;  %4981 = vmatpush.bf16.msrb.mxu1 %v7872_v53  ;;  %v4070_v53 = vld [vmem:[#allocation2 + $0x92] sm:$0xff] }
 0x2c9   : > { %3417 = vst [vmem:[#allocation2 + $0xf1] sm:$0xff] %v3330_v48  ;;  %v2917_v30 = vadd.f32 %v2865_v40, %v2571_v2  ;;  %v3563_v49 = vpack.c.bf16 %v3330_v48, %v3330_v48  ;;  %v4413_v40 = vld [vmem:[#allocation2 + $0x80] sm:$0xff] }
 0x2cb   : > { %v3263_v32 = vadd.f32 %v3211_v57, %v2917_v30  ;;  %3987 = vmatmul.bf16.gmra.mxu2 %v4550_v31  ;;  %4647 = vmatmul.bf16.gmra.mxu0 %v4551_v22  ;;  %v4442_v57 = vpack.c.bf16 %v4410_v37, %v4410_v37 }
 0x2cc   : > { %4301 = vmatmul.bf16.gmra.mxu3 %v4205_v10  ;;  %v8907_v7 = vpop.f32.mrf.mxu1  ;;  %v4067_v10 = vld [vmem:[#allocation2 + $0x6a] sm:$0xff] }
 0x2cd   : > { %v3299_v27 = vadd.f32 %v8732_v39, %v3263_v32  ;;  %v3644_v39 = vunpack.c.l.b16 %v3563_v49  ;;  %v4523_v50 = vunpack.c.l.b16 %v4442_v57 }
 0x2ce   : > { %v2522_v24 = vpop.f32.mrf.mxu2 }
 0x2cf   : > { %v3331_v45 = vmax.f32 %v3299_v27, 0.0  ;;  %v2572_v23 = vadd.f32 %v2522_v24, %v8584_v51  ;;  %v2868_v25 = vpop.f32.mrf.mxu3  ;;  %v2226_v51 = vadd.f32 %v8582_v6, %v8587_v28  ;;  %v4552_v28 = vpack.c.b16 %v4524_v11, %v4523_v50  ;;  %v4412_v24 = vld [vmem:[#allocation2 + $0x78] sm:$0xff] }
 0x2d0   : > { %v3216_v46 = vpop.f32.mrf.mxu0  ;;  %v4444_v41 = vpack.c.bf16 %v4412_v24, %v4412_v24 }
 0x2d1   : > { %3418 = vst [vmem:[#allocation2 + $0xf9] sm:$0xff] %v3331_v45  ;;  %v2918_v31 = vadd.f32 %v2868_v25, %v2572_v23  ;;  %v3564_v19 = vpack.c.bf16 %v3331_v45, %v3331_v45  ;;  %v4098_v23 = vpack.c.bf16 %v4066_v20, %v4066_v20  ;;  %v4099_v25 = vpack.c.bf16 %v4067_v10, %v4067_v10 }
 0x2d2   : > { %v4525_v11 = vunpack.c.l.b16 %v4444_v41 }
 0x2d3   : > { %v3264_v21 = vadd.f32 %v3214_v1, %v2918_v31  ;;  %v3645_v18 = vunpack.c.l.b16 %v3564_v19  ;;  %v9620_v31 = vld [vmem:[#allocation4_spill] sm:$0xff]  ;;  %v4179_v57 = vunpack.c.l.b16 %v4098_v23 }
 0x2d4   : > { %v8911_v26 = vpop.f32.mrf.mxu1 }
 0x2d5   : > { %v3300_v56 = vadd.f32 %v8918_v29, %v3264_v21  ;;  %v3666_v54 = vpack.c.b16 %v3645_v18, %v3644_v39  ;;  %v4180_v39 = vunpack.c.l.b16 %v4099_v25 }
 0x2d6   : > { %v2524_v4 = vpop.f32.mrf.mxu2 }
 0x2d7   : > { %v3332_v3 = vmax.f32 %v3300_v56, 0.0  ;;  %v2573_v9 = vadd.f32 %v2524_v4, %v2226_v51  ;;  %v2870_v55 = vpop.f32.mrf.mxu3  ;;  %3794 = vmatmul.bf16.gmra.mxu1 %v3666_v54 }
 0x2d8   : > { %v3219_v62 = vpop.f32.mrf.mxu0 }
 0x2d9   : > { %3419 = vst [vmem:[#allocation2 + $0x109] sm:$0xff] %v3332_v3  ;;  %v2919_v6 = vadd.f32 %v2870_v55, %v2573_v9  ;;  %v3565_v32 = vpack.c.bf16 %v3332_v3, %v3332_v3  ;;  %v4207_v3 = vpack.c.b16 %v4180_v39, %v4179_v57 }
 0x2db   : > { %v3265_v42 = vadd.f32 %v3216_v46, %v2919_v6  ;;  %3992 = vmatmul.bf16.gmra.mxu2 %v4551_v22  ;;  %4652 = vmatmul.bf16.gmra.mxu0 %v4552_v28  ;;  %v4445_v22 = vpack.c.bf16 %v4413_v40, %v4413_v40  ;;  %v3646_v49 = vunpack.c.l.b16 %v3565_v32  ;;  %v4415_v6 = vld [vmem:[#allocation2 + $0x98] sm:$0xff]  ;;  %v4069_v40 = vld [vmem:[#allocation2 + $0x82] sm:$0xff] }
 0x2dc   : > { %4306 = vmatmul.bf16.gmra.mxu3 %v4206_v13  ;;  %v8921_v34 = vpop.f32.mrf.mxu1  ;;  %v4447_v20 = vpack.c.bf16 %v4415_v6, %v4415_v6 }
 0x2dd   : > { %v3301_v48 = vadd.f32 %v8918_v29, %v3265_v42  ;;  %v4526_v43 = vunpack.c.l.b16 %v4445_v22 }
 0x2de   : > { %v2527_v2 = vpop.f32.mrf.mxu2 }
 0x2df   : > { %v3333_v33 = vmax.f32 %v3301_v48, 0.0  ;;  %v2574_v1 = vadd.f32 %v2527_v2, %v8601_v35  ;;  %v2873_v30 = vpop.f32.mrf.mxu3  ;;  %v9621_v35 = vld [vmem:[#allocation3_spill] sm:$0xff]  ;;  %v4553_v16 = vpack.c.b16 %v4526_v43, %v4525_v11  ;;  %v4068_v2 = vld [vmem:[#allocation2 + $0x7a] sm:$0xff] }
 0x2e0   : > { %v3221_v27 = vpop.f32.mrf.mxu0  ;;  %v2228_v58 = vadd.f32 %v9621_v35, %v9620_v31  ;;  %v4100_v32 = vpack.c.bf16 %v4068_v2, %v4068_v2 }
 0x2e1   : > { %3420 = vst [vmem:[#allocation2 + $0x111] sm:$0xff] %v3333_v33  ;;  %v2920_v59 = vadd.f32 %v2873_v30, %v2574_v1  ;;  %v3566_v45 = vpack.c.bf16 %v3333_v33, %v3333_v33  ;;  %v4414_v30 = vld [vmem:[#allocation2 + $0x90] sm:$0xff] }
 0x2e3   : > { %v3266_v44 = vadd.f32 %v3219_v62, %v2920_v59  ;;  %v3647_v46 = vunpack.c.l.b16 %v3566_v45  ;;  %v4446_v59 = vpack.c.bf16 %v4414_v30, %v4414_v30 }
 0x2e4   : > { %v8925_v37 = vpop.f32.mrf.mxu1 }
 0x2e5   : > { %v3302_v19 = vadd.f32 %v8918_v29, %v3266_v44  ;;  %v3667_v0 = vpack.c.b16 %v3647_v46, %v3646_v49  ;;  %v4528_v44 = vunpack.c.l.b16 %v4447_v20  ;;  %v4181_v46 = vunpack.c.l.b16 %v4100_v32 }
 0x2e6   : > { %v2529_v21 = vpop.f32.mrf.mxu2  ;;  %v4527_v43 = vunpack.c.l.b16 %v4446_v59 }
 0x2e7   : > { %v3334_v18 = vmax.f32 %v3302_v19, 0.0  ;;  %v2575_v51 = vadd.f32 %v2529_v21, %v2228_v58  ;;  %v2875_v56 = vpop.f32.mrf.mxu3  ;;  %3799 = vmatmul.bf16.gmra.mxu1 %v3667_v0 }
 0x2e8   : > { %v3224_v54 = vpop.f32.mrf.mxu0  ;;  %v4554_v57 = vpack.c.b16 %v4528_v44, %v4527_v43  ;;  %v4419_v43 = vld [vmem:[#allocation2 + $0xc8] sm:$0xff] }
 0x2e9   : > { %3421 = vst [vmem:[#allocation2 + $0x121] sm:$0xff] %v3334_v18  ;;  %v2921_v4 = vadd.f32 %v2875_v56, %v2575_v51  ;;  %v3567_v33 = vpack.c.bf16 %v3334_v18, %v3334_v18  ;;  %v4417_v56 = vld [vmem:[#allocation2 + $0xb0] sm:$0xff] }
 0x2eb   : > { %v3267_v9 = vadd.f32 %v3221_v27, %v2921_v4  ;;  %3997 = vmatmul.bf16.gmra.mxu2 %v4552_v28  ;;  %4657 = vmatmul.bf16.gmra.mxu0 %v4553_v16  ;;  %v4101_v27 = vpack.c.bf16 %v4069_v40, %v4069_v40  ;;  %v3648_v22 = vunpack.c.l.b16 %v3567_v33 }
 0x2ec   : > { %4311 = vmatmul.bf16.gmra.mxu3 %v4207_v3  ;;  %v8933_v55 = vpop.f32.mrf.mxu1  ;;  %v4071_v3 = vld [vmem:[#allocation2 + $0x9a] sm:$0xff] }
 0x2ed   : > { %v3303_v50 = vadd.f32 %v8918_v29, %v3267_v9  ;;  %v4182_v31 = vunpack.c.l.b16 %v4101_v27 }
 0x2ee   : > { %v2532_v62 = vpop.f32.mrf.mxu2 }
 0x2ef   : > { %v3335_v13 = vmax.f32 %v3303_v50, 0.0  ;;  %v2576_v42 = vadd.f32 %v2532_v62, %v8615_v38  ;;  %v2878_v48 = vpop.f32.mrf.mxu3  ;;  %v2230_v38 = vadd.f32 %v8613_v63, %v8618_v61  ;;  %v4208_v39 = vpack.c.b16 %v4182_v31, %v4181_v46  ;;  %v4416_v62 = vld [vmem:[#allocation2 + $0xa8] sm:$0xff] }
 0x2f0   : > { %v3226_v1 = vpop.f32.mrf.mxu0  ;;  %v4448_v40 = vpack.c.bf16 %v4416_v62, %v4416_v62 }
 0x2f1   : > { %3422 = vst [vmem:[#allocation2 + $0x129] sm:$0xff] %v3335_v13  ;;  %v2922_v28 = vadd.f32 %v2878_v48, %v2576_v42  ;;  %v3568_v10 = vpack.c.bf16 %v3335_v13, %v3335_v13  ;;  %v4102_v42 = vpack.c.bf16 %v4070_v53, %v4070_v53  ;;  %v4103_v48 = vpack.c.bf16 %v4071_v3, %v4071_v3  ;;  %v7886_v53 = vld [vmem:[%s9612_s3 + $0x178] sm:$0xff] }
 0x2f2   : > { %v7894_v3 = vld [vmem:[%s9612_s3 + $0x1b8] sm:$0xff]  ;;  %5321 = vmatpush.bf16.msra.mxu2 %v7886_v53 }
 0x2f3   : > { %v3268_v24 = vadd.f32 %v3224_v54, %v2922_v28  ;;  %v3649_v45 = vunpack.c.l.b16 %v3568_v10  ;;  %v4184_v59 = vunpack.c.l.b16 %v4103_v48  ;;  %5668 = vmatpush.bf16.msra.mxu3 %v7894_v3 }
 0x2f4   : > { %v8937_v23 = vpop.f32.mrf.mxu1 }
 0x2f5   : > { %v3304_v25 = vadd.f32 %v8918_v29, %v3268_v24  ;;  %v3668_v41 = vpack.c.b16 %v3649_v45, %v3648_v22  ;;  %v4183_v24 = vunpack.c.l.b16 %v4102_v42  ;;  %v2234_v42 = vadd.f32 %v8669_v47, %v8680_v52  ;;  %v7902_v52 = vld [vmem:[%s9612_s3 + $0x1f8] sm:$0xff] }
 0x2f6   : > { %v2534_v49 = vpop.f32.mrf.mxu2  ;;  %6014 = vmatpush.bf16.msra.mxu0 %v7902_v52 }
 0x2f7   : > { %v3336_v35 = vmax.f32 %v3304_v25, 0.0  ;;  %v2577_v58 = vadd.f32 %v2534_v49, %v2230_v38  ;;  %v2880_v19 = vpop.f32.mrf.mxu3  ;;  %3804 = vmatmul.bf16.gmra.mxu1 %v3668_v41  ;;  %v4529_v25 = vunpack.c.l.b16 %v4448_v40  ;;  %v4209_v46 = vpack.c.b16 %v4184_v59, %v4183_v24 }
 0x2f8   : > { %v3229_v0 = vpop.f32.mrf.mxu0 }
 0x2f9   : > { %3423 = vst [vmem:[#allocation2 + $0x139] sm:$0xff] %v3336_v35  ;;  %v2923_v21 = vadd.f32 %v2880_v19, %v2577_v58  ;;  %v3569_v9 = vpack.c.bf16 %v3336_v35, %v3336_v35 }
 0x2fb   : > { %v3269_v18 = vadd.f32 %v3226_v1, %v2923_v21  ;;  %4002 = vmatmul.bf16.gmra.mxu2 %v4553_v16  ;;  %4662 = vmatmul.bf16.gmra.mxu0 %v4554_v57  ;;  %v4449_v16 = vpack.c.bf16 %v4417_v56, %v4417_v56  ;;  %v3650_v33 = vunpack.c.l.b16 %v3569_v9 }
 0x2fc   : > { %4316 = vmatmul.bf16.gmra.mxu3 %v4208_v39  ;;  %v8942_v63 = vpop.f32.mrf.mxu1 }
 0x2fd   : > { %v3305_v61 = vadd.f32 %v8918_v29, %v3269_v18  ;;  %v4530_v10 = vunpack.c.l.b16 %v4449_v16  ;;  %v4072_v18 = vld [vmem:[#allocation2 + $0xaa] sm:$0xff] }
 0x2fe   : > { %v2537_v51 = vpop.f32.mrf.mxu2  ;;  %v4104_v9 = vpack.c.bf16 %v4072_v18, %v4072_v18  ;;  %v7910_v18 = vld [vmem:[%s9612_s3 + $0x238] sm:$0xff] }
 0x2ff   : > { %v3337_v11 = vmax.f32 %v3305_v61, 0.0  ;;  %v2578_v54 = vadd.f32 %v2537_v51, %v8635_v8  ;;  %v2883_v4 = vpop.f32.mrf.mxu3  ;;  %v9622_v8 = vld [vmem:[#allocation5_spill] sm:$0xff]  ;;  %v4555_v49 = vpack.c.b16 %v4530_v10, %v4529_v25  ;;  %v4073_v61 = vld [vmem:[#allocation2 + $0xb2] sm:$0xff] }
 0x300   : > { %v3231_v50 = vpop.f32.mrf.mxu0  ;;  %v2232_v28 = vadd.f32 %v9622_v8, %v8644_v14  ;;  %v7871_v14 = vld [vmem:[%s9612_s3 + $0x100] sm:$0xff] }
 0x301   : > { %3424 = vst [vmem:[#allocation2 + $0x141] sm:$0xff] %v3337_v11  ;;  %v2924_v6 = vadd.f32 %v2883_v4, %v2578_v54  ;;  %v3570_v13 = vpack.c.bf16 %v3337_v11, %v3337_v11  ;;  %4982 = vmatpush.bf16.msrb.mxu1 %v7871_v14  ;;  %v4418_v11 = vld [vmem:[#allocation2 + $0xc0] sm:$0xff]  ;;  %v4451_v54 = vpack.c.bf16 %v4419_v43, %v4419_v43  ;;  %v4420_v43 = vld [vmem:[#allocation2 + $0xd8] sm:$0xff] }
 0x302   : > { %v4450_v62 = vpack.c.bf16 %v4418_v11, %v4418_v11  ;;  %v4452_v11 = vpack.c.bf16 %v4420_v43, %v4420_v43 }
 0x303   : > { %v3270_v2 = vadd.f32 %v3229_v0, %v2924_v6  ;;  %v3651_v1 = vunpack.c.l.b16 %v3570_v13 }
 0x304   : > { %v8946_v30 = vpop.f32.mrf.mxu1 }
 0x305   : > { %v3306_v20 = vadd.f32 %v8918_v29, %v3270_v2  ;;  %v3669_v32 = vpack.c.b16 %v3651_v1, %v3650_v33  ;;  %v4532_v2 = vunpack.c.l.b16 %v4451_v54  ;;  %v4185_v1 = vunpack.c.l.b16 %v4104_v9  ;;  %6360 = vmatpush.bf16.msra.mxu1 %v7910_v18 }
 0x306   : > { %v2539_v27 = vpop.f32.mrf.mxu2 }
 0x307   : > { %v3338_v22 = vmax.f32 %v3306_v20, 0.0  ;;  %v2579_v45 = vadd.f32 %v2539_v27, %v2232_v28  ;;  %v2885_v38 = vpop.f32.mrf.mxu3  ;;  %3809 = vmatmul.bf16.gmra.mxu1 %v3669_v32  ;;  %v4531_v32 = vunpack.c.l.b16 %v4450_v62 }
 0x308   : > { %v3234_v44 = vpop.f32.mrf.mxu0 }
 0x309   : > { %3425 = vst [vmem:[#allocation2 + $0x151] sm:$0xff] %v3338_v22  ;;  %v2925_v41 = vadd.f32 %v2885_v38, %v2579_v45  ;;  %v3571_v51 = vpack.c.bf16 %v3338_v22, %v3338_v22  ;;  %v4556_v59 = vpack.c.b16 %v4532_v2, %v4531_v32  ;;  %v4533_v2 = vunpack.c.l.b16 %v4452_v11 }
 0x30b   : > { %v3271_v31 = vadd.f32 %v3231_v50, %v2925_v41  ;;  %4007 = vmatmul.bf16.gmra.mxu2 %v4554_v57  ;;  %4667 = vmatmul.bf16.gmra.mxu0 %v4555_v49  ;;  %v3652_v6 = vunpack.c.l.b16 %v3571_v51 }
 0x30c   : > { %4321 = vmatmul.bf16.gmra.mxu3 %v4209_v46  ;;  %v8954_v35 = vpop.f32.mrf.mxu1 }
 0x30d   : > { %v3307_v58 = vadd.f32 %v8918_v29, %v3271_v31  ;;  %v4074_v31 = vld [vmem:[#allocation2 + $0xc2] sm:$0xff] }
 0x30e   : > { %v2542_v19 = vpop.f32.mrf.mxu2 }
 0x30f   : > { %v3339_v0 = vmax.f32 %v3307_v58, 0.0  ;;  %v2580_v21 = vadd.f32 %v2542_v19, %v8663_v36  ;;  %v2888_v39 = vpop.f32.mrf.mxu3  ;;  %v4105_v36 = vpack.c.bf16 %v4073_v61, %v4073_v61  ;;  %v4075_v58 = vld [vmem:[#allocation2 + $0xca] sm:$0xff]  ;;  %v4106_v61 = vpack.c.bf16 %v4074_v31, %v4074_v31 }
 0x310   : > { %v3236_v56 = vpop.f32.mrf.mxu0  ;;  %v4107_v51 = vpack.c.bf16 %v4075_v58, %v4075_v58 }
 0x311   : > { %3426 = vst [vmem:[#allocation2 + $0x159] sm:$0xff] %v3339_v0  ;;  %v2926_v57 = vadd.f32 %v2888_v39, %v2580_v21  ;;  %v3572_v4 = vpack.c.bf16 %v3339_v0, %v3339_v0  ;;  %v4186_v8 = vunpack.c.l.b16 %v4105_v36  ;;  %v4187_v62 = vunpack.c.l.b16 %v4106_v61 }
 0x313   : > { %v3272_v50 = vadd.f32 %v3234_v44, %v2926_v57  ;;  %v3653_v16 = vunpack.c.l.b16 %v3572_v4  ;;  %v4210_v22 = vpack.c.b16 %v4186_v8, %v4185_v1  ;;  %v4421_v44 = vld [vmem:[#allocation2 + $0xe0] sm:$0xff]  ;;  %v9623_v4 = vld [vmem:[#allocation6_spill] sm:$0xff] }
 0x314   : > { %v8964_v13 = vpop.f32.mrf.mxu1  ;;  %v4453_v21 = vpack.c.bf16 %v4421_v44, %v4421_v44  ;;  %v2236_v53 = vadd.f32 %v8886_v15, %v9623_v4  ;;  %v4077_v44 = vld [vmem:[#allocation2 + $0xe2] sm:$0xff] }
 0x315   : > { %v3308_v48 = vadd.f32 %v8918_v29, %v3272_v50  ;;  %v3670_v40 = vpack.c.b16 %v3653_v16, %v3652_v6  ;;  %v4188_v6 = vunpack.c.l.b16 %v4107_v51 }
 0x316   : > { %v2544_v33 = vpop.f32.mrf.mxu2  ;;  %v4534_v9 = vunpack.c.l.b16 %v4453_v21 }
 0x317   : > { %v3340_v28 = vmax.f32 %v3308_v48, 0.0  ;;  %v2581_v20 = vadd.f32 %v2544_v33, %v2234_v42  ;;  %v2890_v10 = vpop.f32.mrf.mxu3  ;;  %3814 = vmatmul.bf16.gmra.mxu1 %v3670_v40  ;;  %v4211_v8 = vpack.c.b16 %v4188_v6, %v4187_v62 }
 0x318   : > { %v3239_v27 = vpop.f32.mrf.mxu0  ;;  %v4557_v1 = vpack.c.b16 %v4534_v9, %v4533_v2  ;;  %v4425_v2 = vld [vmem:[#allocation2 + $0x110] sm:$0xff] }
 0x319   : > { %3427 = vst [vmem:[#allocation2 + $0x169] sm:$0xff] %v3340_v28  ;;  %v2927_v24 = vadd.f32 %v2890_v10, %v2581_v20  ;;  %v4750_v10 = vld [vmem:[#allocation2 + $0x19] sm:$0xff] }
 0x31b   : > { %v3273_v45 = vadd.f32 %v3236_v56, %v2927_v24  ;;  %4012 = vmatmul.bf16.gmra.mxu2 %v4555_v49  ;;  %4672 = vmatmul.bf16.gmra.mxu0 %v4556_v59  ;;  %v3573_v49 = vpack.c.bf16 %v3340_v28, %v3340_v28  ;;  %v4751_v28 = vld [vmem:[#allocation2 + $0x21] sm:$0xff] }
 0x31c   : > { %4326 = vmatmul.bf16.gmra.mxu3 %v4210_v22  ;;  %v8969_v47 = vpop.f32.mrf.mxu1  ;;  %v4423_v22 = vld [vmem:[#allocation2 + $0xf8] sm:$0xff] }
 0x31d   : > { %v3309_v38 = vadd.f32 %v8918_v29, %v3273_v45  ;;  %v3654_v57 = vunpack.c.l.b16 %v3573_v49  ;;  %v4455_v31 = vpack.c.bf16 %v4423_v22, %v4423_v22  ;;  %v7893_v49 = vld [vmem:[%s9612_s3 + $0x1b0] sm:$0xff] }
 0x31e   : > { %v2547_v25 = vpop.f32.mrf.mxu2  ;;  %5669 = vmatpush.bf16.msra.mxu3 %v7893_v49  ;;  %v7909_v22 = vld [vmem:[%s9612_s3 + $0x230] sm:$0xff] }
 0x31f   : > { %v3341_v41 = vmax.f32 %v3309_v38, 0.0  ;;  %v2582_v14 = vadd.f32 %v2547_v25, %v8702_v17  ;;  %v2893_v46 = vpop.f32.mrf.mxu3  ;;  %v4076_v25 = vld [vmem:[#allocation2 + $0xda] sm:$0xff]  ;;  %v4536_v18 = vunpack.c.l.b16 %v4455_v31  ;;  %6361 = vmatpush.bf16.msra.mxu1 %v7909_v22 }
 0x320   : > { %v3241_v19 = vpop.f32.mrf.mxu0 }
 0x321   : > { %3428 = vst [vmem:[#allocation2 + $0x171] sm:$0xff] %v3341_v41  ;;  %v2928_v0 = vadd.f32 %v2893_v46, %v2582_v14  ;;  %v3574_v39 = vpack.c.bf16 %v3341_v41, %v3341_v41  ;;  %v4782_v41 = vpack.c.bf16 %v4750_v10, %v4750_v10  ;;  %v4422_v46 = vld [vmem:[#allocation2 + $0xf0] sm:$0xff]  ;;  %v4424_v10 = vld [vmem:[#allocation2 + $0x108] sm:$0xff] }
 0x322   : > { %v4454_v43 = vpack.c.bf16 %v4422_v46, %v4422_v46 }
 0x323   : > { %v3274_v56 = vadd.f32 %v3239_v27, %v2928_v0  ;;  %v3655_v17 = vunpack.c.l.b16 %v3574_v39  ;;  %v4783_v27 = vpack.c.bf16 %v4751_v28, %v4751_v28  ;;  %v4863_v0 = vunpack.c.l.b16 %v4782_v41 }
 0x324   : > { %v8979_v54 = vpop.f32.mrf.mxu1  ;;  %v4535_v4 = vunpack.c.l.b16 %v4454_v43 }
 0x325   : > { %v3310_v3 = vadd.f32 %v8918_v29, %v3274_v56  ;;  %v3671_v36 = vpack.c.b16 %v3655_v17, %v3654_v57  ;;  %v4864_v58 = vunpack.c.l.b16 %v4783_v27  ;;  %v4457_v27 = vpack.c.bf16 %v4425_v2, %v4425_v2  ;;  %v7892_v2 = vld [vmem:[%s9612_s3 + $0x1a8] sm:$0xff] }
 0x326   : > { %v2549_v50 = vpop.f32.mrf.mxu2  ;;  %v4558_v9 = vpack.c.b16 %v4536_v18, %v4535_v4  ;;  %v4755_v18 = vld [vmem:[#allocation2 + $0x51] sm:$0xff]  ;;  %5670 = vmatpush.bf16.msra.mxu3 %v7892_v2 }
 0x327   : > { %v3342_v16 = vmax.f32 %v3310_v3, 0.0  ;;  %v2583_v42 = vadd.f32 %v2549_v50, %v2236_v53  ;;  %v2895_v48 = vpop.f32.mrf.mxu3  ;;  %3819 = vmatmul.bf16.gmra.mxu1 %v3671_v36  ;;  %v4895_v61 = vpack.c.b16 %v4864_v58, %v4863_v0  ;;  %v4753_v50 = vld [vmem:[#allocation2 + $0x39] sm:$0xff]  ;;  %v4538_v41 = vunpack.c.l.b16 %v4457_v27 }
 0x328   : > { %v4638_v40 = vpop.f32.mrf.mxu0 }
 0x329   : > { %3429 = vst [vmem:[#allocation2 + $0x181] sm:$0xff] %v3342_v16  ;;  %v2929_v33 = vadd.f32 %v2895_v48, %v2583_v42  ;;  %v4752_v16 = vld [vmem:[#allocation2 + $0x31] sm:$0xff]  ;;  %v4785_v42 = vpack.c.bf16 %v4753_v50, %v4753_v50 }
 0x32a   : > { %v4784_v28 = vpack.c.bf16 %v4752_v16, %v4752_v16  ;;  %v4426_v16 = vld [vmem:[#allocation2 + $0x120] sm:$0xff] }
 0x32b   : > { %v3275_v20 = vadd.f32 %v3241_v19, %v2929_v33  ;;  %4017 = vmatmul.bf16.gmra.mxu2 %v4556_v59  ;;  %4677 = vmatmul.bf16.gmra.mxu0 %v4557_v1  ;;  %v4108_v19 = vpack.c.bf16 %v4076_v25, %v4076_v25 }
 0x32c   : > { %4331 = vmatmul.bf16.gmra.mxu3 %v4211_v8  ;;  %v8984_v15 = vpop.f32.mrf.mxu1  ;;  %v4078_v8 = vld [vmem:[#allocation2 + $0xf2] sm:$0xff]  ;;  %v4865_v25 = vunpack.c.l.b16 %v4784_v28 }
 0x32d   : > { %v3311_v32 = vadd.f32 %v8918_v29, %v3275_v20  ;;  %v7885_v29 = vld [vmem:[%s9612_s3 + $0x170] sm:$0xff]  ;;  %v4189_v56 = vunpack.c.l.b16 %v4108_v19 }
 0x32e   : > { %v3978_v24 = vpop.f32.mrf.mxu2  ;;  %5322 = vmatpush.bf16.msra.mxu2 %v7885_v29 }
 0x32f   : > { %v3343_v45 = vmax.f32 %v3311_v32, 0.0  ;;  %v3979_v52 = vadd.f32 %v3978_v24, %v8890_v12  ;;  %v4292_v38 = vpop.f32.mrf.mxu3  ;;  %v4109_v12 = vpack.c.bf16 %v4077_v44, %v4077_v44  ;;  %v4866_v24 = vunpack.c.l.b16 %v4785_v42 }
 0x330   : > { %v4640_v14 = vpop.f32.mrf.mxu0 }
 0x331   : > { %3430 = vst [vmem:[#allocation2 + $0x189] sm:$0xff] %v3343_v45  ;;  %v4372_v59 = vadd.f32 %v4292_v38, %v3979_v52  ;;  %v4190_v11 = vunpack.c.l.b16 %v4109_v12  ;;  %v4110_v45 = vpack.c.bf16 %v4078_v8, %v4078_v8  ;;  %v4456_v38 = vpack.c.bf16 %v4424_v10, %v4424_v10 }
 0x333   : > { %v8994_v21 = vadd.f32 %v4638_v40, %v4372_v59  ;;  %v4212_v36 = vpack.c.b16 %v4190_v11, %v4189_v56  ;;  %v4191_v59 = vunpack.c.l.b16 %v4110_v45  ;;  %v4537_v49 = vunpack.c.l.b16 %v4456_v38  ;;  %v4754_v56 = vld [vmem:[#allocation2 + $0x49] sm:$0xff] }
 0x334   : > { %v8996_v39 = vpop.f32.mrf.mxu1  ;;  %v4787_v11 = vpack.c.bf16 %v4755_v18, %v4755_v18 }
 0x335   : > { %v4559_v43 = vpack.c.b16 %v4538_v41, %v4537_v49 }
 0x336   : > { %v3980_v51 = vpop.f32.mrf.mxu2  ;;  %v4868_v42 = vunpack.c.l.b16 %v4787_v11 }
 0x337   : > { %v3981_v57 = vadd.f32 %v3980_v51, %v8895_v60  ;;  %v4294_v17 = vpop.f32.mrf.mxu3  ;;  %4983 = vmatmul.bf16.vlgmr.msrb.gmra.mxu1 %v4895_v61  ;;  %v7901_v60 = vld [vmem:[%s9612_s3 + $0x1f0] sm:$0xff] }
 0x338   : > { %v4643_v53 = vpop.f32.mrf.mxu0  ;;  %6015 = vmatpush.bf16.msra.mxu0 %v7901_v60 }
 0x339   : > { %v4373_v3 = vadd.f32 %v4294_v17, %v3981_v57 }
 0x33b   : > { %4022 = vmatmul.bf16.gmra.mxu2 %v4557_v1  ;;  %4682 = vmatmul.bf16.gmra.mxu0 %v4558_v9  ;;  %v8999_v62 = vadd.f32 %v4640_v14, %v4373_v3  ;;  %v4079_v1 = vld [vmem:[#allocation2 + $0xfa] sm:$0xff]  ;;  %v9014_v14 = vpack.c.b16 %v4866_v24, %v4865_v25  ;;  %v4081_v3 = vld [vmem:[#allocation2 + $0x112] sm:$0xff] }
 0x33c   : > { %4336 = vmatmul.bf16.gmra.mxu3 %v4212_v36  ;;  %v9001_v6 = vpop.f32.mrf.mxu1  ;;  %v4111_v52 = vpack.c.bf16 %v4079_v1, %v4079_v1  ;;  %v4786_v36 = vpack.c.bf16 %v4754_v56, %v4754_v56  ;;  %v4082_v56 = vld [vmem:[#allocation2 + $0x122] sm:$0xff] }
 0x33e   : > { %v3983_v48 = vpop.f32.mrf.mxu2  ;;  %v4192_v31 = vunpack.c.l.b16 %v4111_v52  ;;  %v4867_v8 = vunpack.c.l.b16 %v4786_v36  ;;  %v4114_v36 = vpack.c.bf16 %v4082_v56, %v4082_v56 }
 0x33f   : > { %v3984_v40 = vadd.f32 %v3983_v48, %v8899_v5  ;;  %v4297_v33 = vpop.f32.mrf.mxu3  ;;  %v7884_v48 = vld [vmem:[%s9612_s3 + $0x168] sm:$0xff] }
 0x340   : > { %v4645_v20 = vpop.f32.mrf.mxu0  ;;  %v4213_v0 = vpack.c.b16 %v4192_v31, %v4191_v59  ;;  %5323 = vmatpush.bf16.msra.mxu2 %v7884_v48  ;;  %v9033_v10 = vpack.c.b16 %v4868_v42, %v4867_v8  ;;  %v4757_v59 = vld [vmem:[#allocation2 + $0x69] sm:$0xff] }
 0x341   : > { %v4374_v32 = vadd.f32 %v4297_v33, %v3984_v40  ;;  %v4113_v33 = vpack.c.bf16 %v4081_v3, %v4081_v3  ;;  %v4789_v49 = vpack.c.bf16 %v4757_v59, %v4757_v59  ;;  %v7908_v3 = vld [vmem:[%s9612_s3 + $0x228] sm:$0xff] }
 0x342   : > { %6362 = vmatpush.bf16.msra.mxu1 %v7908_v3 }
 0x343   : > { %v9010_v44 = vadd.f32 %v4643_v53, %v4374_v32  ;;  %v4080_v53 = vld [vmem:[#allocation2 + $0x10a] sm:$0xff]  ;;  %v4194_v24 = vunpack.c.l.b16 %v4113_v33 }
 0x344   : > { %v9012_v5 = vpop.f32.mrf.mxu1  ;;  %v4112_v40 = vpack.c.bf16 %v4080_v53, %v4080_v53  ;;  %v4870_v53 = vunpack.c.l.b16 %v4789_v49  ;;  %v4084_v49 = vld [vmem:[#allocation2 + $0x13a] sm:$0xff] }
 0x346   : > { %v3985_v46 = vpop.f32.mrf.mxu2  ;;  %v4193_v27 = vunpack.c.l.b16 %v4112_v40  ;;  %v4195_v40 = vunpack.c.l.b16 %v4114_v36 }
 0x347   : > { %v3986_v58 = vadd.f32 %v3985_v46, %v8907_v7  ;;  %v4299_v29 = vpop.f32.mrf.mxu3  ;;  %4988 = vmatmul.bf16.gmra.mxu1 %v9014_v14  ;;  %v4427_v7 = vld [vmem:[#allocation2 + $0x128] sm:$0xff] }
 0x348   : > { %v4648_v19 = vpop.f32.mrf.mxu0  ;;  %v4214_v46 = vpack.c.b16 %v4194_v24, %v4193_v27 }
 0x349   : > { %v4375_v12 = vadd.f32 %v4299_v29, %v3986_v58  ;;  %v4756_v29 = vld [vmem:[#allocation2 + $0x61] sm:$0xff] }
 0x34a   : > { %v4788_v11 = vpack.c.bf16 %v4756_v29, %v4756_v29 }
 0x34b   : > { %4027 = vmatmul.bf16.gmra.mxu2 %v4558_v9  ;;  %4687 = vmatmul.bf16.gmra.mxu0 %v4559_v43  ;;  %v9018_v61 = vadd.f32 %v4645_v20, %v4375_v12  ;;  %v4459_v9 = vpack.c.bf16 %v4427_v7, %v4427_v7  ;;  %v4429_v12 = vld [vmem:[#allocation2 + $0x140] sm:$0xff]  ;;  %v4428_v7 = vld [vmem:[#allocation2 + $0x138] sm:$0xff] }
 0x34c   : > { %4341 = vmatmul.bf16.gmra.mxu3 %v4213_v0  ;;  %v9020_v51 = vpop.f32.mrf.mxu1 }
 0x34d   : > { %v4540_v20 = vunpack.c.l.b16 %v4459_v9 }
 0x34e   : > { %v3988_v57 = vpop.f32.mrf.mxu2 }
 0x34f   : > { %v3989_v17 = vadd.f32 %v3988_v57, %v8911_v26  ;;  %v4302_v4 = vpop.f32.mrf.mxu3  ;;  %v4458_v26 = vpack.c.bf16 %v4426_v16, %v4426_v16  ;;  %v4460_v16 = vpack.c.bf16 %v4428_v7, %v4428_v7  ;;  %v4116_v7 = vpack.c.bf16 %v4084_v49, %v4084_v49 }
 0x350   : > { %v4650_v50 = vpop.f32.mrf.mxu0 }
 0x351   : > { %v4376_v60 = vadd.f32 %v4302_v4, %v3989_v17  ;;  %v4539_v52 = vunpack.c.l.b16 %v4458_v26  ;;  %v4461_v4 = vpack.c.bf16 %v4429_v12, %v4429_v12 }
 0x353   : > { %v9029_v1 = vadd.f32 %v4648_v19, %v4376_v60  ;;  %v4560_v41 = vpack.c.b16 %v4540_v20, %v4539_v52  ;;  %v4869_v60 = vunpack.c.l.b16 %v4788_v11  ;;  %v4542_v42 = vunpack.c.l.b16 %v4461_v4  ;;  %v7883_v11 = vld [vmem:[%s9612_s3 + $0x160] sm:$0xff] }
 0x354   : > { %v9031_v28 = vpop.f32.mrf.mxu1  ;;  %v4541_v20 = vunpack.c.l.b16 %v4460_v16  ;;  %5324 = vmatpush.bf16.msra.mxu2 %v7883_v11 }
 0x355   : > { %v9052_v48 = vpack.c.b16 %v4870_v53, %v4869_v60  ;;  %v4197_v60 = vunpack.c.l.b16 %v4116_v7  ;;  %v7907_v7 = vld [vmem:[%s9612_s3 + $0x220] sm:$0xff] }
 0x356   : > { %v3990_v32 = vpop.f32.mrf.mxu2  ;;  %v4561_v24 = vpack.c.b16 %v4542_v42, %v4541_v20  ;;  %6363 = vmatpush.bf16.msra.mxu1 %v7907_v7  ;;  %v4435_v7 = vld [vmem:[#allocation2 + $0x188] sm:$0xff] }
 0x357   : > { %v3991_v22 = vadd.f32 %v3990_v32, %v8921_v34  ;;  %v4304_v45 = vpop.f32.mrf.mxu3  ;;  %4993 = vmatmul.bf16.gmra.mxu1 %v9033_v10  ;;  %v7900_v34 = vld [vmem:[%s9612_s3 + $0x1e8] sm:$0xff] }
 0x358   : > { %v4653_v38 = vpop.f32.mrf.mxu0  ;;  %6016 = vmatpush.bf16.msra.mxu0 %v7900_v34 }
 0x359   : > { %v4377_v25 = vadd.f32 %v4304_v45, %v3991_v22  ;;  %v4759_v45 = vld [vmem:[#allocation2 + $0x81] sm:$0xff] }
 0x35b   : > { %4032 = vmatmul.bf16.gmra.mxu2 %v4559_v43  ;;  %4692 = vmatmul.bf16.gmra.mxu0 %v4560_v41  ;;  %v9037_v31 = vadd.f32 %v4650_v50, %v4377_v25  ;;  %v4083_v43 = vld [vmem:[#allocation2 + $0x12a] sm:$0xff]  ;;  %v4758_v25 = vld [vmem:[#allocation2 + $0x79] sm:$0xff] }
 0x35c   : > { %4346 = vmatmul.bf16.gmra.mxu3 %v4214_v46  ;;  %v9039_v58 = vpop.f32.mrf.mxu1  ;;  %v4115_v50 = vpack.c.bf16 %v4083_v43, %v4083_v43  ;;  %v4791_v46 = vpack.c.bf16 %v4759_v45, %v4759_v45  ;;  %v4790_v12 = vpack.c.bf16 %v4758_v25, %v4758_v25  ;;  %v4760_v45 = vld [vmem:[#allocation2 + $0x91] sm:$0xff] }
 0x35e   : > { %v3993_v19 = vpop.f32.mrf.mxu2  ;;  %v4196_v33 = vunpack.c.l.b16 %v4115_v50  ;;  %v4872_v43 = vunpack.c.l.b16 %v4791_v46  ;;  %v4871_v4 = vunpack.c.l.b16 %v4790_v12  ;;  %v7882_v46 = vld [vmem:[%s9612_s3 + $0x158] sm:$0xff] }
 0x35f   : > { %v3994_v0 = vadd.f32 %v3993_v19, %v8925_v37  ;;  %v4307_v18 = vpop.f32.mrf.mxu3  ;;  %v4085_v19 = vld [vmem:[#allocation2 + $0x142] sm:$0xff]  ;;  %5325 = vmatpush.bf16.msra.mxu2 %v7882_v46  ;;  %v4086_v12 = vld [vmem:[#allocation2 + $0x152] sm:$0xff] }
 0x360   : > { %v4655_v57 = vpop.f32.mrf.mxu0  ;;  %v4215_v22 = vpack.c.b16 %v4196_v33, %v4195_v40  ;;  %v9071_v50 = vpack.c.b16 %v4872_v43, %v4871_v4 }
 0x361   : > { %v4378_v17 = vadd.f32 %v4307_v18, %v3994_v0  ;;  %v4430_v18 = vld [vmem:[#allocation2 + $0x150] sm:$0xff] }
 0x363   : > { %v9048_v9 = vadd.f32 %v4653_v38, %v4378_v17  ;;  %v4117_v17 = vpack.c.bf16 %v4085_v19, %v4085_v19 }
 0x364   : > { %v9050_v37 = vpop.f32.mrf.mxu1 }
 0x365   : > { %v4198_v42 = vunpack.c.l.b16 %v4117_v17  ;;  %v7881_v17 = vld [vmem:[%s9612_s3 + $0x150] sm:$0xff] }
 0x366   : > { %v3995_v2 = vpop.f32.mrf.mxu2  ;;  %5326 = vmatpush.bf16.msra.mxu2 %v7881_v17 }
 0x367   : > { %v3996_v26 = vadd.f32 %v3995_v2, %v8933_v55  ;;  %v4309_v8 = vpop.f32.mrf.mxu3  ;;  %4998 = vmatmul.bf16.gmra.mxu1 %v9052_v48  ;;  %v4431_v55 = vld [vmem:[#allocation2 + $0x158] sm:$0xff] }
 0x368   : > { %v4658_v32 = vpop.f32.mrf.mxu0 }
 0x369   : > { %v4379_v27 = vadd.f32 %v4309_v8, %v3996_v26 }
 0x36b   : > { %4037 = vmatmul.bf16.gmra.mxu2 %v4560_v41  ;;  %4697 = vmatmul.bf16.gmra.mxu0 %v4561_v24  ;;  %v9056_v52 = vadd.f32 %v4655_v57, %v4379_v27  ;;  %v4463_v41 = vpack.c.bf16 %v4431_v55, %v4431_v55  ;;  %v7891_v57 = vld [vmem:[%s9612_s3 + $0x1a0] sm:$0xff]  ;;  %v4216_v27 = vpack.c.b16 %v4198_v42, %v4197_v60  ;;  %v7880_v42 = vld [vmem:[%s9612_s3 + $0x148] sm:$0xff] }
 0x36c   : > { %4351 = vmatmul.bf16.gmra.mxu3 %v4215_v22  ;;  %v9058_v38 = vpop.f32.mrf.mxu1  ;;  %v4761_v22 = vld [vmem:[#allocation2 + $0x99] sm:$0xff]  ;;  %5327 = vmatpush.bf16.msra.mxu2 %v7880_v42 }
 0x36d   : > { %5671 = vmatpush.bf16.msra.mxu3 %v7891_v57  ;;  %v4544_v36 = vunpack.c.l.b16 %v4463_v41  ;;  %v4793_v55 = vpack.c.bf16 %v4761_v22, %v4761_v22  ;;  %v4432_v41 = vld [vmem:[#allocation2 + $0x168] sm:$0xff] }
 0x36e   : > { %v3998_v59 = vpop.f32.mrf.mxu2 }
 0x36f   : > { %v3999_v29 = vadd.f32 %v3998_v59, %v8937_v23  ;;  %v4312_v34 = vpop.f32.mrf.mxu3  ;;  %v4462_v23 = vpack.c.bf16 %v4430_v18, %v4430_v18  ;;  %v7890_v59 = vld [vmem:[%s9612_s3 + $0x198] sm:$0xff]  ;;  %v4792_v18 = vpack.c.bf16 %v4760_v45, %v4760_v45  ;;  %v4874_v57 = vunpack.c.l.b16 %v4793_v55 }
 0x370   : > { %v4660_v0 = vpop.f32.mrf.mxu0 }
 0x371   : > { %v4380_v56 = vadd.f32 %v4312_v34, %v3999_v29  ;;  %v4543_v33 = vunpack.c.l.b16 %v4462_v23  ;;  %v4433_v34 = vld [vmem:[#allocation2 + $0x170] sm:$0xff]  ;;  %5672 = vmatpush.bf16.msra.mxu3 %v7890_v59  ;;  %v4118_v23 = vpack.c.bf16 %v4086_v12, %v4086_v12  ;;  %v4873_v60 = vunpack.c.l.b16 %v4792_v18 }
 0x372   : > { %v4465_v11 = vpack.c.bf16 %v4433_v34, %v4433_v34 }
 0x373   : > { %v9067_v53 = vadd.f32 %v4658_v32, %v4380_v56  ;;  %v9075_v20 = vpack.c.b16 %v4544_v36, %v4543_v33  ;;  %v7899_v32 = vld [vmem:[%s9612_s3 + $0x1e0] sm:$0xff]  ;;  %v7897_v36 = vld [vmem:[%s9612_s3 + $0x1d0] sm:$0xff]  ;;  %v7888_v33 = vld [vmem:[%s9612_s3 + $0x188] sm:$0xff]  ;;  %v4199_v45 = vunpack.c.l.b16 %v4118_v23 }
 0x374   : > { %v9069_v3 = vpop.f32.mrf.mxu1  ;;  %6017 = vmatpush.bf16.msra.mxu0 %v7899_v32  ;;  %v4546_v32 = vunpack.c.l.b16 %v4465_v11  ;;  %v4088_v23 = vld [vmem:[#allocation2 + $0x16a] sm:$0xff] }
 0x376   : > { %v4000_v16 = vpop.f32.mrf.mxu2 }
 0x377   : > { %v4001_v2 = vadd.f32 %v4000_v16, %v8942_v63  ;;  %v4314_v40 = vpop.f32.mrf.mxu3  ;;  %5003 = vmatmul.bf16.gmra.mxu1 %v9071_v50  ;;  %v4464_v16 = vpack.c.bf16 %v4432_v41, %v4432_v41 }
 0x378   : > { %v4663_v26 = vpop.f32.mrf.mxu0 }
 0x379   : > { %v4381_v8 = vadd.f32 %v4314_v40, %v4001_v2 }
 0x37b   : > { %4042 = vmatmul.bf16.gmra.mxu2 %v4561_v24  ;;  %4702 = vmatmul.bf16.gmra.mxu0 %v9075_v20  ;;  %v9081_v25 = vadd.f32 %v4660_v0, %v4381_v8  ;;  %v7898_v24 = vld [vmem:[%s9612_s3 + $0x1d8] sm:$0xff]  ;;  %v7896_v8 = vld [vmem:[%s9612_s3 + $0x1c8] sm:$0xff] }
 0x37c   : > { %4356 = vmatmul.bf16.gmra.mxu3 %v4216_v27  ;;  %v9083_v63 = vpop.f32.mrf.mxu1  ;;  %v4087_v0 = vld [vmem:[#allocation2 + $0x15a] sm:$0xff]  ;;  %6018 = vmatpush.bf16.msra.mxu0 %v7898_v24  ;;  %v9120_v27 = vpack.c.b16 %v4874_v57, %v4873_v60  ;;  %v4545_v24 = vunpack.c.l.b16 %v4464_v16  ;;  %v4467_v60 = vpack.c.bf16 %v4435_v7, %v4435_v7 }
 0x37d   : > { %v4119_v4 = vpack.c.bf16 %v4087_v0, %v4087_v0  ;;  %v4763_v0 = vld [vmem:[#allocation2 + $0xb1] sm:$0xff]  ;;  %v4434_v16 = vld [vmem:[#allocation2 + $0x180] sm:$0xff] }
 0x37e   : > { %v4003_v29 = vpop.f32.mrf.mxu2  ;;  %v4563_v34 = vpack.c.b16 %v4546_v32, %v4545_v24  ;;  %v4795_v11 = vpack.c.bf16 %v4763_v0, %v4763_v0  ;;  %v4466_v32 = vpack.c.bf16 %v4434_v16, %v4434_v16 }
 0x37f   : > { %v4004_v49 = vadd.f32 %v4003_v29, %v8946_v30  ;;  %v4317_v19 = vpop.f32.mrf.mxu3  ;;  %v7889_v30 = vld [vmem:[%s9612_s3 + $0x190] sm:$0xff]  ;;  %v4200_v46 = vunpack.c.l.b16 %v4119_v4 }
 0x380   : > { %v4665_v56 = vpop.f32.mrf.mxu0  ;;  %5673 = vmatpush.bf16.msra.mxu3 %v7889_v30  ;;  %6019 = vmatpush.bf16.msra.mxu0 %v7897_v36  ;;  %v4089_v4 = vld [vmem:[#allocation2 + $0x172] sm:$0xff]  ;;  %v4876_v42 = vunpack.c.l.b16 %v4795_v11 }
 0x381   : > { %v4382_v43 = vadd.f32 %v4317_v19, %v4004_v49  ;;  %v7879_v49 = vld [vmem:[%s9612_s3 + $0x140] sm:$0xff]  ;;  %v4217_v12 = vpack.c.b16 %v4200_v46, %v4199_v45 }
 0x382   : > { %v7887_v19 = vld [vmem:[%s9612_s3 + $0x180] sm:$0xff]  ;;  %5328 = vmatpush.bf16.msra.mxu2 %v7879_v49 }
 0x383   : > { %v9110_v2 = vadd.f32 %v4663_v26, %v4382_v43  ;;  %v4762_v43 = vld [vmem:[#allocation2 + $0xa9] sm:$0xff] }
 0x384   : > { %v9112_v40 = vpop.f32.mrf.mxu1  ;;  %5674 = vmatpush.bf16.msra.mxu3 %v7888_v33  ;;  %6020 = vmatpush.bf16.msra.mxu0 %v7896_v8  ;;  %v4794_v36 = vpack.c.bf16 %v4762_v43, %v4762_v43  ;;  %v4120_v33 = vpack.c.bf16 %v4088_v23, %v4088_v23  ;;  %v4121_v8 = vpack.c.bf16 %v4089_v4, %v4089_v4  ;;  %v5097_v4 = vld [vmem:[#allocation2 + $0x22] sm:$0xff] }
 0x386   : > { %v4005_v22 = vpop.f32.mrf.mxu2  ;;  %v4201_v24 = vunpack.c.l.b16 %v4120_v33 }
 0x387   : > { %v4006_v26 = vadd.f32 %v4005_v22, %v8954_v35  ;;  %v4319_v59 = vpop.f32.mrf.mxu3  ;;  %5008 = vmatmul.bf16.gmra.mxu1 %v9120_v27  ;;  %v7895_v35 = vld [vmem:[%s9612_s3 + $0x1c0] sm:$0xff]  ;;  %v4875_v22 = vunpack.c.l.b16 %v4794_v36 }
 0x388   : > { %v4668_v55 = vpop.f32.mrf.mxu0  ;;  %5675 = vmatpush.bf16.msra.mxu3 %v7887_v19  ;;  %6021 = vmatpush.bf16.msra.mxu0 %v7895_v35  ;;  %v4547_v35 = vunpack.c.l.b16 %v4466_v32  ;;  %v5443_v32 = vld [vmem:[#allocation2 + $0x30] sm:$0xff] }
 0x389   : > { %v4383_v29 = vadd.f32 %v4319_v59, %v4006_v26  ;;  %v4548_v26 = vunpack.c.l.b16 %v4467_v60  ;;  %v9143_v59 = vpack.c.b16 %v4876_v42, %v4875_v22  ;;  %v7906_v22 = vld [vmem:[%s9612_s3 + $0x218] sm:$0xff] }
 0x38a   : > { %6364 = vmatpush.bf16.msra.mxu1 %v7906_v22 }
 0x38b   : > { %4047 = vmatmul.bf16.gmra.mxu2 %v9075_v20  ;;  %4707 = vmatmul.bf16.gmra.mxu0 %v4563_v34  ;;  %v9134_v18 = vadd.f32 %v4665_v56, %v4383_v29  ;;  %v4202_v29 = vunpack.c.l.b16 %v4121_v8  ;;  %v4564_v43 = vpack.c.b16 %v4548_v26, %v4547_v35 }
 0x38c   : > { %4361 = vmatmul.bf16.gmra.mxu3 %v4217_v12  ;;  %v9136_v41 = vpop.f32.mrf.mxu1 }
 0x38d   : > { %v4218_v11 = vpack.c.b16 %v4202_v29, %v4201_v24  ;;  %v5475_v29 = vpack.c.bf16 %v5443_v32, %v5443_v32 }
 0x38e   : > { %v4008_v57 = vpop.f32.mrf.mxu2 }
 0x38f   : > { %v4009_v17 = vadd.f32 %v4008_v57, %v8964_v13  ;;  %v4322_v30 = vpop.f32.mrf.mxu3 }
 0x390   : > { %v4670_v20 = vpop.f32.mrf.mxu0 }
 0x391   : > { %v4384_v56 = vadd.f32 %v4322_v30, %v4009_v17  ;;  %v4764_v17 = vld [vmem:[#allocation2 + $0xc1] sm:$0xff] }
 0x392   : > { %v4796_v60 = vpack.c.bf16 %v4764_v17, %v4764_v17 }
 0x393   : > { %v9139_v45 = vadd.f32 %v4668_v55, %v4384_v56  ;;  %v4765_v55 = vld [vmem:[#allocation2 + $0xc9] sm:$0xff]  ;;  %v5444_v56 = vld [vmem:[#allocation2 + $0x38] sm:$0xff] }
 0x394   : > { %v9141_v46 = vpop.f32.mrf.mxu1  ;;  %v4797_v30 = vpack.c.bf16 %v4765_v55, %v4765_v55  ;;  %v5476_v26 = vpack.c.bf16 %v5444_v56, %v5444_v56  ;;  %v4766_v56 = vld [vmem:[#allocation2 + $0xd9] sm:$0xff] }
 0x395   : > { %v4798_v22 = vpack.c.bf16 %v4766_v56, %v4766_v56 }
 0x396   : > { %v4010_v13 = vpop.f32.mrf.mxu2 }
 0x397   : > { %v4011_v49 = vadd.f32 %v4010_v13, %v8969_v47  ;;  %v4324_v19 = vpop.f32.mrf.mxu3  ;;  %5013 = vmatmul.bf16.gmra.mxu1 %v9143_v59  ;;  %v5096_v47 = vld [vmem:[#allocation2 + $0x1a] sm:$0xff]  ;;  %v4877_v13 = vunpack.c.l.b16 %v4796_v60 }
 0x398   : > { %v4673_v12 = vpop.f32.mrf.mxu0  ;;  %v5128_v8 = vpack.c.bf16 %v5096_v47, %v5096_v47 }
 0x399   : > { %v4385_v0 = vadd.f32 %v4324_v19, %v4011_v49 }
 0x39a   : > { %v5209_v49 = vunpack.c.l.b16 %v5128_v8  ;;  %v5099_v8 = vld [vmem:[#allocation2 + $0x3a] sm:$0xff] }
 0x39b   : > { %4052 = vmatmul.bf16.gmra.mxu2 %v4563_v34  ;;  %4712 = vmatmul.bf16.gmra.mxu0 %v4564_v43  ;;  %v9147_v57 = vadd.f32 %v4670_v20, %v4385_v0  ;;  %v5129_v34 = vpack.c.bf16 %v5097_v4, %v5097_v4  ;;  %v4878_v20 = vunpack.c.l.b16 %v4797_v30  ;;  %v5557_v43 = vunpack.c.l.b16 %v5476_v26  ;;  %v4767_v4 = vld [vmem:[#allocation2 + $0xe1] sm:$0xff] }
 0x39c   : > { %4366 = vmatmul.bf16.gmra.mxu3 %v4218_v11  ;;  %v9149_v7 = vpop.f32.mrf.mxu1  ;;  %v5556_v30 = vunpack.c.l.b16 %v5475_v29  ;;  %v4799_v60 = vpack.c.bf16 %v4767_v4, %v4767_v4 }
 0x39d   : > { %v5210_v19 = vunpack.c.l.b16 %v5129_v34  ;;  %v9159_v35 = vpack.c.b16 %v4878_v20, %v4877_v13  ;;  %v5446_v20 = vld [vmem:[#allocation2 + $0x50] sm:$0xff] }
 0x39e   : > { %v4013_v23 = vpop.f32.mrf.mxu2 }
 0x39f   : > { %v4014_v36 = vadd.f32 %v4013_v23, %v8979_v54  ;;  %v4327_v16 = vpop.f32.mrf.mxu3  ;;  %v5241_v47 = vpack.c.b16 %v5210_v19, %v5209_v49  ;;  %v5131_v49 = vpack.c.bf16 %v5099_v8, %v5099_v8  ;;  %v5478_v19 = vpack.c.bf16 %v5446_v20, %v5446_v20 }
 0x3a0   : > { %v4675_v42 = vpop.f32.mrf.mxu0 }
 0x3a1   : > { %v4386_v33 = vadd.f32 %v4327_v16, %v4014_v36  ;;  %v5559_v4 = vunpack.c.l.b16 %v5478_v19 }
 0x3a3   : > { %v9155_v24 = vadd.f32 %v4673_v12, %v4386_v33  ;;  %v5588_v12 = vpack.c.b16 %v5557_v43, %v5556_v30  ;;  %v5098_v33 = vld [vmem:[#allocation2 + $0x32] sm:$0xff] }
 0x3a4   : > { %v9157_v54 = vpop.f32.mrf.mxu1  ;;  %v5130_v29 = vpack.c.bf16 %v5098_v33, %v5098_v33 }
 0x3a6   : > { %v4015_v0 = vpop.f32.mrf.mxu2  ;;  %v5211_v30 = vunpack.c.l.b16 %v5130_v29 }
 0x3a7   : > { %v4016_v11 = vadd.f32 %v4015_v0, %v8984_v15  ;;  %v4329_v55 = vpop.f32.mrf.mxu3  ;;  %5018 = vmatmul.bf16.gmra.mxu1 %v9159_v35  ;;  %v4879_v0 = vunpack.c.l.b16 %v4798_v22  ;;  %v4768_v22 = vld [vmem:[#allocation2 + $0xf1] sm:$0xff] }
 0x3a8   : > { %v4678_v17 = vpop.f32.mrf.mxu0 }
 0x3a9   : > { %v4387_v23 = vadd.f32 %v4329_v55, %v4016_v11 }
 0x3ab   : > { %5329 = vmatmul.bf16.vlgmr.msra.gmra.mxu2 %v5241_v47  ;;  %6022 = vmatmul.bf16.vlgmr.msra.gmra.mxu0 %v9014_v14  ;;  %v9164_v36 = vadd.f32 %v4675_v42, %v4387_v23  ;;  %v5445_v14 = vld [vmem:[#allocation2 + $0x48] sm:$0xff]  ;;  %v4880_v42 = vunpack.c.l.b16 %v4799_v60  ;;  %v5212_v23 = vunpack.c.l.b16 %v5131_v49 }
 0x3ac   : > { %5676 = vmatmul.bf16.vlgmr.msra.gmra.mxu3 %v5588_v12  ;;  %v9166_v16 = vpop.f32.mrf.mxu1  ;;  %v5477_v11 = vpack.c.bf16 %v5445_v14, %v5445_v14  ;;  %v5100_v49 = vld [vmem:[#allocation2 + $0x4a] sm:$0xff]  ;;  %v5101_v14 = vld [vmem:[#allocation2 + $0x52] sm:$0xff] }
 0x3ad   : > { %v9178_v8 = vpack.c.b16 %v5212_v23, %v5211_v30  ;;  %v5447_v23 = vld [vmem:[#allocation2 + $0x60] sm:$0xff] }
 0x3ae   : > { %v4018_v15 = vpop.f32.mrf.mxu2  ;;  %v5558_v33 = vunpack.c.l.b16 %v5477_v11  ;;  %v4800_v11 = vpack.c.bf16 %v4768_v22, %v4768_v22 }
 0x3af   : > { %v4019_v34 = vadd.f32 %v4018_v15, %v8996_v39  ;;  %v4332_v32 = vpop.f32.mrf.mxu3  ;;  %v9174_v39 = vpack.c.b16 %v4880_v42, %v4879_v0  ;;  %v5448_v0 = vld [vmem:[#allocation2 + $0x68] sm:$0xff] }
 0x3b0   : > { %v4680_v26 = vpop.f32.mrf.mxu0 }
 0x3b1   : > { %v4388_v13 = vadd.f32 %v4332_v32, %v4019_v34  ;;  %v5589_v34 = vpack.c.b16 %v5559_v4, %v5558_v33  ;;  %v4769_v32 = vld [vmem:[#allocation2 + $0xf9] sm:$0xff]  ;;  %v5480_v4 = vpack.c.bf16 %v5448_v0, %v5448_v0  ;;  %v5479_v33 = vpack.c.bf16 %v5447_v23, %v5447_v23 }
 0x3b3   : > { %v9169_v43 = vadd.f32 %v4678_v17, %v4388_v13  ;;  %v4801_v13 = vpack.c.bf16 %v4769_v32, %v4769_v32 }
 0x3b4   : > { %v4984_v55 = vpop.f32.mrf.mxu1 }
 0x3b5   : > { %v9172_v47 = vadd.f32 %v4984_v55, %v8994_v21 }
 0x3b6   : > { %v4020_v12 = vpop.f32.mrf.mxu2 }
 0x3b7   : > { %v4021_v56 = vadd.f32 %v4020_v12, %v9001_v6  ;;  %v4334_v15 = vpop.f32.mrf.mxu3  ;;  %5023 = vmatmul.bf16.gmra.mxu1 %v9174_v39  ;;  %v4882_v12 = vunpack.c.l.b16 %v4801_v13  ;;  %v5561_v13 = vunpack.c.l.b16 %v5480_v4 }
 0x3b8   : > { %v4683_v60 = vpop.f32.mrf.mxu0 }
 0x3b9   : > { %v4389_v17 = vadd.f32 %v4334_v15, %v4021_v56  ;;  %v4881_v56 = vunpack.c.l.b16 %v4800_v11  ;;  %v4771_v11 = vld [vmem:[#allocation2 + $0x111] sm:$0xff] }
 0x3bb   : > { %5334 = vmatmul.bf16.gmra.mxu2 %v9178_v8  ;;  %6027 = vmatmul.bf16.gmra.mxu0 %v9033_v10  ;;  %v9182_v21 = vadd.f32 %v4680_v26, %v4389_v17  ;;  %v5132_v10 = vpack.c.bf16 %v5100_v49, %v5100_v49  ;;  %v5133_v26 = vpack.c.bf16 %v5101_v14, %v5101_v14 }
 0x3bc   : > { %5681 = vmatmul.bf16.gmra.mxu3 %v5589_v34  ;;  %v4986_v20 = vpop.f32.mrf.mxu1 }
 0x3bd   : > { %v9185_v6 = vadd.f32 %v4986_v20, %v8999_v62  ;;  %v7905_v62 = vld [vmem:[%s9612_s3 + $0x210] sm:$0xff]  ;;  %v5213_v17 = vunpack.c.l.b16 %v5132_v10  ;;  %v5214_v34 = vunpack.c.l.b16 %v5133_v26  ;;  %v9196_v20 = vpack.c.b16 %v4882_v12, %v4881_v56  ;;  %v5102_v12 = vld [vmem:[#allocation2 + $0x62] sm:$0xff] }
 0x3be   : > { %v4023_v29 = vpop.f32.mrf.mxu2  ;;  %6365 = vmatpush.bf16.msra.mxu1 %v7905_v62  ;;  %v4770_v10 = vld [vmem:[#allocation2 + $0x109] sm:$0xff]  ;;  %v4803_v26 = vpack.c.bf16 %v4771_v11, %v4771_v11 }
 0x3bf   : > { %v4024_v42 = vadd.f32 %v4023_v29, %v9012_v5  ;;  %v4337_v19 = vpop.f32.mrf.mxu3  ;;  %v5103_v62 = vld [vmem:[#allocation2 + $0x6a] sm:$0xff] }
 0x3c0   : > { %v4685_v55 = vpop.f32.mrf.mxu0 }
 0x3c1   : > { %v4390_v30 = vadd.f32 %v4337_v19, %v4024_v42  ;;  %v5560_v42 = vunpack.c.l.b16 %v5479_v33  ;;  %v9200_v19 = vpack.c.b16 %v5214_v34, %v5213_v17  ;;  %v5450_v33 = vld [vmem:[#allocation2 + $0x80] sm:$0xff] }
 0x3c3   : > { %v9191_v15 = vadd.f32 %v4683_v60, %v4390_v30  ;;  %v5590_v0 = vpack.c.b16 %v5561_v13, %v5560_v42  ;;  %v4884_v13 = vunpack.c.l.b16 %v4803_v26 }
 0x3c4   : > { %v4989_v5 = vpop.f32.mrf.mxu1 }
 0x3c5   : > { %v9194_v32 = vadd.f32 %v4989_v5, %v9010_v44  ;;  %v4802_v5 = vpack.c.bf16 %v4770_v10, %v4770_v10 }
 0x3c6   : > { %v4025_v22 = vpop.f32.mrf.mxu2 }
 0x3c7   : > { %v4026_v29 = vadd.f32 %v4025_v22, %v9020_v51  ;;  %v4339_v49 = vpop.f32.mrf.mxu3  ;;  %5028 = vmatmul.bf16.gmra.mxu1 %v9196_v20  ;;  %v5449_v22 = vld [vmem:[#allocation2 + $0x78] sm:$0xff] }
 0x3c8   : > { %v4688_v14 = vpop.f32.mrf.mxu0 }
 0x3c9   : > { %v4391_v60 = vadd.f32 %v4339_v49, %v4026_v29  ;;  %v5482_v29 = vpack.c.bf16 %v5450_v33, %v5450_v33  ;;  %v4883_v49 = vunpack.c.l.b16 %v4802_v5  ;;  %v4773_v5 = vld [vmem:[#allocation2 + $0x129] sm:$0xff] }
 0x3cb   : > { %5339 = vmatmul.bf16.gmra.mxu2 %v9200_v19  ;;  %6032 = vmatmul.bf16.gmra.mxu0 %v9052_v48  ;;  %v9204_v44 = vadd.f32 %v4685_v55, %v4391_v60  ;;  %v5134_v48 = vpack.c.bf16 %v5102_v12, %v5102_v12  ;;  %v5135_v55 = vpack.c.bf16 %v5103_v62, %v5103_v62 }
 0x3cc   : > { %5686 = vmatmul.bf16.gmra.mxu3 %v5590_v0  ;;  %v4991_v30 = vpop.f32.mrf.mxu1 }
 0x3cd   : > { %v9207_v51 = vadd.f32 %v4991_v30, %v9018_v61  ;;  %v5481_v61 = vpack.c.bf16 %v5449_v22, %v5449_v22  ;;  %v5215_v0 = vunpack.c.l.b16 %v5134_v48  ;;  %v5216_v11 = vunpack.c.l.b16 %v5135_v55  ;;  %v4772_v48 = vld [vmem:[#allocation2 + $0x121] sm:$0xff] }
 0x3ce   : > { %v4028_v23 = vpop.f32.mrf.mxu2  ;;  %v4805_v55 = vpack.c.bf16 %v4773_v5, %v4773_v5 }
 0x3cf   : > { %v4029_v4 = vadd.f32 %v4028_v23, %v9031_v28  ;;  %v4342_v56 = vpop.f32.mrf.mxu3  ;;  %v9215_v28 = vpack.c.b16 %v4884_v13, %v4883_v49  ;;  %v5563_v23 = vunpack.c.l.b16 %v5482_v29  ;;  %v5104_v13 = vld [vmem:[#allocation2 + $0x7a] sm:$0xff]  ;;  %v5105_v29 = vld [vmem:[#allocation2 + $0x82] sm:$0xff] }
 0x3d0   : > { %v4690_v17 = vpop.f32.mrf.mxu0 }
 0x3d1   : > { %v4392_v34 = vadd.f32 %v4342_v56, %v4029_v4  ;;  %v5562_v4 = vunpack.c.l.b16 %v5481_v61  ;;  %v9219_v56 = vpack.c.b16 %v5216_v11, %v5215_v0  ;;  %v4804_v0 = vpack.c.bf16 %v4772_v48, %v4772_v48 }
 0x3d3   : > { %v9210_v42 = vadd.f32 %v4688_v14, %v4392_v34  ;;  %v5591_v33 = vpack.c.b16 %v5563_v23, %v5562_v4  ;;  %v5451_v23 = vld [vmem:[#allocation2 + $0x90] sm:$0xff]  ;;  %v4885_v4 = vunpack.c.l.b16 %v4804_v0 }
 0x3d4   : > { %v4994_v60 = vpop.f32.mrf.mxu1 }
 0x3d5   : > { %v9213_v30 = vadd.f32 %v4994_v60, %v9029_v1  ;;  %v5452_v60 = vld [vmem:[#allocation2 + $0x98] sm:$0xff] }
 0x3d6   : > { %v4030_v10 = vpop.f32.mrf.mxu2 }
 0x3d7   : > { %v4031_v12 = vadd.f32 %v4030_v10, %v9039_v58  ;;  %v4344_v62 = vpop.f32.mrf.mxu3  ;;  %5033 = vmatmul.bf16.gmra.mxu1 %v9215_v28 }
 0x3d8   : > { %v4693_v26 = vpop.f32.mrf.mxu0 }
 0x3d9   : > { %v4393_v14 = vadd.f32 %v4344_v62, %v4031_v12  ;;  %v4886_v12 = vunpack.c.l.b16 %v4805_v55  ;;  %v5484_v62 = vpack.c.bf16 %v5452_v60, %v5452_v60 }
 0x3db   : > { %5344 = vmatmul.bf16.gmra.mxu2 %v9219_v56  ;;  %6037 = vmatmul.bf16.gmra.mxu0 %v9071_v50  ;;  %v9223_v1 = vadd.f32 %v4690_v17, %v4393_v14  ;;  %v5136_v50 = vpack.c.bf16 %v5104_v13, %v5104_v13  ;;  %v5137_v17 = vpack.c.bf16 %v5105_v29, %v5105_v29  ;;  %v5565_v55 = vunpack.c.l.b16 %v5484_v62  ;;  %v5106_v62 = vld [vmem:[#allocation2 + $0x92] sm:$0xff] }
 0x3dc   : > { %5691 = vmatmul.bf16.gmra.mxu3 %v5591_v33  ;;  %v4996_v34 = vpop.f32.mrf.mxu1  ;;  %v5483_v33 = vpack.c.bf16 %v5451_v23, %v5451_v23  ;;  %v4774_v23 = vld [vmem:[#allocation2 + $0x139] sm:$0xff] }
 0x3dd   : > { %v9226_v58 = vadd.f32 %v4996_v34, %v9037_v31  ;;  %v7904_v31 = vld [vmem:[%s9612_s3 + $0x208] sm:$0xff]  ;;  %v5217_v5 = vunpack.c.l.b16 %v5136_v50  ;;  %v5218_v34 = vunpack.c.l.b16 %v5137_v17 }
 0x3de   : > { %v4033_v22 = vpop.f32.mrf.mxu2  ;;  %6366 = vmatpush.bf16.msra.mxu1 %v7904_v31  ;;  %v5564_v60 = vunpack.c.l.b16 %v5483_v33  ;;  %v4775_v50 = vld [vmem:[#allocation2 + $0x141] sm:$0xff] }
 0x3df   : > { %v4034_v49 = vadd.f32 %v4033_v22, %v9050_v37  ;;  %v4347_v61 = vpop.f32.mrf.mxu3  ;;  %v9237_v22 = vpack.c.b16 %v4886_v12, %v4885_v4  ;;  %v9241_v0 = vpack.c.b16 %v5218_v34, %v5217_v5  ;;  %v4807_v12 = vpack.c.bf16 %v4775_v50, %v4775_v50  ;;  %v5107_v4 = vld [vmem:[#allocation2 + $0x9a] sm:$0xff]  ;;  %v5454_v5 = vld [vmem:[#allocation2 + $0xb0] sm:$0xff] }
 0x3e0   : > { %v4695_v11 = vpop.f32.mrf.mxu0  ;;  %v4806_v34 = vpack.c.bf16 %v4774_v23, %v4774_v23 }
 0x3e1   : > { %v4394_v10 = vadd.f32 %v4347_v61, %v4034_v49  ;;  %9624 = vst [vmem:[#allocation4_spill] sm:$0xff] %v9241_v0 }
 0x3e3   : > { %v9232_v14 = vadd.f32 %v4693_v26, %v4394_v10  ;;  %v5592_v10 = vpack.c.b16 %v5565_v55, %v5564_v60  ;;  %v5486_v60 = vpack.c.bf16 %v5454_v5, %v5454_v5 }
 0x3e4   : > { %v4999_v37 = vpop.f32.mrf.mxu1 }
 0x3e5   : > { %v9235_v48 = vadd.f32 %v4999_v37, %v9048_v9 }
 0x3e6   : > { %v4035_v13 = vpop.f32.mrf.mxu2 }
 0x3e7   : > { %v4036_v29 = vadd.f32 %v4035_v13, %v9058_v38  ;;  %v4349_v49 = vpop.f32.mrf.mxu3  ;;  %5038 = vmatmul.bf16.gmra.mxu1 %v9237_v22 }
 0x3e8   : > { %v4698_v61 = vpop.f32.mrf.mxu0 }
 0x3e9   : > { %v4395_v26 = vadd.f32 %v4349_v49, %v4036_v29  ;;  %v5453_v29 = vld [vmem:[#allocation2 + $0xa8] sm:$0xff]  ;;  %v4888_v49 = vunpack.c.l.b16 %v4807_v12 }
 0x3eb   : > { %5349 = vmatmul.bf16.gmra.mxu2 %v9241_v0  ;;  %6042 = vmatmul.bf16.gmra.mxu0 %v9120_v27  ;;  %v9245_v9 = vadd.f32 %v4695_v11, %v4395_v26  ;;  %v5138_v27 = vpack.c.bf16 %v5106_v62, %v5106_v62  ;;  %v5139_v11 = vpack.c.bf16 %v5107_v4, %v5107_v4  ;;  %v4887_v26 = vunpack.c.l.b16 %v4806_v34  ;;  %v4777_v34 = vld [vmem:[#allocation2 + $0x159] sm:$0xff] }
 0x3ec   : > { %5696 = vmatmul.bf16.gmra.mxu3 %v5592_v10  ;;  %v5001_v17 = vpop.f32.mrf.mxu1 }
 0x3ed   : > { %9625 = vst [vmem:[#allocation3_spill] sm:$0xff] %v9245_v9  ;;  %v9248_v38 = vadd.f32 %v5001_v17, %v9056_v52  ;;  %v5485_v52 = vpack.c.bf16 %v5453_v29, %v5453_v29  ;;  %v5219_v17 = vunpack.c.l.b16 %v5138_v27  ;;  %v5220_v9 = vunpack.c.l.b16 %v5139_v11  ;;  %v4776_v27 = vld [vmem:[#allocation2 + $0x151] sm:$0xff] }
 0x3ee   : > { %v4038_v31 = vpop.f32.mrf.mxu2  ;;  %v4809_v11 = vpack.c.bf16 %v4777_v34, %v4777_v34 }
 0x3ef   : > { %v4039_v33 = vadd.f32 %v4038_v31, %v9069_v3  ;;  %v4352_v37 = vpop.f32.mrf.mxu3  ;;  %v9256_v3 = vpack.c.b16 %v4888_v49, %v4887_v26  ;;  %v5567_v31 = vunpack.c.l.b16 %v5486_v60  ;;  %v5108_v49 = vld [vmem:[#allocation2 + $0xaa] sm:$0xff]  ;;  %v5109_v60 = vld [vmem:[#allocation2 + $0xb2] sm:$0xff] }
 0x3f0   : > { %v4700_v13 = vpop.f32.mrf.mxu0 }
 0x3f1   : > { %v4396_v55 = vadd.f32 %v4352_v37, %v4039_v33  ;;  %v5566_v33 = vunpack.c.l.b16 %v5485_v52  ;;  %v9260_v37 = vpack.c.b16 %v5220_v9, %v5219_v17  ;;  %v5456_v52 = vld [vmem:[#allocation2 + $0xc8] sm:$0xff] }
 0x3f3   : > { %v9251_v10 = vadd.f32 %v4698_v61, %v4396_v55  ;;  %v5593_v5 = vpack.c.b16 %v5567_v31, %v5566_v33  ;;  %v5455_v31 = vld [vmem:[#allocation2 + $0xc0] sm:$0xff] }
 0x3f4   : > { %v5004_v50 = vpop.f32.mrf.mxu1 }
 0x3f5   : > { %v9254_v0 = vadd.f32 %v5004_v50, %v9067_v53  ;;  %v4808_v50 = vpack.c.bf16 %v4776_v27, %v4776_v27 }
 0x3f6   : > { %v4040_v23 = vpop.f32.mrf.mxu2 }
 0x3f7   : > { %v4041_v62 = vadd.f32 %v4040_v23, %v9083_v63  ;;  %v4354_v4 = vpop.f32.mrf.mxu3  ;;  %5043 = vmatmul.bf16.gmra.mxu1 %v9256_v3  ;;  %v4889_v33 = vunpack.c.l.b16 %v4808_v50 }
 0x3f8   : > { %v4703_v12 = vpop.f32.mrf.mxu0 }
 0x3f9   : > { %v4397_v61 = vadd.f32 %v4354_v4, %v4041_v62  ;;  %v4890_v62 = vunpack.c.l.b16 %v4809_v11  ;;  %v5488_v4 = vpack.c.bf16 %v5456_v52, %v5456_v52 }
 0x3fb   : > { %5354 = vmatmul.bf16.gmra.mxu2 %v9260_v37  ;;  %6047 = vmatmul.bf16.gmra.mxu0 %v9143_v59  ;;  %v9264_v53 = vadd.f32 %v4700_v13, %v4397_v61  ;;  %v5140_v59 = vpack.c.bf16 %v5108_v49, %v5108_v49  ;;  %v5141_v13 = vpack.c.bf16 %v5109_v60, %v5109_v60  ;;  %v5569_v11 = vunpack.c.l.b16 %v5488_v4  ;;  %v5110_v4 = vld [vmem:[#allocation2 + $0xc2] sm:$0xff] }
 0x3fc   : > { %5701 = vmatmul.bf16.gmra.mxu3 %v5593_v5  ;;  %v5006_v55 = vpop.f32.mrf.mxu1  ;;  %v5487_v5 = vpack.c.bf16 %v5455_v31, %v5455_v31  ;;  %v4778_v31 = vld [vmem:[#allocation2 + $0x169] sm:$0xff] }
 0x3fd   : > { %v9267_v63 = vadd.f32 %v5006_v55, %v9081_v25  ;;  %v7903_v25 = vld [vmem:[%s9612_s3 + $0x200] sm:$0xff]  ;;  %v5221_v34 = vunpack.c.l.b16 %v5140_v59  ;;  %v5222_v55 = vunpack.c.l.b16 %v5141_v13  ;;  %v4779_v59 = vld [vmem:[#allocation2 + $0x171] sm:$0xff] }
 0x3fe   : > { %v4043_v29 = vpop.f32.mrf.mxu2  ;;  %6367 = vmatpush.bf16.msra.mxu1 %v7903_v25  ;;  %v5568_v52 = vunpack.c.l.b16 %v5487_v5 }
 0x3ff   : > { %v4044_v9 = vadd.f32 %v4043_v29, %v9112_v40  ;;  %v4357_v26 = vpop.f32.mrf.mxu3  ;;  %v9278_v29 = vpack.c.b16 %v4890_v62, %v4889_v33  ;;  %v9282_v50 = vpack.c.b16 %v5222_v55, %v5221_v34  ;;  %v4811_v62 = vpack.c.bf16 %v4779_v59, %v4779_v59  ;;  %v5111_v33 = vld [vmem:[#allocation2 + $0xca] sm:$0xff]  ;;  %v5458_v34 = vld [vmem:[#allocation2 + $0xe0] sm:$0xff] }
 0x400   : > { %v4705_v17 = vpop.f32.mrf.mxu0  ;;  %v4810_v55 = vpack.c.bf16 %v4778_v31, %v4778_v31 }
 0x401   : > { %v4398_v23 = vadd.f32 %v4357_v26, %v4044_v9 }
 0x403   : > { %v9273_v61 = vadd.f32 %v4703_v12, %v4398_v23  ;;  %v5594_v23 = vpack.c.b16 %v5569_v11, %v5568_v52  ;;  %v5490_v52 = vpack.c.bf16 %v5458_v34, %v5458_v34 }
 0x404   : > { %v5009_v40 = vpop.f32.mrf.mxu1 }
 0x405   : > { %v9276_v27 = vadd.f32 %v5009_v40, %v9110_v2 }
 0x406   : > { %v4045_v49 = vpop.f32.mrf.mxu2 }
 0x407   : > { %9626 = vst [vmem:[#allocation5_spill] sm:$0xff] %v9276_v27  ;;  %v4046_v60 = vadd.f32 %v4045_v49, %v9136_v41  ;;  %v4359_v9 = vpop.f32.mrf.mxu3  ;;  %5048 = vmatmul.bf16.gmra.mxu1 %v9278_v29 }
 0x408   : > { %v4708_v26 = vpop.f32.mrf.mxu0 }
 0x409   : > { %v4399_v12 = vadd.f32 %v4359_v9, %v4046_v60  ;;  %v5457_v60 = vld [vmem:[#allocation2 + $0xd8] sm:$0xff]  ;;  %v4892_v9 = vunpack.c.l.b16 %v4811_v62 }
 0x40b   : > { %5359 = vmatmul.bf16.gmra.mxu2 %v9282_v50  ;;  %6052 = vmatmul.bf16.gmra.mxu0 %v9159_v35  ;;  %v9286_v2 = vadd.f32 %v4705_v17, %v4399_v12  ;;  %v5142_v35 = vpack.c.bf16 %v5110_v4, %v5110_v4  ;;  %v5143_v17 = vpack.c.bf16 %v5111_v33, %v5111_v33  ;;  %v4891_v12 = vunpack.c.l.b16 %v4810_v55  ;;  %v4781_v55 = vld [vmem:[#allocation2 + $0x189] sm:$0xff] }
 0x40c   : > { %5706 = vmatmul.bf16.gmra.mxu3 %v5594_v23  ;;  %v5011_v13 = vpop.f32.mrf.mxu1 }
 0x40d   : > { %v9289_v41 = vadd.f32 %v5011_v13, %v9134_v18  ;;  %v5489_v18 = vpack.c.bf16 %v5457_v60, %v5457_v60  ;;  %v5223_v13 = vunpack.c.l.b16 %v5142_v35  ;;  %v4780_v35 = vld [vmem:[#allocation2 + $0x181] sm:$0xff] }
 0x40e   : > { %v4048_v25 = vpop.f32.mrf.mxu2 }
 0x40f   : > { %9627 = vst [vmem:[#allocation6_spill] sm:$0xff] %v9289_v41  ;;  %v4049_v5 = vadd.f32 %v4048_v25, %v9141_v46  ;;  %v4362_v40 = vpop.f32.mrf.mxu3  ;;  %v5224_v41 = vunpack.c.l.b16 %v5143_v17  ;;  %v9297_v46 = vpack.c.b16 %v4892_v9, %v4891_v12  ;;  %v5571_v25 = vunpack.c.l.b16 %v5490_v52  ;;  %v5112_v9 = vld [vmem:[#allocation2 + $0xda] sm:$0xff]  ;;  %v5113_v52 = vld [vmem:[#allocation2 + $0xe2] sm:$0xff] }
 0x410   : > { %v4710_v49 = vpop.f32.mrf.mxu0  ;;  %v4813_v17 = vpack.c.bf16 %v4781_v55, %v4781_v55 }
 0x411   : > { %v4400_v11 = vadd.f32 %v4362_v40, %v4049_v5  ;;  %v5570_v5 = vunpack.c.l.b16 %v5489_v18  ;;  %v9301_v40 = vpack.c.b16 %v5224_v41, %v5223_v13  ;;  %v5460_v18 = vld [vmem:[#allocation2 + $0xf8] sm:$0xff] }
 0x413   : > { %v9292_v23 = vadd.f32 %v4708_v26, %v4400_v11  ;;  %v5595_v34 = vpack.c.b16 %v5571_v25, %v5570_v5  ;;  %v5459_v25 = vld [vmem:[#allocation2 + $0xf0] sm:$0xff] }
 0x414   : > { %v5014_v59 = vpop.f32.mrf.mxu1 }
 0x415   : > { %v9295_v27 = vadd.f32 %v5014_v59, %v9139_v45  ;;  %v4812_v59 = vpack.c.bf16 %v4780_v35, %v4780_v35 }
 0x416   : > { %v4050_v31 = vpop.f32.mrf.mxu2 }
 0x417   : > { %v4051_v4 = vadd.f32 %v4050_v31, %v9149_v7  ;;  %v4364_v33 = vpop.f32.mrf.mxu3  ;;  %5053 = vmatmul.bf16.gmra.mxu1 %v9297_v46  ;;  %v4893_v5 = vunpack.c.l.b16 %v4812_v59 }
 0x418   : > { %v4713_v62 = vpop.f32.mrf.mxu0 }
 0x419   : > { %v4401_v26 = vadd.f32 %v4364_v33, %v4051_v4  ;;  %v4894_v4 = vunpack.c.l.b16 %v4813_v17  ;;  %v5492_v33 = vpack.c.bf16 %v5460_v18, %v5460_v18 }
 0x41b   : > { %5364 = vmatmul.bf16.gmra.mxu2 %v9301_v40  ;;  %6057 = vmatmul.bf16.gmra.mxu0 %v9174_v39  ;;  %v9305_v45 = vadd.f32 %v4710_v49, %v4401_v26  ;;  %v5144_v39 = vpack.c.bf16 %v5112_v9, %v5112_v9  ;;  %v5145_v49 = vpack.c.bf16 %v5113_v52, %v5113_v52 }
 0x41c   : > { %5711 = vmatmul.bf16.gmra.mxu3 %v5595_v34  ;;  %v5016_v11 = vpop.f32.mrf.mxu1 }
 0x41d   : > { %v9308_v7 = vadd.f32 %v5016_v11, %v9147_v57  ;;  %v5491_v57 = vpack.c.bf16 %v5459_v25, %v5459_v25  ;;  %v5225_v55 = vunpack.c.l.b16 %v5144_v39  ;;  %v5226_v11 = vunpack.c.l.b16 %v5145_v49  ;;  %v5114_v39 = vld [vmem:[#allocation2 + $0xf2] sm:$0xff]  ;;  %v5115_v49 = vld [vmem:[#allocation2 + $0xfa] sm:$0xff] }
 0x41e   : > { %v4053_v60 = vpop.f32.mrf.mxu2 }
 0x41f   : > { %9628 = vst [vmem:[#allocation7_spill] sm:$0xff] %v9308_v7  ;;  %v4054_v41 = vadd.f32 %v4053_v60, %v9157_v54  ;;  %v4367_v12 = vpop.f32.mrf.mxu3  ;;  %v9316_v54 = vpack.c.b16 %v4894_v4, %v4893_v5  ;;  %v5573_v60 = vunpack.c.l.b16 %v5492_v33  ;;  %v5462_v33 = vld [vmem:[#allocation2 + $0x110] sm:$0xff] }
 0x420   : > { %v4715_v13 = vpop.f32.mrf.mxu0 }
 0x421   : > { %v4402_v31 = vadd.f32 %v4367_v12, %v4054_v41  ;;  %v5572_v41 = vunpack.c.l.b16 %v5491_v57  ;;  %v9320_v12 = vpack.c.b16 %v5226_v11, %v5225_v55  ;;  %v5147_v55 = vpack.c.bf16 %v5115_v49, %v5115_v49  ;;  %v5461_v11 = vld [vmem:[#allocation2 + $0x108] sm:$0xff] }
 0x423   : > { %v9311_v26 = vadd.f32 %v4713_v62, %v4402_v31  ;;  %v5596_v18 = vpack.c.b16 %v5573_v60, %v5572_v41 }
 0x424   : > { %v5019_v34 = vpop.f32.mrf.mxu1 }
 0x425   : > { %v9314_v7 = vadd.f32 %v5019_v34, %v9155_v24  ;;  %v5146_v34 = vpack.c.bf16 %v5114_v39, %v5114_v39 }
 0x426   : > { %v4055_v35 = vpop.f32.mrf.mxu2 }
 0x427   : > { %v4056_v9 = vadd.f32 %v4055_v35, %v9166_v16  ;;  %v4369_v52 = vpop.f32.mrf.mxu3  ;;  %5058 = vmatmul.bf16.gmra.mxu1 %v9316_v54  ;;  %v5493_v35 = vpack.c.bf16 %v5461_v11, %v5461_v11 }
 0x428   : > { %v6023_v17 = vpop.f32.mrf.mxu0 }
 0x429   : > { %v4403_v62 = vadd.f32 %v4369_v52, %v4056_v9  ;;  %v5227_v9 = vunpack.c.l.b16 %v5146_v34 }
 0x42b   : > { %5369 = vmatmul.bf16.gmra.mxu2 %v9320_v12  ;;  %6062 = vmatmul.bf16.gmra.mxu0 %v9196_v20  ;;  %v9324_v24 = vadd.f32 %v4715_v13, %v4403_v62  ;;  %v5494_v20 = vpack.c.bf16 %v5462_v33, %v5462_v33  ;;  %v5116_v33 = vld [vmem:[#allocation2 + $0x10a] sm:$0xff] }
 0x42c   : > { %5716 = vmatmul.bf16.gmra.mxu3 %v5596_v18  ;;  %v5021_v59 = vpop.f32.mrf.mxu1 }
 0x42d   : > { %v9327_v31 = vadd.f32 %v5021_v59, %v9164_v36  ;;  %v5228_v36 = vunpack.c.l.b16 %v5147_v55  ;;  %v5575_v62 = vunpack.c.l.b16 %v5494_v20  ;;  %v5464_v55 = vld [vmem:[#allocation2 + $0x128] sm:$0xff]  ;;  %v5148_v20 = vpack.c.bf16 %v5116_v33, %v5116_v33 }
 0x42e   : > { %v5330_v16 = vpop.f32.mrf.mxu2 }
 0x42f   : > { %v5410_v25 = vadd.f32 %v5330_v16, %v9172_v47  ;;  %v5677_v4 = vpop.f32.mrf.mxu3  ;;  %v5574_v16 = vunpack.c.l.b16 %v5493_v35  ;;  %v9337_v49 = vpack.c.b16 %v5228_v36, %v5227_v9 }
 0x430   : > { %v6025_v5 = vpop.f32.mrf.mxu0 }
 0x431   : > { %v5757_v57 = vadd.f32 %v5677_v4, %v5410_v25 }
 0x433   : > { %v9330_v13 = vadd.f32 %v6023_v17, %v5757_v57  ;;  %v5597_v17 = vpack.c.b16 %v5575_v62, %v5574_v16  ;;  %v5229_v62 = vunpack.c.l.b16 %v5148_v20  ;;  %v5466_v20 = vld [vmem:[#allocation2 + $0x140] sm:$0xff] }
 0x434   : > { %v5024_v60 = vpop.f32.mrf.mxu1 }
 0x435   : > { %v9333_v52 = vadd.f32 %v5024_v60, %v9169_v43  ;;  %v5463_v60 = vld [vmem:[#allocation2 + $0x120] sm:$0xff] }
 0x436   : > { %v5332_v41 = vpop.f32.mrf.mxu2  ;;  %v5495_v36 = vpack.c.bf16 %v5463_v60, %v5463_v60 }
 0x437   : > { %v5411_v47 = vadd.f32 %v5332_v41, %v9185_v6  ;;  %v5679_v18 = vpop.f32.mrf.mxu3  ;;  %6368 = vmatmul.bf16.vlgmr.msra.gmra.mxu1 %v9178_v8  ;;  %v5117_v8 = vld [vmem:[#allocation2 + $0x112] sm:$0xff] }
 0x438   : > { %v6028_v59 = vpop.f32.mrf.mxu0  ;;  %v5149_v35 = vpack.c.bf16 %v5117_v8, %v5117_v8 }
 0x439   : > { %v5758_v39 = vadd.f32 %v5679_v18, %v5411_v47 }
 0x43b   : > { %5374 = vmatmul.bf16.gmra.mxu2 %v9337_v49  ;;  %6067 = vmatmul.bf16.gmra.mxu0 %v9215_v28  ;;  %v9341_v25 = vadd.f32 %v6025_v5, %v5758_v39  ;;  %v5496_v28 = vpack.c.bf16 %v5464_v55, %v5464_v55 }
 0x43c   : > { %5721 = vmatmul.bf16.gmra.mxu3 %v5597_v17  ;;  %v5026_v43 = vpop.f32.mrf.mxu1  ;;  %v5576_v17 = vunpack.c.l.b16 %v5495_v36  ;;  %v5465_v36 = vld [vmem:[#allocation2 + $0x138] sm:$0xff] }
 0x43d   : > { %v9344_v4 = vadd.f32 %v5026_v43, %v9182_v21  ;;  %v5230_v21 = vunpack.c.l.b16 %v5149_v35  ;;  %v5577_v16 = vunpack.c.l.b16 %v5496_v28 }
 0x43e   : > { %v5335_v6 = vpop.f32.mrf.mxu2 }
 0x43f   : > { %v5412_v57 = vadd.f32 %v5335_v6, %v9194_v32  ;;  %v5682_v34 = vpop.f32.mrf.mxu3  ;;  %v9354_v6 = vpack.c.b16 %v5230_v21, %v5229_v62 }
 0x440   : > { %v6030_v9 = vpop.f32.mrf.mxu0 }
 0x441   : > { %v5759_v11 = vadd.f32 %v5682_v34, %v5412_v57  ;;  %v5118_v34 = vld [vmem:[#allocation2 + $0x122] sm:$0xff] }
 0x442   : > { %v5150_v60 = vpack.c.bf16 %v5118_v34, %v5118_v34 }
 0x443   : > { %v9347_v5 = vadd.f32 %v6028_v59, %v5759_v11  ;;  %v5598_v59 = vpack.c.b16 %v5577_v16, %v5576_v17 }
 0x444   : > { %v5029_v41 = vpop.f32.mrf.mxu1  ;;  %v5231_v21 = vunpack.c.l.b16 %v5150_v60 }
 0x445   : > { %v9350_v47 = vadd.f32 %v5029_v41, %v9191_v15  ;;  %v5497_v41 = vpack.c.bf16 %v5465_v36, %v5465_v36 }
 0x446   : > { %v5337_v18 = vpop.f32.mrf.mxu2 }
 0x447   : > { %v5413_v32 = vadd.f32 %v5337_v18, %v9207_v51  ;;  %v5684_v39 = vpop.f32.mrf.mxu3  ;;  %6373 = vmatmul.bf16.gmra.mxu1 %v9200_v19  ;;  %v5119_v19 = vld [vmem:[#allocation2 + $0x12a] sm:$0xff] }
 0x448   : > { %v6033_v15 = vpop.f32.mrf.mxu0  ;;  %v5151_v28 = vpack.c.bf16 %v5119_v19, %v5119_v19  ;;  %v5120_v19 = vld [vmem:[#allocation2 + $0x13a] sm:$0xff] }
 0x449   : > { %v5760_v43 = vadd.f32 %v5684_v39, %v5413_v32 }
 0x44a   : > { %v5232_v18 = vunpack.c.l.b16 %v5151_v28  ;;  %v5152_v28 = vpack.c.bf16 %v5120_v19, %v5120_v19 }
 0x44b   : > { %5379 = vmatmul.bf16.gmra.mxu2 %v9354_v6  ;;  %6072 = vmatmul.bf16.gmra.mxu0 %v9237_v22  ;;  %v9358_v33 = vadd.f32 %v6030_v9, %v5760_v43  ;;  %v5498_v22 = vpack.c.bf16 %v5466_v20, %v5466_v20  ;;  %v5578_v43 = vunpack.c.l.b16 %v5497_v41  ;;  %v5468_v20 = vld [vmem:[#allocation2 + $0x158] sm:$0xff] }
 0x44c   : > { %5726 = vmatmul.bf16.gmra.mxu3 %v5598_v59  ;;  %v5031_v8 = vpop.f32.mrf.mxu1 }
 0x44d   : > { %v9361_v57 = vadd.f32 %v5031_v8, %v9204_v44  ;;  %v5579_v39 = vunpack.c.l.b16 %v5498_v22  ;;  %v9371_v8 = vpack.c.b16 %v5232_v18, %v5231_v21  ;;  %v5467_v22 = vld [vmem:[#allocation2 + $0x150] sm:$0xff]  ;;  %v5233_v18 = vunpack.c.l.b16 %v5152_v28  ;;  %v5469_v28 = vld [vmem:[#allocation2 + $0x168] sm:$0xff] }
 0x44e   : > { %v5340_v51 = vpop.f32.mrf.mxu2 }
 0x44f   : > { %v5414_v55 = vadd.f32 %v5340_v51, %v9213_v30  ;;  %v5687_v11 = vpop.f32.mrf.mxu3 }
 0x450   : > { %v6035_v16 = vpop.f32.mrf.mxu0 }
 0x451   : > { %v5761_v35 = vadd.f32 %v5687_v11, %v5414_v55  ;;  %v5121_v55 = vld [vmem:[#allocation2 + $0x142] sm:$0xff] }
 0x452   : > { %v5153_v36 = vpack.c.bf16 %v5121_v55, %v5121_v55  ;;  %v9630_v55 = vld [vmem:[#allocation3_spill] sm:$0xff] }
 0x453   : > { %v9364_v9 = vadd.f32 %v6033_v15, %v5761_v35  ;;  %v5599_v15 = vpack.c.b16 %v5579_v39, %v5578_v43 }
 0x454   : > { %v5034_v62 = vpop.f32.mrf.mxu1 }
 0x455   : > { %v9367_v44 = vadd.f32 %v5034_v62, %v9210_v42  ;;  %v5499_v62 = vpack.c.bf16 %v5467_v22, %v5467_v22  ;;  %v5501_v22 = vpack.c.bf16 %v5469_v28, %v5469_v28 }
 0x456   : > { %v5342_v32 = vpop.f32.mrf.mxu2 }
 0x457   : > { %v5415_v30 = vadd.f32 %v5342_v32, %v9226_v58  ;;  %v5689_v17 = vpop.f32.mrf.mxu3  ;;  %6378 = vmatmul.bf16.gmra.mxu1 %v9219_v56  ;;  %v5580_v43 = vunpack.c.l.b16 %v5499_v62 }
 0x458   : > { %v6038_v35 = vpop.f32.mrf.mxu0 }
 0x459   : > { %v5762_v59 = vadd.f32 %v5689_v17, %v5415_v30  ;;  %v9629_v30 = vld [vmem:[#allocation4_spill] sm:$0xff] }
 0x45b   : > { %5384 = vmatmul.bf16.gmra.mxu2 %v9371_v8  ;;  %6077 = vmatmul.bf16.gmra.mxu0 %v9256_v3  ;;  %v9375_v51 = vadd.f32 %v6035_v16, %v5762_v59  ;;  %v5500_v3 = vpack.c.bf16 %v5468_v20, %v5468_v20  ;;  %v5470_v20 = vld [vmem:[#allocation2 + $0x170] sm:$0xff] }
 0x45c   : > { %5731 = vmatmul.bf16.gmra.mxu3 %v5599_v15  ;;  %v5036_v42 = vpop.f32.mrf.mxu1 }
 0x45d   : > { %v9378_v34 = vadd.f32 %v5036_v42, %v9223_v1  ;;  %v5234_v1 = vunpack.c.l.b16 %v5153_v36  ;;  %v5581_v39 = vunpack.c.l.b16 %v5500_v3  ;;  %v5502_v36 = vpack.c.bf16 %v5470_v20, %v5470_v20 }
 0x45e   : > { %v5345_v58 = vpop.f32.mrf.mxu2 }
 0x45f   : > { %v5416_v56 = vadd.f32 %v5345_v58, %v9235_v48  ;;  %v5692_v11 = vpop.f32.mrf.mxu3  ;;  %v9388_v15 = vpack.c.b16 %v5234_v1, %v5233_v18  ;;  %v5600_v58 = vpack.c.b16 %v5581_v39, %v5580_v43  ;;  %v5583_v18 = vunpack.c.l.b16 %v5502_v36  ;;  %v5125_v43 = vld [vmem:[#allocation2 + $0x172] sm:$0xff] }
 0x460   : > { %v6040_v42 = vpop.f32.mrf.mxu0  ;;  %v5582_v1 = vunpack.c.l.b16 %v5501_v22  ;;  %v5819_v36 = vld [vmem:[#allocation2 + $0x199] sm:$0xff]  ;;  %v5820_v22 = vld [vmem:[#allocation2 + $0x1a1] sm:$0xff] }
 0x461   : > { %v5763_v60 = vadd.f32 %v5692_v11, %v5416_v56  ;;  %v5123_v11 = vld [vmem:[#allocation2 + $0x15a] sm:$0xff] }
 0x462   : > { %v5601_v39 = vpack.c.b16 %v5583_v18, %v5582_v1  ;;  %v5852_v18 = vpack.c.bf16 %v5820_v22, %v5820_v22 }
 0x463   : > { %v9381_v41 = vadd.f32 %v6038_v35, %v5763_v60  ;;  %v5155_v60 = vpack.c.bf16 %v5123_v11, %v5123_v11 }
 0x464   : > { %v5039_v21 = vpop.f32.mrf.mxu1 }
 0x465   : > { %v9384_v16 = vadd.f32 %v5039_v21, %v9232_v14  ;;  %v5236_v21 = vunpack.c.l.b16 %v5155_v60 }
 0x466   : > { %v5347_v32 = vpop.f32.mrf.mxu2 }
 0x467   : > { %v5417_v48 = vadd.f32 %v5347_v32, %v9248_v38  ;;  %6383 = vmatmul.bf16.gmra.mxu1 %v9629_v30  ;;  %v5694_v17 = vpop.f32.mrf.mxu3  ;;  %v5122_v38 = vld [vmem:[#allocation2 + $0x152] sm:$0xff] }
 0x468   : > { %v5154_v35 = vpack.c.bf16 %v5122_v38, %v5122_v38 }
 0x469   : > { %v5764_v59 = vadd.f32 %v5694_v17, %v5417_v48  ;;  %v5124_v17 = vld [vmem:[#allocation2 + $0x16a] sm:$0xff] }
 0x46a   : > { %v5235_v62 = vunpack.c.l.b16 %v5154_v35 }
 0x46b   : > { %5389 = vmatmul.bf16.gmra.mxu2 %v9388_v15  ;;  %6082 = vmatmul.bf16.gmra.mxu0 %v9278_v29  ;;  %v9392_v19 = vadd.f32 %v6040_v42, %v5764_v59  ;;  %v5156_v59 = vpack.c.bf16 %v5124_v17, %v5124_v17  ;;  %v5157_v42 = vpack.c.bf16 %v5125_v43, %v5125_v43  ;;  %v5933_v43 = vunpack.c.l.b16 %v5852_v18  ;;  %v9455_v18 = vpop.f32.mrf.mxu0 }
 0x46c   : > { %5736 = vmatmul.bf16.gmra.mxu3 %v5600_v58  ;;  %v5041_v14 = vpop.f32.mrf.mxu1  ;;  %v9401_v32 = vpack.c.b16 %v5236_v21, %v5235_v62  ;;  %v5471_v58 = vld [vmem:[#allocation2 + $0x180] sm:$0xff]  ;;  %v5127_v62 = vld [vmem:[#allocation2 + $0x18a] sm:$0xff]  ;;  %v5851_v21 = vpack.c.bf16 %v5819_v36, %v5819_v36 }
 0x46d   : > { %v9395_v56 = vadd.f32 %v5041_v14, %v9630_v55  ;;  %v5503_v14 = vpack.c.bf16 %v5471_v58, %v5471_v58  ;;  %v5237_v38 = vunpack.c.l.b16 %v5156_v59  ;;  %v5238_v11 = vunpack.c.l.b16 %v5157_v42 }
 0x46e   : > { %v5932_v17 = vunpack.c.l.b16 %v5851_v21  ;;  %v5350_v36 = vpop.f32.mrf.mxu2 }
 0x46f   : > { %v5584_v35 = vunpack.c.l.b16 %v5503_v14  ;;  %v5697_v21 = vpop.f32.mrf.mxu3 }
 0x474   : > { %v5044_v3 = vpop.f32.mrf.mxu1 }
 0x475   : > { %v9398_v29 = vadd.f32 %v5044_v3, %v9251_v10  ;;  %v5472_v10 = vld [vmem:[#allocation2 + $0x188] sm:$0xff] }
 0x477   : > { %6388 = vmatmul.bf16.gmra.mxu1 %v9260_v37  ;;  %v5504_v37 = vpack.c.bf16 %v5472_v10, %v5472_v10 }
 0x47b   : > { %5394 = vmatmul.bf16.gmra.mxu2 %v9401_v32  ;;  %6087 = vmatmul.bf16.gmra.mxu0 %v9297_v46  ;;  %v5585_v46 = vunpack.c.l.b16 %v5504_v37 }
 0x47c   : > { %5741 = vmatmul.bf16.gmra.mxu3 %v5601_v39  ;;  %v5046_v48 = vpop.f32.mrf.mxu1 }
 0x47d   : > { %v9406_v30 = vadd.f32 %v5046_v48, %v9264_v53  ;;  %v9412_v53 = vpack.c.b16 %v5238_v11, %v5237_v38  ;;  %v5602_v60 = vpack.c.b16 %v5585_v46, %v5584_v35  ;;  %v5159_v48 = vpack.c.bf16 %v5127_v62, %v5127_v62  ;;  %v9439_v35 = vld [vmem:[%s9613_s4] ss:$0 sm:$0xff] }
 0x47f   : > { %v5240_v42 = vunpack.c.l.b16 %v5159_v48 }
 0x484   : > { %v5049_v55 = vpop.f32.mrf.mxu1 }
 0x485   : > { %v9409_v20 = vadd.f32 %v5049_v55, %v9273_v61  ;;  %v5126_v61 = vld [vmem:[#allocation2 + $0x182] sm:$0xff] }
 0x486   : > { %v5158_v39 = vpack.c.bf16 %v5126_v61, %v5126_v61  ;;  %v7733_v61 = vld [vmem:[%s8022_s16 + $0x21] sm:$0xff] }
 0x487   : > { %6393 = vmatmul.bf16.gmra.mxu1 %v9282_v50  ;;  %v7941_v50 = vld [vmem:[#allocation2] sm:$0xff] }
 0x488   : > { %v5505_v1 = vpack.c.bf16 %v7941_v50, %v7941_v50 }
 0x48a   : > { %v5586_v59 = vunpack.c.l.b16 %v5505_v1  ;;  %v5352_v1 = vpop.f32.mrf.mxu2 }
 0x48b   : > { %5399 = vmatmul.bf16.gmra.mxu2 %v9412_v53  ;;  %6092 = vmatmul.bf16.gmra.mxu0 %v9316_v54  ;;  %v5239_v54 = vunpack.c.l.b16 %v5158_v39 }
 0x48c   : > { %5746 = vmatmul.bf16.gmra.mxu3 %v5602_v60  ;;  %v5051_v28 = vpop.f32.mrf.mxu1  ;;  %v5603_v37 = vpack.c.b16 %v5586_v59, %v5586_v59 }
 0x48d   : > { %v9417_v3 = vadd.f32 %v5051_v28, %v9286_v2  ;;  %v5949_v2 = vpack.c.b16 %v5933_v43, %v5932_v17  ;;  %v9423_v14 = vpack.c.b16 %v5240_v42, %v5239_v54  ;;  %v7732_v28 = vld [vmem:[%s8022_s16 + $0x19] sm:$0xff]  ;;  %v7734_v17 = vld [vmem:[%s8022_s16 + $0x31] sm:$0xff]  ;;  %v9462_v42 = vpop.f32.mrf.mxu0 }
 0x494   : > { %v5054_v10 = vpop.f32.mrf.mxu1 }
 0x495   : > { %v9420_v58 = vadd.f32 %v5054_v10, %v9292_v23  ;;  %v5699_v10 = vpop.f32.mrf.mxu3 }
 0x497   : > { %6398 = vmatmul.bf16.gmra.mxu1 %v9301_v40 }
 0x49b   : > { %5404 = vmatmul.bf16.gmra.mxu2 %v9423_v14  ;;  %6097 = vmatmul.bf16.gmra.mxu0 %v5949_v2 }
 0x49c   : > { %5751 = vmatmul.bf16.gmra.mxu3 %v5603_v37  ;;  %v5056_v55 = vpop.f32.mrf.mxu1  ;;  %v5355_v37 = vpop.f32.mrf.mxu2 }
 0x49d   : > { %v9427_v38 = vadd.f32 %v5056_v55, %v9305_v45  ;;  %v7735_v55 = vld [vmem:[%s8022_s16 + $0x39] sm:$0xff] }
 0x4a4   : > { %v5059_v11 = vpop.f32.mrf.mxu1 }
 0x4a5   : > { %v9430_v23 = vadd.f32 %v5059_v11, %v9311_v26 }
 0x4a7   : > { %6403 = vmatmul.bf16.gmra.mxu1 %v9320_v12 }
 0x4ac   : > { %v5061_v40 = vpop.f32.mrf.mxu1 }
 0x4ad   : > { %v9434_v46 = vadd.f32 %v5061_v40, %v9324_v24 }
 0x4b4   : > { %v6369_v60 = vpop.f32.mrf.mxu1 }
 0x4b5   : > { %v6449_v45 = vadd.f32 %v6369_v60, %v9330_v13  ;;  %v5702_v60 = vpop.f32.mrf.mxu3 }
 0x4b7   : > { %v6517_v26 = vadd.f32 %v9439_v35, %v6449_v45  ;;  %6408 = vmatmul.bf16.gmra.mxu1 %v9337_v49 }
 0x4b9   : > { %v6549_v12 = vadd.f32 %v7732_v28, %v6517_v26  ;;  %v7736_v28 = vld [vmem:[%s8022_s16 + $0x49] sm:$0xff]  ;;  %v9471_v26 = vpop.f32.mrf.mxu0 }
 0x4bb   : > { %v6581_v24 = vmax.f32 %v6549_v12, 0.0 }
 0x4bc   : > { %v6371_v22 = vpop.f32.mrf.mxu1 }
 0x4bd   : > { %6613 = vst [vmem:[%s9449_s9] sm:$0xff] %v6581_v24  ;;  %v6450_v13 = vadd.f32 %v6371_v22, %v9341_v25 }
 0x4bf   : > { %v6518_v62 = vadd.f32 %v9439_v35, %v6450_v13 }
 0x4c1   : > { %v6550_v49 = vadd.f32 %v7733_v61, %v6518_v62  ;;  %v5704_v62 = vpop.f32.mrf.mxu3 }
 0x4c3   : > { %v6582_v50 = vmax.f32 %v6550_v49, 0.0  ;;  %v7737_v49 = vld [vmem:[%s8022_s16 + $0x51] sm:$0xff] }
 0x4c4   : > { %v6374_v39 = vpop.f32.mrf.mxu1 }
 0x4c5   : > { %6614 = vst [vmem:[%s9449_s9 + $0x8] sm:$0xff] %v6582_v50  ;;  %v6451_v48 = vadd.f32 %v6374_v39, %v9347_v5  ;;  %v9479_v50 = vpop.f32.mrf.mxu0 }
 0x4c7   : > { %v6519_v43 = vadd.f32 %v9439_v35, %v6451_v48  ;;  %6413 = vmatmul.bf16.gmra.mxu1 %v9354_v6 }
 0x4c9   : > { %v6551_v25 = vadd.f32 %v7734_v17, %v6519_v43 }
 0x4cb   : > { %v6583_v59 = vmax.f32 %v6551_v25, 0.0  ;;  %v7738_v25 = vld [vmem:[%s8022_s16 + $0x61] sm:$0xff] }
 0x4cc   : > { %v6376_v54 = vpop.f32.mrf.mxu1 }
 0x4cd   : > { %6615 = vst [vmem:[%s9449_s9 + $0x10] sm:$0xff] %v6583_v59  ;;  %v6452_v2 = vadd.f32 %v6376_v54, %v9358_v33  ;;  %v5357_v33 = vpop.f32.mrf.mxu2 }
 0x4cf   : > { %v6520_v5 = vadd.f32 %v9439_v35, %v6452_v2  ;;  %v5418_v2 = vadd.f32 %v5350_v36, %v9254_v0 }
 0x4d1   : > { %v6552_v11 = vadd.f32 %v7735_v55, %v6520_v5  ;;  %v9487_v55 = vpop.f32.mrf.mxu0 }
 0x4d3   : > { %v6584_v40 = vmax.f32 %v6552_v11, 0.0 }
 0x4d4   : > { %v6379_v6 = vpop.f32.mrf.mxu1 }
 0x4d5   : > { %6616 = vst [vmem:[%s9449_s9 + $0x18] sm:$0xff] %v6584_v40  ;;  %v6453_v45 = vadd.f32 %v6379_v6, %v9364_v9  ;;  %v5360_v48 = vpop.f32.mrf.mxu2 }
 0x4d7   : > { %v6521_v12 = vadd.f32 %v9439_v35, %v6453_v45  ;;  %6418 = vmatmul.bf16.gmra.mxu1 %v9371_v8  ;;  %v5765_v45 = vadd.f32 %v5697_v21, %v5418_v2 }
 0x4d9   : > { %v6553_v24 = vadd.f32 %v7736_v28, %v6521_v12  ;;  %v6111_v0 = vadd.f32 %v9455_v18, %v5765_v45 }
 0x4db   : > { %v6585_v22 = vmax.f32 %v6553_v24, 0.0  ;;  %v5419_v24 = vadd.f32 %v5352_v1, %v9267_v63 }
 0x4dc   : > { %v6381_v13 = vpop.f32.mrf.mxu1 }
 0x4dd   : > { %6617 = vst [vmem:[%s9449_s9 + $0x20] sm:$0xff] %v6585_v22  ;;  %v6454_v61 = vadd.f32 %v6381_v13, %v9375_v51  ;;  %v5707_v51 = vpop.f32.mrf.mxu3  ;;  %v5362_v11 = vpop.f32.mrf.mxu2 }
 0x4de   : > { %v9495_v13 = vpop.f32.mrf.mxu0 }
 0x4df   : > { %v6522_v9 = vadd.f32 %v9439_v35, %v6454_v61 }
 0x4e1   : > { %v6554_v39 = vadd.f32 %v7737_v49, %v6522_v9  ;;  %v5766_v9 = vadd.f32 %v5699_v10, %v5419_v24 }
 0x4e3   : > { %v6586_v17 = vmax.f32 %v6554_v39, 0.0  ;;  %v6112_v18 = vadd.f32 %v9462_v42, %v5766_v9 }
 0x4e4   : > { %v6384_v8 = vpop.f32.mrf.mxu1 }
 0x4e5   : > { %6618 = vst [vmem:[%s9449_s9 + $0x28] sm:$0xff] %v6586_v17  ;;  %v6455_v43 = vadd.f32 %v6384_v8, %v9381_v41  ;;  %v7739_v41 = vld [vmem:[%s8022_s16 + $0x69] sm:$0xff]  ;;  %v5365_v49 = vpop.f32.mrf.mxu2  ;;  %v9631_v17 = vld [vmem:[#allocation5_spill] sm:$0xff] }
 0x4e6   : > { %v5420_v63 = vadd.f32 %v5355_v37, %v9631_v17  ;;  %v9505_v2 = vpop.f32.mrf.mxu0 }
 0x4e7   : > { %v6523_v59 = vadd.f32 %v9439_v35, %v6455_v43  ;;  %6423 = vmatmul.bf16.gmra.mxu1 %v9388_v15  ;;  %v5709_v15 = vpop.f32.mrf.mxu3 }
 0x4e9   : > { %v6555_v54 = vadd.f32 %v7738_v25, %v6523_v59  ;;  %v7741_v59 = vld [vmem:[%s8022_s16 + $0x81] sm:$0xff] }
 0x4eb   : > { %v6587_v5 = vmax.f32 %v6555_v54, 0.0  ;;  %v5767_v54 = vadd.f32 %v5702_v60, %v5420_v63  ;;  %v9633_v63 = vld [vmem:[#allocation7_spill] sm:$0xff] }
 0x4ec   : > { %v6386_v40 = vpop.f32.mrf.mxu1 }
 0x4ed   : > { %6619 = vst [vmem:[%s9449_s9 + $0x30] sm:$0xff] %v6587_v5  ;;  %v6456_v6 = vadd.f32 %v6386_v40, %v9392_v19  ;;  %v7740_v19 = vld [vmem:[%s8022_s16 + $0x79] sm:$0xff]  ;;  %v5367_v5 = vpop.f32.mrf.mxu2  ;;  %v9632_v40 = vld [vmem:[#allocation6_spill] sm:$0xff] }
 0x4ef   : > { %v6524_v28 = vadd.f32 %v9439_v35, %v6456_v6  ;;  %v5712_v8 = vpop.f32.mrf.mxu3  ;;  %v5421_v6 = vadd.f32 %v5357_v33, %v9632_v40  ;;  %v5422_v33 = vadd.f32 %v5360_v48, %v9295_v27 }
 0x4f1   : > { %v6556_v12 = vadd.f32 %v7739_v41, %v6524_v28  ;;  %v6113_v41 = vadd.f32 %v9471_v26, %v5767_v54  ;;  %v5768_v24 = vadd.f32 %v5704_v62, %v5421_v6  ;;  %v5769_v62 = vadd.f32 %v5707_v51, %v5422_v33  ;;  %v7744_v54 = vld [vmem:[%s8022_s16 + $0xa9] sm:$0xff]  ;;  %v6165_v51 = vld [vmem:[#allocation2 + $0x19a] sm:$0xff] }
 0x4f3   : > { %v6588_v22 = vmax.f32 %v6556_v12, 0.0  ;;  %v7742_v12 = vld [vmem:[%s8022_s16 + $0x91] sm:$0xff]  ;;  %v6114_v26 = vadd.f32 %v9479_v50, %v5768_v24  ;;  %v6115_v27 = vadd.f32 %v9487_v55, %v5769_v62  ;;  %v5424_v55 = vadd.f32 %v5365_v49, %v9314_v7 }
 0x4f4   : > { %v6389_v36 = vpop.f32.mrf.mxu1 }
 0x4f5   : > { %6620 = vst [vmem:[%s9449_s9 + $0x38] sm:$0xff] %v6588_v22  ;;  %v6457_v61 = vadd.f32 %v6389_v36, %v6111_v0  ;;  %v9514_v22 = vpop.f32.mrf.mxu0  ;;  %v5370_v36 = vpop.f32.mrf.mxu2 }
 0x4f7   : > { %v6525_v21 = vadd.f32 %v9439_v35, %v6457_v61  ;;  %6428 = vmatmul.bf16.gmra.mxu1 %v9401_v32  ;;  %v5714_v28 = vpop.f32.mrf.mxu3 }
 0x4f9   : > { %v6557_v39 = vadd.f32 %v7740_v19, %v6525_v21  ;;  %v7743_v21 = vld [vmem:[%s8022_s16 + $0x99] sm:$0xff] }
 0x4fb   : > { %v6589_v1 = vmax.f32 %v6557_v39, 0.0 }
 0x4fc   : > { %v6391_v43 = vpop.f32.mrf.mxu1 }
 0x4fd   : > { %6621 = vst [vmem:[%s9449_s9 + $0x40] sm:$0xff] %v6589_v1  ;;  %v6458_v25 = vadd.f32 %v6391_v43, %v6112_v18  ;;  %v5423_v1 = vadd.f32 %v5362_v11, %v9633_v63  ;;  %v6063_v18 = vpop.f32.mrf.mxu0  ;;  %v5372_v48 = vpop.f32.mrf.mxu2 }
 0x4ff   : > { %v6526_v10 = vadd.f32 %v9439_v35, %v6458_v25  ;;  %v5717_v17 = vpop.f32.mrf.mxu3 }
 0x501   : > { %v6558_v32 = vadd.f32 %v7741_v59, %v6526_v10  ;;  %v5770_v59 = vadd.f32 %v5709_v15, %v5423_v1 }
 0x503   : > { %v6590_v37 = vmax.f32 %v6558_v32, 0.0  ;;  %v6166_v32 = vld [vmem:[#allocation2 + $0x1a2] sm:$0xff]  ;;  %v6116_v6 = vadd.f32 %v9495_v13, %v5770_v59  ;;  %v5425_v13 = vadd.f32 %v5367_v5, %v9327_v31  ;;  %v5426_v31 = vadd.f32 %v5370_v36, %v9333_v52 }
 0x504   : > { %v6394_v42 = vpop.f32.mrf.mxu1  ;;  %v7747_v59 = vld [vmem:[%s8022_s16 + $0xc9] sm:$0xff] }
 0x505   : > { %6622 = vst [vmem:[%s9449_s9 + $0x48] sm:$0xff] %v6590_v37  ;;  %v6459_v45 = vadd.f32 %v6394_v42, %v6113_v41  ;;  %v6197_v41 = vpack.c.bf16 %v6165_v51, %v6165_v51  ;;  %v6198_v42 = vpack.c.bf16 %v6166_v32, %v6166_v32  ;;  %v5375_v24 = vpop.f32.mrf.mxu2 }
 0x507   : > { %v6527_v60 = vadd.f32 %v9439_v35, %v6459_v45  ;;  %6433 = vmatmul.bf16.gmra.mxu1 %v9412_v53  ;;  %v5719_v11 = vpop.f32.mrf.mxu3  ;;  %v6278_v33 = vunpack.c.l.b16 %v6197_v41 }
 0x509   : > { %v6559_v0 = vadd.f32 %v7742_v12, %v6527_v60  ;;  %v6065_v12 = vpop.f32.mrf.mxu0  ;;  %v7745_v60 = vld [vmem:[%s8022_s16 + $0xb1] sm:$0xff] }
 0x50b   : > { %v6591_v61 = vmax.f32 %v6559_v0, 0.0 }
 0x50c   : > { %v6396_v19 = vpop.f32.mrf.mxu1 }
 0x50d   : > { %6623 = vst [vmem:[%s9449_s9 + $0x50] sm:$0xff] %v6591_v61  ;;  %v6460_v9 = vadd.f32 %v6396_v19, %v6114_v26  ;;  %v6279_v61 = vunpack.c.l.b16 %v6198_v42  ;;  %v5377_v1 = vpop.f32.mrf.mxu2 }
 0x50f   : > { %v6528_v39 = vadd.f32 %v9439_v35, %v6460_v9  ;;  %v6295_v19 = vpack.c.b16 %v6279_v61, %v6278_v33  ;;  %v5722_v9 = vpop.f32.mrf.mxu3 }
 0x511   : > { %v6560_v53 = vadd.f32 %v7743_v21, %v6528_v39  ;;  %v7746_v39 = vld [vmem:[%s8022_s16 + $0xc1] sm:$0xff] }
 0x513   : > { %v6592_v43 = vmax.f32 %v6560_v53, 0.0  ;;  %v5772_v53 = vadd.f32 %v5714_v28, %v5425_v13  ;;  %v5429_v13 = vadd.f32 %v5377_v1, %v9361_v57 }
 0x514   : > { %v6399_v25 = vpop.f32.mrf.mxu1 }
 0x515   : > { %6624 = vst [vmem:[%s9449_s9 + $0x58] sm:$0xff] %v6592_v43  ;;  %v6461_v50 = vadd.f32 %v6399_v25, %v6115_v27  ;;  %v5380_v32 = vpop.f32.mrf.mxu2 }
 0x517   : > { %v6529_v10 = vadd.f32 %v9439_v35, %v6461_v50  ;;  %6438 = vmatmul.bf16.gmra.mxu1 %v9423_v14  ;;  %v5771_v14 = vadd.f32 %v5712_v8, %v5424_v55  ;;  %v6068_v8 = vpop.f32.mrf.mxu0  ;;  %v5724_v50 = vpop.f32.mrf.mxu3  ;;  %v7748_v55 = vld [vmem:[%s8022_s16 + $0xd9] sm:$0xff] }
 0x519   : > { %v6561_v40 = vadd.f32 %v7744_v54, %v6529_v10  ;;  %v6117_v49 = vadd.f32 %v9505_v2, %v5771_v14  ;;  %v6118_v2 = vadd.f32 %v9514_v22, %v5772_v53  ;;  %v5773_v54 = vadd.f32 %v5717_v17, %v5426_v31  ;;  %v7751_v31 = vld [vmem:[%s8022_s16 + $0xf9] sm:$0xff] }
 0x51a   : > { %v5430_v53 = vadd.f32 %v5380_v32, %v9367_v44  ;;  %v7752_v32 = vld [vmem:[%s8022_s16 + $0x109] sm:$0xff] }
 0x51b   : > { %v6593_v37 = vmax.f32 %v6561_v40, 0.0  ;;  %v5427_v40 = vadd.f32 %v5372_v48, %v9344_v4  ;;  %v6119_v52 = vadd.f32 %v6063_v18, %v5773_v54 }
 0x51c   : > { %v6401_v45 = vpop.f32.mrf.mxu1 }
 0x51d   : > { %6625 = vst [vmem:[%s9449_s9 + $0x60] sm:$0xff] %v6593_v37  ;;  %v6462_v15 = vadd.f32 %v6401_v45, %v6116_v6  ;;  %v5774_v37 = vadd.f32 %v5719_v11, %v5427_v40  ;;  %v5428_v45 = vadd.f32 %v5375_v24, %v9350_v47  ;;  %v5382_v4 = vpop.f32.mrf.mxu2 }
 0x51f   : > { %v6530_v0 = vadd.f32 %v9439_v35, %v6462_v15  ;;  %v6070_v10 = vpop.f32.mrf.mxu0  ;;  %v5727_v42 = vpop.f32.mrf.mxu3  ;;  %v6120_v14 = vadd.f32 %v6065_v12, %v5774_v37  ;;  %v5775_v33 = vadd.f32 %v5722_v9, %v5428_v45 }
 0x521   : > { %v6562_v26 = vadd.f32 %v7745_v60, %v6530_v0  ;;  %v7749_v0 = vld [vmem:[%s8022_s16 + $0xe1] sm:$0xff]  ;;  %v6121_v47 = vadd.f32 %v6068_v8, %v5775_v33 }
 0x523   : > { %v6594_v7 = vmax.f32 %v6562_v26, 0.0 }
 0x524   : > { %v6404_v21 = vpop.f32.mrf.mxu1 }
 0x525   : > { %6626 = vst [vmem:[%s9449_s9 + $0x68] sm:$0xff] %v6594_v7  ;;  %v6463_v62 = vadd.f32 %v6404_v21, %v6117_v49  ;;  %v7750_v21 = vld [vmem:[%s8022_s16 + $0xf1] sm:$0xff] }
 0x527   : > { %v6531_v63 = vadd.f32 %v9439_v35, %v6463_v62  ;;  %6443 = vmatmul.bf16.gmra.mxu1 %v6295_v19  ;;  %v6073_v15 = vpop.f32.mrf.mxu0  ;;  %v5729_v26 = vpop.f32.mrf.mxu3  ;;  %v5776_v62 = vadd.f32 %v5724_v50, %v5429_v13 }
 0x528   : > { %v5385_v19 = vpop.f32.mrf.mxu2 }
 0x529   : > { %v6563_v43 = vadd.f32 %v7746_v39, %v6531_v63 }
 0x52b   : > { %v6595_v5 = vmax.f32 %v6563_v43, 0.0  ;;  %v6122_v43 = vadd.f32 %v6070_v10, %v5776_v62 }
 0x52c   : > { %v6406_v27 = vpop.f32.mrf.mxu1 }
 0x52d   : > { %6627 = vst [vmem:[%s9449_s9 + $0x70] sm:$0xff] %v6595_v5  ;;  %v6464_v25 = vadd.f32 %v6406_v27, %v6118_v2  ;;  %v5777_v5 = vadd.f32 %v5727_v42, %v5430_v53 }
 0x52f   : > { %v6532_v28 = vadd.f32 %v9439_v35, %v6464_v25  ;;  %v6075_v49 = vpop.f32.mrf.mxu0  ;;  %v5732_v57 = vpop.f32.mrf.mxu3  ;;  %v6123_v44 = vadd.f32 %v6073_v15, %v5777_v5  ;;  %v7756_v5 = vld [vmem:[%s8022_s16 + $0x139] sm:$0xff] }
 0x530   : > { %v5387_v25 = vpop.f32.mrf.mxu2 }
 0x531   : > { %v6564_v51 = vadd.f32 %v7747_v59, %v6532_v28  ;;  %v5431_v59 = vadd.f32 %v5382_v4, %v9378_v34  ;;  %v5433_v4 = vadd.f32 %v5387_v25, %v9395_v56 }
 0x533   : > { %v6596_v6 = vmax.f32 %v6564_v51, 0.0  ;;  %v5778_v40 = vadd.f32 %v5729_v26, %v5431_v59 }
 0x534   : > { %v6409_v36 = vpop.f32.mrf.mxu1 }
 0x535   : > { %6628 = vst [vmem:[%s9449_s9 + $0x78] sm:$0xff] %v6596_v6  ;;  %v6465_v22 = vadd.f32 %v6409_v36, %v6119_v52  ;;  %v6124_v34 = vadd.f32 %v6075_v49, %v5778_v40 }
 0x537   : > { %v6533_v41 = vadd.f32 %v9439_v35, %v6465_v22  ;;  %v6078_v2 = vpop.f32.mrf.mxu0  ;;  %v5734_v51 = vpop.f32.mrf.mxu3 }
 0x538   : > { %v5390_v22 = vpop.f32.mrf.mxu2  ;;  %v5780_v26 = vadd.f32 %v5734_v51, %v5433_v4 }
 0x539   : > { %v6565_v17 = vadd.f32 %v7748_v55, %v6533_v41  ;;  %v5432_v55 = vadd.f32 %v5385_v19, %v9384_v16 }
 0x53b   : > { %v6597_v60 = vmax.f32 %v6565_v17, 0.0  ;;  %v7753_v17 = vld [vmem:[%s8022_s16 + $0x111] sm:$0xff]  ;;  %v5779_v45 = vadd.f32 %v5732_v57, %v5432_v55 }
 0x53c   : > { %v6411_v48 = vpop.f32.mrf.mxu1 }
 0x53d   : > { %6629 = vst [vmem:[%s9449_s9 + $0x80] sm:$0xff] %v6597_v60  ;;  %v6466_v18 = vadd.f32 %v6411_v48, %v6120_v14 }
 0x53f   : > { %v6534_v61 = vadd.f32 %v9439_v35, %v6466_v18  ;;  %v6080_v52 = vpop.f32.mrf.mxu0  ;;  %v5737_v60 = vpop.f32.mrf.mxu3 }
 0x540   : > { %v5392_v16 = vpop.f32.mrf.mxu2  ;;  %v6126_v56 = vadd.f32 %v6080_v52, %v5780_v26 }
 0x541   : > { %v6566_v11 = vadd.f32 %v7749_v0, %v6534_v61  ;;  %v6125_v0 = vadd.f32 %v6078_v2, %v5779_v45 }
 0x543   : > { %v6598_v7 = vmax.f32 %v6566_v11, 0.0  ;;  %v7754_v11 = vld [vmem:[%s8022_s16 + $0x121] sm:$0xff] }
 0x544   : > { %v6414_v24 = vpop.f32.mrf.mxu1 }
 0x545   : > { %6630 = vst [vmem:[%s9449_s9 + $0x88] sm:$0xff] %v6598_v7  ;;  %v6467_v12 = vadd.f32 %v6414_v24, %v6121_v47  ;;  %v5434_v24 = vadd.f32 %v5390_v22, %v9398_v29 }
 0x547   : > { %v6535_v39 = vadd.f32 %v9439_v35, %v6467_v12  ;;  %v6083_v48 = vpop.f32.mrf.mxu0  ;;  %v5739_v47 = vpop.f32.mrf.mxu3 }
 0x548   : > { %v5395_v62 = vpop.f32.mrf.mxu2 }
 0x549   : > { %v6567_v9 = vadd.f32 %v7750_v21, %v6535_v39  ;;  %v7755_v39 = vld [vmem:[%s8022_s16 + $0x129] sm:$0xff] }
 0x54b   : > { %v6599_v63 = vmax.f32 %v6567_v9, 0.0  ;;  %v5781_v9 = vadd.f32 %v5737_v60, %v5434_v24 }
 0x54c   : > { %v6416_v1 = vpop.f32.mrf.mxu1 }
 0x54d   : > { %6631 = vst [vmem:[%s9449_s9 + $0x90] sm:$0xff] %v6599_v63  ;;  %v6468_v8 = vadd.f32 %v6416_v1, %v6122_v43  ;;  %v5435_v43 = vadd.f32 %v5392_v16, %v9406_v30  ;;  %v6127_v1 = vadd.f32 %v6083_v48, %v5781_v9 }
 0x54f   : > { %v6536_v27 = vadd.f32 %v9439_v35, %v6468_v8  ;;  %v6085_v19 = vpop.f32.mrf.mxu0  ;;  %v5742_v29 = vpop.f32.mrf.mxu3  ;;  %v5782_v2 = vadd.f32 %v5739_v47, %v5435_v43 }
 0x551   : > { %v6568_v50 = vadd.f32 %v7751_v31, %v6536_v27  ;;  %v6128_v30 = vadd.f32 %v6085_v19, %v5782_v2  ;;  %v7760_v19 = vld [vmem:[%s8022_s16 + $0x169] sm:$0xff] }
 0x553   : > { %v6600_v54 = vmax.f32 %v6568_v50, 0.0  ;;  %v5397_v50 = vpop.f32.mrf.mxu2 }
 0x554   : > { %v6419_v28 = vpop.f32.mrf.mxu1  ;;  %v5437_v55 = vadd.f32 %v5397_v50, %v9417_v3 }
 0x555   : > { %6632 = vst [vmem:[%s9449_s9 + $0x98] sm:$0xff] %v6600_v54  ;;  %v6469_v10 = vadd.f32 %v6419_v28, %v6123_v44  ;;  %v5436_v54 = vadd.f32 %v5395_v62, %v9409_v20 }
 0x557   : > { %v6537_v6 = vadd.f32 %v9439_v35, %v6469_v10  ;;  %v6088_v27 = vpop.f32.mrf.mxu0  ;;  %v5744_v51 = vpop.f32.mrf.mxu3  ;;  %v5783_v40 = vadd.f32 %v5742_v29, %v5436_v54  ;;  %v7761_v29 = vld [vmem:[%s8022_s16 + $0x171] sm:$0xff] }
 0x559   : > { %v6569_v36 = vadd.f32 %v7752_v32, %v6537_v6  ;;  %v7757_v32 = vld [vmem:[%s8022_s16 + $0x141] sm:$0xff]  ;;  %v6129_v20 = vadd.f32 %v6088_v27, %v5783_v40 }
 0x55b   : > { %v6601_v37 = vmax.f32 %v6569_v36, 0.0  ;;  %v5400_v22 = vpop.f32.mrf.mxu2 }
 0x55c   : > { %v6421_v41 = vpop.f32.mrf.mxu1  ;;  %v5438_v4 = vadd.f32 %v5400_v22, %v9420_v58 }
 0x55d   : > { %6633 = vst [vmem:[%s9449_s9 + $0xa0] sm:$0xff] %v6601_v37  ;;  %v6470_v42 = vadd.f32 %v6421_v41, %v6124_v34 }
 0x55f   : > { %v6538_v15 = vadd.f32 %v9439_v35, %v6470_v42  ;;  %v6090_v52 = vpop.f32.mrf.mxu0  ;;  %v7758_v42 = vld [vmem:[%s8022_s16 + $0x151] sm:$0xff] }
 0x561   : > { %v6570_v14 = vadd.f32 %v7753_v17, %v6538_v15  ;;  %v5784_v17 = vadd.f32 %v5744_v51, %v5437_v55  ;;  %v5747_v15 = vpop.f32.mrf.mxu3 }
 0x563   : > { %v6602_v18 = vmax.f32 %v6570_v14, 0.0  ;;  %v5402_v3 = vpop.f32.mrf.mxu2 }
 0x564   : > { %v6424_v33 = vpop.f32.mrf.mxu1 }
 0x565   : > { %6634 = vst [vmem:[%s9449_s9 + $0xa8] sm:$0xff] %v6602_v18  ;;  %v6471_v61 = vadd.f32 %v6424_v33, %v6125_v0  ;;  %v6130_v18 = vadd.f32 %v6090_v52, %v5784_v17  ;;  %v7759_v33 = vld [vmem:[%s8022_s16 + $0x159] sm:$0xff] }
 0x567   : > { %v6539_v13 = vadd.f32 %v9439_v35, %v6471_v61  ;;  %v6093_v14 = vpop.f32.mrf.mxu0  ;;  %v5785_v61 = vadd.f32 %v5747_v15, %v5438_v4 }
 0x569   : > { %v6571_v7 = vadd.f32 %v7754_v11, %v6539_v13  ;;  %v5749_v13 = vpop.f32.mrf.mxu3  ;;  %v6131_v24 = vadd.f32 %v6093_v14, %v5785_v61 }
 0x56b   : > { %v6603_v49 = vmax.f32 %v6571_v7, 0.0  ;;  %v5439_v7 = vadd.f32 %v5402_v3, %v9427_v38 }
 0x56c   : > { %v6426_v12 = vpop.f32.mrf.mxu1 }
 0x56d   : > { %6635 = vst [vmem:[%s9449_s9 + $0xb0] sm:$0xff] %v6603_v49  ;;  %v6472_v21 = vadd.f32 %v6426_v12, %v6126_v56  ;;  %v5405_v12 = vpop.f32.mrf.mxu2 }
 0x56f   : > { %v6540_v53 = vadd.f32 %v9439_v35, %v6472_v21  ;;  %v6095_v56 = vpop.f32.mrf.mxu0  ;;  %v5786_v21 = vadd.f32 %v5749_v13, %v5439_v7 }
 0x571   : > { %v6572_v63 = vadd.f32 %v7755_v39, %v6540_v53  ;;  %v5752_v9 = vpop.f32.mrf.mxu3  ;;  %v5440_v53 = vadd.f32 %v5405_v12, %v9430_v23  ;;  %v6132_v38 = vadd.f32 %v6095_v56, %v5786_v21 }
 0x573   : > { %v6604_v57 = vmax.f32 %v6572_v63, 0.0 }
 0x574   : > { %v6429_v8 = vpop.f32.mrf.mxu1 }
 0x575   : > { %6636 = vst [vmem:[%s9449_s9 + $0xb8] sm:$0xff] %v6604_v57  ;;  %v6473_v31 = vadd.f32 %v6429_v8, %v6127_v1  ;;  %v5787_v8 = vadd.f32 %v5752_v9, %v5440_v53 }
 0x577   : > { %v6541_v25 = vadd.f32 %v9439_v35, %v6473_v31  ;;  %v6098_v1 = vpop.f32.mrf.mxu0 }
 0x578   : > { %v6133_v27 = vadd.f32 %v6098_v1, %v5787_v8 }
 0x579   : > { %v6573_v59 = vadd.f32 %v7756_v5, %v6541_v25  ;;  %v5407_v5 = vpop.f32.mrf.mxu2  ;;  %v5754_v50 = vpop.f32.mrf.mxu3 }
 0x57a   : > { %v5441_v25 = vadd.f32 %v5407_v5, %v9434_v46 }
 0x57b   : > { %v6605_v44 = vmax.f32 %v6573_v59, 0.0 }
 0x57c   : > { %v6431_v28 = vpop.f32.mrf.mxu1 }
 0x57d   : > { %6637 = vst [vmem:[%s9449_s9 + $0xc0] sm:$0xff] %v6605_v44  ;;  %v6474_v10 = vadd.f32 %v6431_v28, %v6128_v30  ;;  %v7762_v44 = vld [vmem:[%s8022_s16 + $0x181] sm:$0xff]  ;;  %v5788_v30 = vadd.f32 %v5754_v50, %v5441_v25 }
 0x57f   : > { %v6542_v6 = vadd.f32 %v9439_v35, %v6474_v10  ;;  %v6100_v10 = vpop.f32.mrf.mxu0 }
 0x581   : > { %v6574_v36 = vadd.f32 %v7757_v32, %v6542_v6  ;;  %v6134_v32 = vadd.f32 %v6100_v10, %v5788_v30 }
 0x583   : > { %v6606_v37 = vmax.f32 %v6574_v36, 0.0  ;;  %v7763_v36 = vld [vmem:[%s8022_s16 + $0x189] sm:$0xff] }
 0x584   : > { %v6434_v34 = vpop.f32.mrf.mxu1 }
 0x585   : > { %6638 = vst [vmem:[%s9449_s9 + $0xc8] sm:$0xff] %v6606_v37  ;;  %v6475_v41 = vadd.f32 %v6434_v34, %v6129_v20 }
 0x587   : > { %v6543_v45 = vadd.f32 %v9439_v35, %v6475_v41 }
 0x589   : > { %v6575_v60 = vadd.f32 %v7758_v42, %v6543_v45 }
 0x58b   : > { %v6607_v48 = vmax.f32 %v6575_v60, 0.0 }
 0x58c   : > { %v6436_v0 = vpop.f32.mrf.mxu1 }
 0x58d   : > { %6639 = vst [vmem:[%s9449_s9 + $0xd0] sm:$0xff] %v6607_v48  ;;  %v6476_v16 = vadd.f32 %v6436_v0, %v6130_v18 }
 0x58f   : > { %v6544_v11 = vadd.f32 %v9439_v35, %v6476_v16 }
 0x591   : > { %v6576_v26 = vadd.f32 %v7759_v33, %v6544_v11 }
 0x593   : > { %v6608_v47 = vmax.f32 %v6576_v26, 0.0 }
 0x594   : > { %v6439_v58 = vpop.f32.mrf.mxu1 }
 0x595   : > { %6640 = vst [vmem:[%s9449_s9 + $0xd8] sm:$0xff] %v6608_v47  ;;  %v6477_v49 = vadd.f32 %v6439_v58, %v6131_v24 }
 0x597   : > { %v6545_v62 = vadd.f32 %v9439_v35, %v6477_v49 }
 0x599   : > { %v6577_v39 = vadd.f32 %v7760_v19, %v6545_v62 }
 0x59b   : > { %v6609_v63 = vmax.f32 %v6577_v39, 0.0 }
 0x59c   : > { %v6441_v43 = vpop.f32.mrf.mxu1 }
 0x59d   : > { %6641 = vst [vmem:[%s9449_s9 + $0xe0] sm:$0xff] %v6609_v63  ;;  %v6478_v57 = vadd.f32 %v6441_v43, %v6132_v38 }
 0x59f   : > { %v6546_v31 = vadd.f32 %v9439_v35, %v6478_v57 }
 0x5a1   : > { %v6578_v2 = vadd.f32 %v7761_v29, %v6546_v31 }
 0x5a3   : > { %v6610_v23 = vmax.f32 %v6578_v2, 0.0 }
 0x5a4   : > { %v6444_v59 = vpop.f32.mrf.mxu1 }
 0x5a5   : > { %6642 = vst [vmem:[%s9449_s9 + $0xe8] sm:$0xff] %v6610_v23  ;;  %v6479_v54 = vadd.f32 %v6444_v59, %v6133_v27 }
 0x5a7   : > { %v6547_v28 = vadd.f32 %v9439_v35, %v6479_v54 }
 0x5a9   : > { %v6579_v51 = vadd.f32 %v7762_v44, %v6547_v28 }
 0x5ab   : > { %v6611_v40 = vmax.f32 %v6579_v51, 0.0 }
 0x5ac   : > { %v6446_v6 = vpop.f32.mrf.mxu1 }
 0x5ad   : > { %6643 = vst [vmem:[%s9449_s9 + $0xf0] sm:$0xff] %v6611_v40  ;;  %v6480_v52 = vadd.f32 %v6446_v6, %v6134_v32 }
 0x5af   : > { %v6548_v46 = vadd.f32 %v9439_v35, %v6480_v52 }
 0x5b1   : > { %v6580_v22 = vadd.f32 %v7763_v36, %v6548_v46 }
 0x5b3   : > { %v6612_v55 = vmax.f32 %v6580_v22, 0.0 }
 0x5b5   : > { %6644 = vst [vmem:[%s9449_s9 + $0xf8] sm:$0xff] %v6612_v55 }
 0x5b6 PF: > { %s15_s18 = sadd.s32 1, %s7948_s18  }
 0x5b7   : > { %p12_p4 = scmp.ge.s32.totalorder %s15_s18, 4  }
 0x5b9   :  { %14 = sbr.rel (!%p12_p4) target bundleno = 1 (0x1), region = 90 }

</bundles_post_ra>
